<compile_context>
chip_gen: v7x
topology: tpu7x:2x2x1
jax: 0.10.0
libtpu: 0.0.40
codegen_flags: <defaults>
</compile_context>

<pallas_src>
import functools

import jax
import jax.numpy as jnp
from jax.experimental import pallas as pl
from jax.experimental.pallas import tpu as pltpu

EPS = 1e-5
_PAD_L = 8   # left halo width of the stage-2 scratch (keeps the interior store sublane-aligned)

_COMPILER_PARAMS = pltpu.CompilerParams(
    dimension_semantics=("parallel",),      # batch-image grid -> megacore sharding on v7x
    vmem_limit_bytes=48 * 1024 * 1024,      # headroom below v7x's 64-MiB physical VMEM
)


# --------------------------------------------------------------------------
# small helpers shared by the kernels / wrapper
# --------------------------------------------------------------------------
def _stats8(a):
    """Per-channel [sum; sum_sq; 0; ...] over rows of (M, C), padded to 8 sublanes."""
    c = a.shape[1]
    s1 = jnp.sum(a, axis=0, keepdims=True)
    s2 = jnp.sum(a * a, axis=0, keepdims=True)
    return jnp.concatenate([s1, s2, jnp.zeros((6, c), jnp.float32)], axis=0)   # (8, C)


def _finalize_bn(stats, count, gamma, beta):
    """Reduce per-image partial stats (N, 8, C) to a fused BN affine (scale, shift)."""
    tot = jnp.sum(stats, axis=0)                       # (8, C); rows 2..7 are zero pad
    mean = tot[0] / count
    var = tot[1] / count - mean * mean                 # biased variance (PyTorch BN)
    scale = gamma * jax.lax.rsqrt(var + EPS)           # (1, C)
    shift = beta - mean * scale                        # (1, C)
    return scale, shift


# --------------------------------------------------------------------------
# stage 1: 1x1 conv (f[0]) + partial BN1 statistics
# --------------------------------------------------------------------------
def _make_conv1x1_stats_kernel(H, W, Cin, C1):
    M = H * W

    def kernel(x_ref, w_ref, a_ref, st_ref):
        x = x_ref[...].reshape(M, Cin).astype(jnp.bfloat16)      # bf16 MXU operand
        a = jnp.dot(x, w_ref[...], preferred_element_type=jnp.float32)
        st_ref[...] = _stats8(a)                                 # stats from the f32 accumulator
        a_ref[...] = a.reshape(H, W, C1).astype(jnp.bfloat16)    # bf16 inter-stage store

    return kernel


# --------------------------------------------------------------------------
# stage 2: fused BN1+ReLU (f[1:3]) -> 3x3 conv (f[3]) via a zero-bordered
#          VMEM scratch + 9 static-window matmuls, + partial BN2 statistics
# --------------------------------------------------------------------------
def _make_conv3x3_kernel(H, W, C1):
    M = H * W

    def kernel(a_ref, sc_ref, sh_ref, w2_ref, o_ref, st_ref, pad_ref):
        # Zero the padded scratch each step (cheap; keeps the halo valid no
        # matter how the "parallel" batch axis is sharded across cores).
        pad_ref[...] = jnp.zeros_like(pad_ref)

        # BN1 folded to a single f32 FMA + ReLU, then one sublane-aligned
        # store into the interior of the zero-bordered scratch.
        h = jnp.maximum(a_ref[...].astype(jnp.float32) * sc_ref[...] + sh_ref[...], 0.0)
        pad_ref[1:H + 1, _PAD_L:_PAD_L + W, :] = h

        # 3x3 conv = 9 static-window matmuls accumulated in f32 (no concats,
        # no lane-axis relayouts).
        acc = jnp.zeros((M, C1), jnp.float32)
        for ky in range(3):
            for kx in range(3):
                off = _PAD_L - 1 + kx
                win = pad_ref[ky:ky + H, off:off + W, :]
                lhs = win.reshape(M, C1).astype(jnp.bfloat16)
                acc = acc + jnp.dot(lhs, w2_ref[3 * ky + kx],
                                    preferred_element_type=jnp.float32)

        st_ref[...] = _stats8(acc)
        o_ref[...] = acc.reshape(H, W, C1).astype(jnp.bfloat16)

    return kernel


# --------------------------------------------------------------------------
# stage 3: fused BN2+ReLU (f[4:6]) -> 1x1 conv (f[6]) + residual/projection,
#          + partial BN3 statistics
# --------------------------------------------------------------------------
def _make_conv1x1_residual_kernel(H, W, C1, Cin, Cout, identity):
    M = H * W

    def _bn_relu_bf16(a_ref, sc_ref, sh_ref):
        h = jnp.maximum(a_ref[...].astype(jnp.float32) * sc_ref[...] + sh_ref[...], 0.0)
        return h.reshape(M, C1).astype(jnp.bfloat16)

    if identity:
        def kernel(a_ref, sc_ref, sh_ref, w3_ref, x_ref, s_ref, st_ref):
            hb = _bn_relu_bf16(a_ref, sc_ref, sh_ref)
            fx = jnp.dot(hb, w3_ref[...], preferred_element_type=jnp.float32)
            s = fx + x_ref[...].reshape(M, Cout)                 # identity residual
            st_ref[...] = _stats8(s)
            s_ref[...] = s.reshape(H, W, Cout).astype(jnp.bfloat16)
    else:
        def kernel(a_ref, sc_ref, sh_ref, w3_ref, x_ref, wp_ref, s_ref, st_ref):
            hb = _bn_relu_bf16(a_ref, sc_ref, sh_ref)
            fx = jnp.dot(hb, w3_ref[...], preferred_element_type=jnp.float32)
            xb = x_ref[...].reshape(M, Cin).astype(jnp.bfloat16)
            res = jnp.dot(xb, wp_ref[...], preferred_element_type=jnp.float32)
            s = fx + res
            st_ref[...] = _stats8(s)
            s_ref[...] = s.reshape(H, W, Cout).astype(jnp.bfloat16)

    return kernel


# --------------------------------------------------------------------------
# stage 4: final BN + ReLU (lightweight elementwise pass, reads bf16 s)
# --------------------------------------------------------------------------
def _final_bn_relu_kernel(s_ref, sc_ref, sh_ref, y_ref):
    # TODO(synk): in a full network, fuse this BN+ReLU into the consumer's
    # (next block's stage-1) load and delete this pass entirely.
    y_ref[...] = jnp.maximum(
        s_ref[...].astype(jnp.float32) * sc_ref[...] + sh_ref[...], 0.0)


# --------------------------------------------------------------------------
# wrapper
# --------------------------------------------------------------------------
@functools.partial(jax.jit, static_argnames=("stride",))
def bottleneck_block_pallas(x, params, stride=1):
    # x: (N, H, W, Cin) float32 (NHWC)
    if stride > 1:
        # TODO(synk): fold the stride-s subsample into stage-1/3's input read
        # (strided pl.ds index_map) instead of this extra XLA gather.
        x = x[:, ::stride, ::stride, :]
    N, H, W, Cin = x.shape
    C1 = params["w1"].shape[1]
    Cout = params["w3"].shape[1]
    identity = (Cin == Cout)
    count = N * H * W

    bf16 = jnp.bfloat16
    w1 = params["w1"].astype(bf16)                        # (Cin, C1)
    w2 = params["w2"].astype(bf16).reshape(9, C1, C1)     # (ky,kx,ci,co) -> (9, C1, C1)
    w3 = params["w3"].astype(bf16)                        # (C1, Cout)

    # TODO(synk): for real ResNet widths with C1 % 128 != 0, consider zero-
    # padding the channel axis to 128 (lane-dense stores) traded against the
    # extra HBM traffic of this memory-bound block.
    # TODO(synk): on v7x / small batch, add a spatial grid axis (N, H//TH)
    # (stage 2 needing a 1-row halo) so both TensorCores are fed.
    img = lambda C: pl.BlockSpec((None, H, W, C), lambda n: (n, 0, 0, 0))
    stat = lambda C: pl.BlockSpec((None, 8, C), lambda n: (n, 0, 0))
    full = lambda a: pl.BlockSpec(a.shape, lambda n: (0,) * a.ndim)

    # ---- stage 1: 1x1 conv + BN1 partial stats (bf16 activation out) ------
    a1, st1 = pl.pallas_call(
        _make_conv1x1_stats_kernel(H, W, Cin, C1),
        grid=(N,),
        in_specs=[img(Cin), full(w1)],
        out_specs=(img(C1), stat(C1)),
        out_shape=(jax.ShapeDtypeStruct((N, H, W, C1), bf16),
                   jax.ShapeDtypeStruct((N, 8, C1), jnp.float32)),
        compiler_params=_COMPILER_PARAMS,
    )(x, w1)
    sc1, sh1 = _finalize_bn(st1, count, params["g1"], params["be1"])

    # ---- stage 2: BN1+ReLU fused, 3x3 conv (padded scratch), BN2 stats ----
    a2, st2 = pl.pallas_call(
        _make_conv3x3_kernel(H, W, C1),
        grid=(N,),
        in_specs=[img(C1), full(sc1), full(sh1), full(w2)],
        out_specs=(img(C1), stat(C1)),
        out_shape=(jax.ShapeDtypeStruct((N, H, W, C1), bf16),
                   jax.ShapeDtypeStruct((N, 8, C1), jnp.float32)),
        scratch_shapes=[pltpu.VMEM((H + 2, W + _PAD_L + 1, C1), jnp.float32)],
        compiler_params=_COMPILER_PARAMS,
    )(a1, sc1, sh1, w2)
    sc2, sh2 = _finalize_bn(st2, count, params["g2"], params["be2"])

    # ---- stage 3: BN2+ReLU fused, 1x1 conv, residual add, BN3 stats -------
    in_specs3 = [img(C1), full(sc2), full(sh2), full(w3), img(Cin)]
    args3 = [a2, sc2, sh2, w3, x]
    if not identity:
        wp = params["wp"].astype(bf16)                    # projection weight only when needed
        in_specs3.append(full(wp))
        args3.append(wp)
    s, st3 = pl.pallas_call(
        _make_conv1x1_residual_kernel(H, W, C1, Cin, Cout, identity),
        grid=(N,),
        in_specs=in_specs3,
        out_specs=(img(Cout), stat(Cout)),
        out_shape=(jax.ShapeDtypeStruct((N, H, W, Cout), bf16),
                   jax.ShapeDtypeStruct((N, 8, Cout), jnp.float32)),
        compiler_params=_COMPILER_PARAMS,
    )(*args3)
    sc3, sh3 = _finalize_bn(st3, count, params["go"], params["bo"])

    # ---- stage 4: final BN + ReLU (f32 block output) -----------------------
    y = pl.pallas_call(
        _final_bn_relu_kernel,
        grid=(N,),
        in_specs=[img(Cout), full(sc3), full(sh3)],
        out_specs=img(Cout),
        out_shape=jax.ShapeDtypeStruct((N, H, W, Cout), jnp.float32),
        compiler_params=_COMPILER_PARAMS,
    )(s, sc3, sh3)
    return y


# --------------------------------------------------------------------------
# pure-JAX reference (full module semantics incl. conv biases; mirrors the
# kernel's bf16 MXU operands and bf16 inter-stage activation storage)
# --------------------------------------------------------------------------
def bottleneck_block_ref(x, params, stride=1):
    xs = x[:, ::stride, ::stride, :] if stride > 1 else x
    bf16 = jnp.bfloat16

    def mm(a, w):
        return jnp.einsum("nhwc,cd->nhwd", a.astype(bf16), w.astype(bf16),
                          preferred_element_type=jnp.float32)

    def bn_relu(a32, g, b):
        # BN stats from the f32 activation; normalization applied to the
        # bf16-rounded activation (mirrors the kernel's bf16 inter-stage store).
        m = a32.mean(axis=(0, 1, 2), keepdims=True)
        v = ((a32 - m) ** 2).mean(axis=(0, 1, 2), keepdims=True)
        scale = g * jax.lax.rsqrt(v + EPS)
        shift = b - m * scale
        a16 = a32.astype(bf16).astype(jnp.float32)
        return jnp.maximum(a16 * scale + shift, 0.0)

    h = bn_relu(mm(xs, params["w1"]) + params["b1"], params["g1"], params["be1"])
    N, Ho, Wo, C1 = h.shape
    hp = jnp.pad(h, ((0, 0), (1, 1), (1, 1), (0, 0)))
    acc = jnp.zeros((N, Ho, Wo, C1), jnp.float32) + params["b2"]
    for ky in range(3):
        for kx in range(3):
            acc = acc + mm(hp[:, ky:ky + Ho, kx:kx + Wo, :], params["w2"][ky, kx])
    h = bn_relu(acc, params["g2"], params["be2"])
    fx = mm(h, params["w3"]) + params["b3"]
    Cin, Cout = x.shape[-1], fx.shape[-1]
    res = xs if Cin == Cout else mm(xs, params["wp"]) + params["bp"]
    return bn_relu(res + fx, params["go"], params["bo"])


def init_params(key, cin, c1, cout):
    ks = jax.random.split(key, 8)
    f32 = jnp.float32
    return {
        # conv weights stored as (Cin, Cout); equivalent to PyTorch (Cout, Cin, 1, 1).T
        "w1": jax.random.normal(ks[0], (cin, c1), f32) * 0.1,
        "b1": jax.random.normal(ks[1], (1, c1), f32) * 0.1,
        "g1": jnp.ones((1, c1), f32), "be1": jnp.zeros((1, c1), f32),
        # 3x3 conv weight: (ky, kx, Cin, Cout)
        "w2": jax.random.normal(ks[2], (3, 3, c1, c1), f32) * 0.1,
        "b2": jax.random.normal(ks[3], (1, c1), f32) * 0.1,
        "g2": jnp.ones((1, c1), f32), "be2": jnp.zeros((1, c1), f32),
        "w3": jax.random.normal(ks[4], (c1, cout), f32) * 0.1,
        "b3": jax.random.normal(ks[5], (1, cout), f32) * 0.1,
        "wp": jax.random.normal(ks[6], (cin, cout), f32) * 0.1,
        "bp": jax.random.normal(ks[7], (1, cout), f32) * 0.1,
        "go": jnp.ones((1, cout), f32), "bo": jnp.zeros((1, cout), f32),
    }


if __name__ == "__main__":
    key = jax.random.PRNGKey(0)
    kx_, kp1, kp2 = jax.random.split(key, 3)

    N, H, W = 2, 16, 16

    # case 1: in_channels != out_channels -> projection residual branch
    Cin, C1, Cout = 4, 8, 16
    x = jax.random.normal(kx_, (N, H, W, Cin), jnp.float32)
    params = init_params(kp1, Cin, C1, Cout)
    out = jax.block_until_ready(bottleneck_block_pallas(x, params, stride=1))
    ref = bottleneck_block_ref(x, params, stride=1)
    assert out.shape == (N, H, W, Cout)
    assert jnp.allclose(out, ref, atol=2e-2, rtol=2e-2), "projection-branch mismatch"

    # case 2: in_channels == out_channels -> identity residual branch
    Cin2, C12, Cout2 = 8, 8, 8
    x2 = jax.random.normal(kx_, (N, H, W, Cin2), jnp.float32)
    params2 = init_params(kp2, Cin2, C12, Cout2)
    out2 = jax.block_until_ready(bottleneck_block_pallas(x2, params2, stride=1))
    ref2 = bottleneck_block_ref(x2, params2, stride=1)
    assert jnp.allclose(out2, ref2, atol=2e-2, rtol=2e-2), "identity-branch mismatch"

    print("KERNEL_OK")
</pallas_src>

<mosaic_0001>
module attributes {stable_mosaic.version = 11 : i64} {
  func.func @kernel(%arg0: i32, %arg1: memref<1x16x16x4xf32, #tpu.memory_space<vmem>>, %arg2: memref<4x8xbf16, #tpu.memory_space<vmem>>, %arg3: memref<1x16x16x8xbf16, #tpu.memory_space<vmem>>, %arg4: memref<1x8x8xf32, #tpu.memory_space<vmem>>) attributes {dimension_semantics = [#tpu.dimension_semantics<parallel>], iteration_bounds = array<i64: 2>, scalar_prefetch = 0 : i64, scratch_operands = 0 : i64, tpu.core_type = #tpu.core_type<tc>, window_params = [{transform_indices = @transform_0, window_bounds = array<i64: 1, 16, 16, 4>}, {pipeline_mode = #tpu.pipeline_mode<synchronous>, transform_indices = @transform_1, window_bounds = array<i64: 4, 8>}, {transform_indices = @transform_2, window_bounds = array<i64: 1, 16, 16, 8>}, {transform_indices = @transform_3, window_bounds = array<i64: 1, 8, 8>}]} {
    %c0 = arith.constant 0 : index
    %c0_0 = arith.constant 0 : index
    %c0_1 = arith.constant 0 : index
    %c0_2 = arith.constant 0 : index
    %0 = vector.load %arg1[%c0, %c0_0, %c0_1, %c0_2] : memref<1x16x16x4xf32, #tpu.memory_space<vmem>>, vector<1x16x16x4xf32>
    %1 = vector.shape_cast %0 : vector<1x16x16x4xf32> to vector<16x16x4xf32>
    %2 = vector.shape_cast %1 : vector<16x16x4xf32> to vector<256x4xf32>
    %3 = arith.truncf %2 : vector<256x4xf32> to vector<256x4xbf16>
    %c0_3 = arith.constant 0 : index
    %c0_4 = arith.constant 0 : index
    %4 = vector.load %arg2[%c0_3, %c0_4] : memref<4x8xbf16, #tpu.memory_space<vmem>>, vector<4x8xbf16>
    %cst = arith.constant dense<0.000000e+00> : vector<256x8xf32>
    %5 = tpu.matmul %3, %4, %cst {dimension_numbers = #tpu.dot_dimension_numbers<[1], [0], [0], [1], [0, 0, 1, 1], [], []>} : vector<256x4xbf16>, vector<4x8xbf16>, vector<256x8xf32> -> vector<256x8xf32>
    %cst_5 = arith.constant dense<0.000000e+00> : vector<8xf32>
    %6 = vector.multi_reduction <add>, %5, %cst_5 [0] : vector<256x8xf32> to vector<8xf32>
    %7 = vector.shape_cast %6 : vector<8xf32> to vector<1x8xf32>
    %8 = arith.mulf %5, %5 : vector<256x8xf32>
    %cst_6 = arith.constant dense<0.000000e+00> : vector<8xf32>
    %9 = vector.multi_reduction <add>, %8, %cst_6 [0] : vector<256x8xf32> to vector<8xf32>
    %10 = vector.shape_cast %9 : vector<8xf32> to vector<1x8xf32>
    %cst_7 = arith.constant 0.000000e+00 : f32
    %11 = vector.broadcast %cst_7 : f32 to vector<6x8xf32>
    %12 = tpu.concatenate %7, %10, %11 in 0 : vector<1x8xf32>, vector<1x8xf32>, vector<6x8xf32> -> vector<8x8xf32>
    %c0_8 = arith.constant 0 : index
    %c0_9 = arith.constant 0 : index
    %c0_10 = arith.constant 0 : index
    %13 = vector.load %arg4[%c0_8, %c0_9, %c0_10] : memref<1x8x8xf32, #tpu.memory_space<vmem>>, vector<1x8x8xf32>
    %14 = vector.shape_cast %13 : vector<1x8x8xf32> to vector<8x8xf32>
    %15 = vector.shape_cast %12 : vector<8x8xf32> to vector<1x8x8xf32>
    tpu.vector_store %arg4[%c0_8, %c0_9, %c0_10], %15 {strides = array<i32>} : memref<1x8x8xf32, #tpu.memory_space<vmem>>, vector<1x8x8xf32>,
    %16 = vector.shape_cast %5 : vector<256x8xf32> to vector<16x16x8xf32>
    %17 = arith.truncf %16 : vector<16x16x8xf32> to vector<16x16x8xbf16>
    %c0_11 = arith.constant 0 : index
    %c0_12 = arith.constant 0 : index
    %c0_13 = arith.constant 0 : index
    %c0_14 = arith.constant 0 : index
    %18 = vector.load %arg3[%c0_11, %c0_12, %c0_13, %c0_14] : memref<1x16x16x8xbf16, #tpu.memory_space<vmem>>, vector<1x16x16x8xbf16>
    %19 = vector.shape_cast %18 : vector<1x16x16x8xbf16> to vector<16x16x8xbf16>
    %20 = vector.shape_cast %17 : vector<16x16x8xbf16> to vector<1x16x16x8xbf16>
    tpu.vector_store %arg3[%c0_11, %c0_12, %c0_13, %c0_14], %20 {strides = array<i32>} : memref<1x16x16x8xbf16, #tpu.memory_space<vmem>>, vector<1x16x16x8xbf16>,
    return
  }
  func.func @transform_0(%arg0: i32) -> (i32, i32, i32, i32) {
    %c0_i32 = arith.constant 0 : i32
    %c0_i32_0 = arith.constant 0 : i32
    %c0_i32_1 = arith.constant 0 : i32
    %c0_i32_2 = arith.constant 0 : i32
    return %arg0, %c0_i32, %c0_i32_0, %c0_i32_1 : i32, i32, i32, i32
  }
  func.func @transform_1(%arg0: i32) -> (i32, i32) {
    %c0_i32 = arith.constant 0 : i32
    %c0_i32_0 = arith.constant 0 : i32
    %c0_i32_1 = arith.constant 0 : i32
    return %c0_i32, %c0_i32_0 : i32, i32
  }
  func.func @transform_2(%arg0: i32) -> (i32, i32, i32, i32) {
    %c0_i32 = arith.constant 0 : i32
    %c0_i32_0 = arith.constant 0 : i32
    %c0_i32_1 = arith.constant 0 : i32
    %c0_i32_2 = arith.constant 0 : i32
    return %arg0, %c0_i32, %c0_i32_0, %c0_i32_1 : i32, i32, i32, i32
  }
  func.func @transform_3(%arg0: i32) -> (i32, i32, i32) {
    %c0_i32 = arith.constant 0 : i32
    %c0_i32_0 = arith.constant 0 : i32
    %c0_i32_1 = arith.constant 0 : i32
    return %arg0, %c0_i32, %c0_i32_0 : i32, i32, i32
  }
}

module attributes {stable_mosaic.version = 11 : i64} {
  func.func @kernel(%arg0: i32, %arg1: memref<1x16x16x8xbf16, #tpu.memory_space<vmem>>, %arg2: memref<1x8xf32, #tpu.memory_space<vmem>>, %arg3: memref<1x8xf32, #tpu.memory_space<vmem>>, %arg4: memref<9x8x8xbf16, #tpu.memory_space<vmem>>, %arg5: memref<1x16x16x8xbf16, #tpu.memory_space<vmem>>, %arg6: memref<1x8x8xf32, #tpu.memory_space<vmem>>, %arg7: memref<18x25x8xf32, #tpu.memory_space<vmem>>) attributes {dimension_semantics = [#tpu.dimension_semantics<parallel>], iteration_bounds = array<i64: 2>, scalar_prefetch = 0 : i64, scratch_operands = 1 : i64, tpu.core_type = #tpu.core_type<tc>, window_params = [{transform_indices = @transform_0, window_bounds = array<i64: 1, 16, 16, 8>}, {pipeline_mode = #tpu.pipeline_mode<synchronous>, transform_indices = @transform_1, window_bounds = array<i64: 1, 8>}, {pipeline_mode = #tpu.pipeline_mode<synchronous>, transform_indices = @transform_2, window_bounds = array<i64: 1, 8>}, {pipeline_mode = #tpu.pipeline_mode<synchronous>, transform_indices = @transform_3, window_bounds = array<i64: 9, 8, 8>}, {transform_indices = @transform_4, window_bounds = array<i64: 1, 16, 16, 8>}, {transform_indices = @transform_5, window_bounds = array<i64: 1, 8, 8>}]} {
    %cst = arith.constant 0.000000e+00 : f32
    %0 = vector.broadcast %cst : f32 to vector<18x25x8xf32>
    %c0 = arith.constant 0 : index
    %c0_0 = arith.constant 0 : index
    %c0_1 = arith.constant 0 : index
    %1 = vector.load %arg7[%c0, %c0_0, %c0_1] : memref<18x25x8xf32, #tpu.memory_space<vmem>>, vector<18x25x8xf32>
    tpu.vector_store %arg7[%c0, %c0_0, %c0_1], %0 {strides = array<i32>} : memref<18x25x8xf32, #tpu.memory_space<vmem>>, vector<18x25x8xf32>,
    %c0_2 = arith.constant 0 : index
    %c0_3 = arith.constant 0 : index
    %c0_4 = arith.constant 0 : index
    %c0_5 = arith.constant 0 : index
    %2 = vector.load %arg1[%c0_2, %c0_3, %c0_4, %c0_5] : memref<1x16x16x8xbf16, #tpu.memory_space<vmem>>, vector<1x16x16x8xbf16>
    %3 = vector.shape_cast %2 : vector<1x16x16x8xbf16> to vector<16x16x8xbf16>
    %4 = arith.extf %3 : vector<16x16x8xbf16> to vector<16x16x8xf32>
    %c0_6 = arith.constant 0 : index
    %c0_7 = arith.constant 0 : index
    %5 = vector.load %arg2[%c0_6, %c0_7] : memref<1x8xf32, #tpu.memory_space<vmem>>, vector<1x8xf32>
    %6 = vector.shape_cast %5 : vector<1x8xf32> to vector<1x1x8xf32>
    %7 = vector.broadcast %6 : vector<1x1x8xf32> to vector<16x16x8xf32>
    %8 = arith.mulf %4, %7 : vector<16x16x8xf32>
    %c0_8 = arith.constant 0 : index
    %c0_9 = arith.constant 0 : index
    %9 = vector.load %arg3[%c0_8, %c0_9] : memref<1x8xf32, #tpu.memory_space<vmem>>, vector<1x8xf32>
    %10 = vector.shape_cast %9 : vector<1x8xf32> to vector<1x1x8xf32>
    %11 = vector.broadcast %10 : vector<1x1x8xf32> to vector<16x16x8xf32>
    %12 = arith.addf %8, %11 : vector<16x16x8xf32>
    %cst_10 = arith.constant 0.000000e+00 : f32
    %13 = vector.broadcast %cst_10 : f32 to vector<16x16x8xf32>
    %14 = arith.maximumf %12, %13 : vector<16x16x8xf32>
    %c1 = arith.constant 1 : index
    %c8 = arith.constant 8 : index
    %c0_11 = arith.constant 0 : index
    %15 = vector.load %arg7[%c1, %c8, %c0_11] : memref<18x25x8xf32, #tpu.memory_space<vmem>>, vector<16x16x8xf32>
    tpu.vector_store %arg7[%c1, %c8, %c0_11], %14 {strides = array<i32>} : memref<18x25x8xf32, #tpu.memory_space<vmem>>, vector<16x16x8xf32>,
    %cst_12 = arith.constant 0.000000e+00 : f32
    %16 = vector.broadcast %cst_12 : f32 to vector<256x8xf32>
    %c0_13 = arith.constant 0 : index
    %c7 = arith.constant 7 : index
    %c0_14 = arith.constant 0 : index
    %17 = vector.load %arg7[%c0_13, %c7, %c0_14] : memref<18x25x8xf32, #tpu.memory_space<vmem>>, vector<16x16x8xf32>
    %18 = vector.shape_cast %17 : vector<16x16x8xf32> to vector<256x8xf32>
    %19 = arith.truncf %18 : vector<256x8xf32> to vector<256x8xbf16>
    %c0_15 = arith.constant 0 : index
    %c0_16 = arith.constant 0 : index
    %c0_17 = arith.constant 0 : index
    %20 = vector.load %arg4[%c0_15, %c0_16, %c0_17] : memref<9x8x8xbf16, #tpu.memory_space<vmem>>, vector<1x8x8xbf16>
    %21 = vector.shape_cast %20 : vector<1x8x8xbf16> to vector<8x8xbf16>
    %cst_18 = arith.constant dense<0.000000e+00> : vector<256x8xf32>
    %22 = tpu.matmul %19, %21, %cst_18 {dimension_numbers = #tpu.dot_dimension_numbers<[1], [0], [0], [1], [0, 0, 1, 1], [], []>} : vector<256x8xbf16>, vector<8x8xbf16>, vector<256x8xf32> -> vector<256x8xf32>
    %23 = arith.addf %16, %22 : vector<256x8xf32>
    %c0_19 = arith.constant 0 : index
    %c8_20 = arith.constant 8 : index
    %c0_21 = arith.constant 0 : index
    %24 = vector.load %arg7[%c0_19, %c8_20, %c0_21] : memref<18x25x8xf32, #tpu.memory_space<vmem>>, vector<16x16x8xf32>
    %25 = vector.shape_cast %24 : vector<16x16x8xf32> to vector<256x8xf32>
    %26 = arith.truncf %25 : vector<256x8xf32> to vector<256x8xbf16>
    %c1_22 = arith.constant 1 : index
    %c0_23 = arith.constant 0 : index
    %c0_24 = arith.constant 0 : index
    %27 = vector.load %arg4[%c1_22, %c0_23, %c0_24] : memref<9x8x8xbf16, #tpu.memory_space<vmem>>, vector<1x8x8xbf16>
    %28 = vector.shape_cast %27 : vector<1x8x8xbf16> to vector<8x8xbf16>
    %cst_25 = arith.constant dense<0.000000e+00> : vector<256x8xf32>
    %29 = tpu.matmul %26, %28, %cst_25 {dimension_numbers = #tpu.dot_dimension_numbers<[1], [0], [0], [1], [0, 0, 1, 1], [], []>} : vector<256x8xbf16>, vector<8x8xbf16>, vector<256x8xf32> -> vector<256x8xf32>
    %30 = arith.addf %23, %29 : vector<256x8xf32>
    %c0_26 = arith.constant 0 : index
    %c9 = arith.constant 9 : index
    %c0_27 = arith.constant 0 : index
    %31 = vector.load %arg7[%c0_26, %c9, %c0_27] : memref<18x25x8xf32, #tpu.memory_space<vmem>>, vector<16x16x8xf32>
    %32 = vector.shape_cast %31 : vector<16x16x8xf32> to vector<256x8xf32>
    %33 = arith.truncf %32 : vector<256x8xf32> to vector<256x8xbf16>
    %c2 = arith.constant 2 : index
    %c0_28 = arith.constant 0 : index
    %c0_29 = arith.constant 0 : index
    %34 = vector.load %arg4[%c2, %c0_28, %c0_29] : memref<9x8x8xbf16, #tpu.memory_space<vmem>>, vector<1x8x8xbf16>
    %35 = vector.shape_cast %34 : vector<1x8x8xbf16> to vector<8x8xbf16>
    %cst_30 = arith.constant dense<0.000000e+00> : vector<256x8xf32>
    %36 = tpu.matmul %33, %35, %cst_30 {dimension_numbers = #tpu.dot_dimension_numbers<[1], [0], [0], [1], [0, 0, 1, 1], [], []>} : vector<256x8xbf16>, vector<8x8xbf16>, vector<256x8xf32> -> vector<256x8xf32>
    %37 = arith.addf %30, %36 : vector<256x8xf32>
    %c1_31 = arith.constant 1 : index
    %c7_32 = arith.constant 7 : index
    %c0_33 = arith.constant 0 : index
    %38 = vector.load %arg7[%c1_31, %c7_32, %c0_33] : memref<18x25x8xf32, #tpu.memory_space<vmem>>, vector<16x16x8xf32>
    %39 = vector.shape_cast %38 : vector<16x16x8xf32> to vector<256x8xf32>
    %40 = arith.truncf %39 : vector<256x8xf32> to vector<256x8xbf16>
    %c3 = arith.constant 3 : index
    %c0_34 = arith.constant 0 : index
    %c0_35 = arith.constant 0 : index
    %41 = vector.load %arg4[%c3, %c0_34, %c0_35] : memref<9x8x8xbf16, #tpu.memory_space<vmem>>, vector<1x8x8xbf16>
    %42 = vector.shape_cast %41 : vector<1x8x8xbf16> to vector<8x8xbf16>
    %cst_36 = arith.constant dense<0.000000e+00> : vector<256x8xf32>
    %43 = tpu.matmul %40, %42, %cst_36 {dimension_numbers = #tpu.dot_dimension_numbers<[1], [0], [0], [1], [0, 0, 1, 1], [], []>} : vector<256x8xbf16>, vector<8x8xbf16>, vector<256x8xf32> -> vector<256x8xf32>
    %44 = arith.addf %37, %43 : vector<256x8xf32>
    %c1_37 = arith.constant 1 : index
    %c8_38 = arith.constant 8 : index
    %c0_39 = arith.constant 0 : index
    %45 = vector.load %arg7[%c1_37, %c8_38, %c0_39] : memref<18x25x8xf32, #tpu.memory_space<vmem>>, vector<16x16x8xf32>
    %46 = vector.shape_cast %45 : vector<16x16x8xf32> to vector<256x8xf32>
    %47 = arith.truncf %46 : vector<256x8xf32> to vector<256x8xbf16>
    %c4 = arith.constant 4 : index
    %c0_40 = arith.constant 0 : index
    %c0_41 = arith.constant 0 : index
    %48 = vector.load %arg4[%c4, %c0_40, %c0_41] : memref<9x8x8xbf16, #tpu.memory_space<vmem>>, vector<1x8x8xbf16>
    %49 = vector.shape_cast %48 : vector<1x8x8xbf16> to vector<8x8xbf16>
    %cst_42 = arith.constant dense<0.000000e+00> : vector<256x8xf32>
    %50 = tpu.matmul %47, %49, %cst_42 {dimension_numbers = #tpu.dot_dimension_numbers<[1], [0], [0], [1], [0, 0, 1, 1], [], []>} : vector<256x8xbf16>, vector<8x8xbf16>, vector<256x8xf32> -> vector<256x8xf32>
    %51 = arith.addf %44, %50 : vector<256x8xf32>
    %c1_43 = arith.constant 1 : index
    %c9_44 = arith.constant 9 : index
    %c0_45 = arith.constant 0 : index
    %52 = vector.load %arg7[%c1_43, %c9_44, %c0_45] : memref<18x25x8xf32, #tpu.memory_space<vmem>>, vector<16x16x8xf32>
    %53 = vector.shape_cast %52 : vector<16x16x8xf32> to vector<256x8xf32>
    %54 = arith.truncf %53 : vector<256x8xf32> to vector<256x8xbf16>
    %c5 = arith.constant 5 : index
    %c0_46 = arith.constant 0 : index
    %c0_47 = arith.constant 0 : index
    %55 = vector.load %arg4[%c5, %c0_46, %c0_47] : memref<9x8x8xbf16, #tpu.memory_space<vmem>>, vector<1x8x8xbf16>
    %56 = vector.shape_cast %55 : vector<1x8x8xbf16> to vector<8x8xbf16>
    %cst_48 = arith.constant dense<0.000000e+00> : vector<256x8xf32>
    %57 = tpu.matmul %54, %56, %cst_48 {dimension_numbers = #tpu.dot_dimension_numbers<[1], [0], [0], [1], [0, 0, 1, 1], [], []>} : vector<256x8xbf16>, vector<8x8xbf16>, vector<256x8xf32> -> vector<256x8xf32>
    %58 = arith.addf %51, %57 : vector<256x8xf32>
    %c2_49 = arith.constant 2 : index
    %c7_50 = arith.constant 7 : index
    %c0_51 = arith.constant 0 : index
    %59 = vector.load %arg7[%c2_49, %c7_50, %c0_51] : memref<18x25x8xf32, #tpu.memory_space<vmem>>, vector<16x16x8xf32>
    %60 = vector.shape_cast %59 : vector<16x16x8xf32> to vector<256x8xf32>
    %61 = arith.truncf %60 : vector<256x8xf32> to vector<256x8xbf16>
    %c6 = arith.constant 6 : index
    %c0_52 = arith.constant 0 : index
    %c0_53 = arith.constant 0 : index
    %62 = vector.load %arg4[%c6, %c0_52, %c0_53] : memref<9x8x8xbf16, #tpu.memory_space<vmem>>, vector<1x8x8xbf16>
    %63 = vector.shape_cast %62 : vector<1x8x8xbf16> to vector<8x8xbf16>
    %cst_54 = arith.constant dense<0.000000e+00> : vector<256x8xf32>
    %64 = tpu.matmul %61, %63, %cst_54 {dimension_numbers = #tpu.dot_dimension_numbers<[1], [0], [0], [1], [0, 0, 1, 1], [], []>} : vector<256x8xbf16>, vector<8x8xbf16>, vector<256x8xf32> -> vector<256x8xf32>
    %65 = arith.addf %58, %64 : vector<256x8xf32>
    %c2_55 = arith.constant 2 : index
    %c8_56 = arith.constant 8 : index
    %c0_57 = arith.constant 0 : index
    %66 = vector.load %arg7[%c2_55, %c8_56, %c0_57] : memref<18x25x8xf32, #tpu.memory_space<vmem>>, vector<16x16x8xf32>
    %67 = vector.shape_cast %66 : vector<16x16x8xf32> to vector<256x8xf32>
    %68 = arith.truncf %67 : vector<256x8xf32> to vector<256x8xbf16>
    %c7_58 = arith.constant 7 : index
    %c0_59 = arith.constant 0 : index
    %c0_60 = arith.constant 0 : index
    %69 = vector.load %arg4[%c7_58, %c0_59, %c0_60] : memref<9x8x8xbf16, #tpu.memory_space<vmem>>, vector<1x8x8xbf16>
    %70 = vector.shape_cast %69 : vector<1x8x8xbf16> to vector<8x8xbf16>
    %cst_61 = arith.constant dense<0.000000e+00> : vector<256x8xf32>
    %71 = tpu.matmul %68, %70, %cst_61 {dimension_numbers = #tpu.dot_dimension_numbers<[1], [0], [0], [1], [0, 0, 1, 1], [], []>} : vector<256x8xbf16>, vector<8x8xbf16>, vector<256x8xf32> -> vector<256x8xf32>
    %72 = arith.addf %65, %71 : vector<256x8xf32>
    %c2_62 = arith.constant 2 : index
    %c9_63 = arith.constant 9 : index
    %c0_64 = arith.constant 0 : index
    %73 = vector.load %arg7[%c2_62, %c9_63, %c0_64] : memref<18x25x8xf32, #tpu.memory_space<vmem>>, vector<16x16x8xf32>
    %74 = vector.shape_cast %73 : vector<16x16x8xf32> to vector<256x8xf32>
    %75 = arith.truncf %74 : vector<256x8xf32> to vector<256x8xbf16>
    %c8_65 = arith.constant 8 : index
    %c0_66 = arith.constant 0 : index
    %c0_67 = arith.constant 0 : index
    %76 = vector.load %arg4[%c8_65, %c0_66, %c0_67] : memref<9x8x8xbf16, #tpu.memory_space<vmem>>, vector<1x8x8xbf16>
    %77 = vector.shape_cast %76 : vector<1x8x8xbf16> to vector<8x8xbf16>
    %cst_68 = arith.constant dense<0.000000e+00> : vector<256x8xf32>
    %78 = tpu.matmul %75, %77, %cst_68 {dimension_numbers = #tpu.dot_dimension_numbers<[1], [0], [0], [1], [0, 0, 1, 1], [], []>} : vector<256x8xbf16>, vector<8x8xbf16>, vector<256x8xf32> -> vector<256x8xf32>
    %79 = arith.addf %72, %78 : vector<256x8xf32>
    %cst_69 = arith.constant dense<0.000000e+00> : vector<8xf32>
    %80 = vector.multi_reduction <add>, %79, %cst_69 [0] : vector<256x8xf32> to vector<8xf32>
    %81 = vector.shape_cast %80 : vector<8xf32> to vector<1x8xf32>
    %82 = arith.mulf %79, %79 : vector<256x8xf32>
    %cst_70 = arith.constant dense<0.000000e+00> : vector<8xf32>
    %83 = vector.multi_reduction <add>, %82, %cst_70 [0] : vector<256x8xf32> to vector<8xf32>
    %84 = vector.shape_cast %83 : vector<8xf32> to vector<1x8xf32>
    %cst_71 = arith.constant 0.000000e+00 : f32
    %85 = vector.broadcast %cst_71 : f32 to vector<6x8xf32>
    %86 = tpu.concatenate %81, %84, %85 in 0 : vector<1x8xf32>, vector<1x8xf32>, vector<6x8xf32> -> vector<8x8xf32>
    %c0_72 = arith.constant 0 : index
    %c0_73 = arith.constant 0 : index
    %c0_74 = arith.constant 0 : index
    %87 = vector.load %arg6[%c0_72, %c0_73, %c0_74] : memref<1x8x8xf32, #tpu.memory_space<vmem>>, vector<1x8x8xf32>
    %88 = vector.shape_cast %87 : vector<1x8x8xf32> to vector<8x8xf32>
    %89 = vector.shape_cast %86 : vector<8x8xf32> to vector<1x8x8xf32>
    tpu.vector_store %arg6[%c0_72, %c0_73, %c0_74], %89 {strides = array<i32>} : memref<1x8x8xf32, #tpu.memory_space<vmem>>, vector<1x8x8xf32>,
    %90 = vector.shape_cast %79 : vector<256x8xf32> to vector<16x16x8xf32>
    %91 = arith.truncf %90 : vector<16x16x8xf32> to vector<16x16x8xbf16>
    %c0_75 = arith.constant 0 : index
    %c0_76 = arith.constant 0 : index
    %c0_77 = arith.constant 0 : index
    %c0_78 = arith.constant 0 : index
    %92 = vector.load %arg5[%c0_75, %c0_76, %c0_77, %c0_78] : memref<1x16x16x8xbf16, #tpu.memory_space<vmem>>, vector<1x16x16x8xbf16>
    %93 = vector.shape_cast %92 : vector<1x16x16x8xbf16> to vector<16x16x8xbf16>
    %94 = vector.shape_cast %91 : vector<16x16x8xbf16> to vector<1x16x16x8xbf16>
    tpu.vector_store %arg5[%c0_75, %c0_76, %c0_77, %c0_78], %94 {strides = array<i32>} : memref<1x16x16x8xbf16, #tpu.memory_space<vmem>>, vector<1x16x16x8xbf16>,
    return
  }
  func.func @transform_0(%arg0: i32) -> (i32, i32, i32, i32) {
    %c0_i32 = arith.constant 0 : i32
    %c0_i32_0 = arith.constant 0 : i32
    %c0_i32_1 = arith.constant 0 : i32
    %c0_i32_2 = arith.constant 0 : i32
    return %arg0, %c0_i32, %c0_i32_0, %c0_i32_1 : i32, i32, i32, i32
  }
  func.func @transform_1(%arg0: i32) -> (i32, i32) {
    %c0_i32 = arith.constant 0 : i32
    %c0_i32_0 = arith.constant 0 : i32
    %c0_i32_1 = arith.constant 0 : i32
    return %c0_i32, %c0_i32_0 : i32, i32
  }
  func.func @transform_2(%arg0: i32) -> (i32, i32) {
    %c0_i32 = arith.constant 0 : i32
    %c0_i32_0 = arith.constant 0 : i32
    %c0_i32_1 = arith.constant 0 : i32
    return %c0_i32, %c0_i32_0 : i32, i32
  }
  func.func @transform_3(%arg0: i32) -> (i32, i32, i32) {
    %c0_i32 = arith.constant 0 : i32
    %c0_i32_0 = arith.constant 0 : i32
    %c0_i32_1 = arith.constant 0 : i32
    %c0_i32_2 = arith.constant 0 : i32
    return %c0_i32, %c0_i32_0, %c0_i32_1 : i32, i32, i32
  }
  func.func @transform_4(%arg0: i32) -> (i32, i32, i32, i32) {
    %c0_i32 = arith.constant 0 : i32
    %c0_i32_0 = arith.constant 0 : i32
    %c0_i32_1 = arith.constant 0 : i32
    %c0_i32_2 = arith.constant 0 : i32
    return %arg0, %c0_i32, %c0_i32_0, %c0_i32_1 : i32, i32, i32, i32
  }
  func.func @transform_5(%arg0: i32) -> (i32, i32, i32) {
    %c0_i32 = arith.constant 0 : i32
    %c0_i32_0 = arith.constant 0 : i32
    %c0_i32_1 = arith.constant 0 : i32
    return %arg0, %c0_i32, %c0_i32_0 : i32, i32, i32
  }
}

module attributes {stable_mosaic.version = 11 : i64} {
  func.func @kernel(%arg0: i32, %arg1: memref<1x16x16x8xbf16, #tpu.memory_space<vmem>>, %arg2: memref<1x8xf32, #tpu.memory_space<vmem>>, %arg3: memref<1x8xf32, #tpu.memory_space<vmem>>, %arg4: memref<8x16xbf16, #tpu.memory_space<vmem>>, %arg5: memref<1x16x16x4xf32, #tpu.memory_space<vmem>>, %arg6: memref<4x16xbf16, #tpu.memory_space<vmem>>, %arg7: memref<1x16x16x16xbf16, #tpu.memory_space<vmem>>, %arg8: memref<1x8x16xf32, #tpu.memory_space<vmem>>) attributes {dimension_semantics = [#tpu.dimension_semantics<parallel>], iteration_bounds = array<i64: 2>, scalar_prefetch = 0 : i64, scratch_operands = 0 : i64, tpu.core_type = #tpu.core_type<tc>, window_params = [{transform_indices = @transform_0, window_bounds = array<i64: 1, 16, 16, 8>}, {pipeline_mode = #tpu.pipeline_mode<synchronous>, transform_indices = @transform_1, window_bounds = array<i64: 1, 8>}, {pipeline_mode = #tpu.pipeline_mode<synchronous>, transform_indices = @transform_2, window_bounds = array<i64: 1, 8>}, {pipeline_mode = #tpu.pipeline_mode<synchronous>, transform_indices = @transform_3, window_bounds = array<i64: 8, 16>}, {transform_indices = @transform_4, window_bounds = array<i64: 1, 16, 16, 4>}, {pipeline_mode = #tpu.pipeline_mode<synchronous>, transform_indices = @transform_5, window_bounds = array<i64: 4, 16>}, {transform_indices = @transform_6, window_bounds = array<i64: 1, 16, 16, 16>}, {transform_indices = @transform_7, window_bounds = array<i64: 1, 8, 16>}]} {
    %c0 = arith.constant 0 : index
    %c0_0 = arith.constant 0 : index
    %c0_1 = arith.constant 0 : index
    %c0_2 = arith.constant 0 : index
    %0 = vector.load %arg1[%c0, %c0_0, %c0_1, %c0_2] : memref<1x16x16x8xbf16, #tpu.memory_space<vmem>>, vector<1x16x16x8xbf16>
    %1 = vector.shape_cast %0 : vector<1x16x16x8xbf16> to vector<16x16x8xbf16>
    %2 = arith.extf %1 : vector<16x16x8xbf16> to vector<16x16x8xf32>
    %c0_3 = arith.constant 0 : index
    %c0_4 = arith.constant 0 : index
    %3 = vector.load %arg2[%c0_3, %c0_4] : memref<1x8xf32, #tpu.memory_space<vmem>>, vector<1x8xf32>
    %4 = vector.shape_cast %3 : vector<1x8xf32> to vector<1x1x8xf32>
    %5 = vector.broadcast %4 : vector<1x1x8xf32> to vector<16x16x8xf32>
    %6 = arith.mulf %2, %5 : vector<16x16x8xf32>
    %c0_5 = arith.constant 0 : index
    %c0_6 = arith.constant 0 : index
    %7 = vector.load %arg3[%c0_5, %c0_6] : memref<1x8xf32, #tpu.memory_space<vmem>>, vector<1x8xf32>
    %8 = vector.shape_cast %7 : vector<1x8xf32> to vector<1x1x8xf32>
    %9 = vector.broadcast %8 : vector<1x1x8xf32> to vector<16x16x8xf32>
    %10 = arith.addf %6, %9 : vector<16x16x8xf32>
    %cst = arith.constant 0.000000e+00 : f32
    %11 = vector.broadcast %cst : f32 to vector<16x16x8xf32>
    %12 = arith.maximumf %10, %11 : vector<16x16x8xf32>
    %13 = vector.shape_cast %12 : vector<16x16x8xf32> to vector<256x8xf32>
    %14 = arith.truncf %13 : vector<256x8xf32> to vector<256x8xbf16>
    %c0_7 = arith.constant 0 : index
    %c0_8 = arith.constant 0 : index
    %15 = vector.load %arg4[%c0_7, %c0_8] : memref<8x16xbf16, #tpu.memory_space<vmem>>, vector<8x16xbf16>
    %cst_9 = arith.constant dense<0.000000e+00> : vector<256x16xf32>
    %16 = tpu.matmul %14, %15, %cst_9 {dimension_numbers = #tpu.dot_dimension_numbers<[1], [0], [0], [1], [0, 0, 1, 1], [], []>} : vector<256x8xbf16>, vector<8x16xbf16>, vector<256x16xf32> -> vector<256x16xf32>
    %c0_10 = arith.constant 0 : index
    %c0_11 = arith.constant 0 : index
    %c0_12 = arith.constant 0 : index
    %c0_13 = arith.constant 0 : index
    %17 = vector.load %arg5[%c0_10, %c0_11, %c0_12, %c0_13] : memref<1x16x16x4xf32, #tpu.memory_space<vmem>>, vector<1x16x16x4xf32>
    %18 = vector.shape_cast %17 : vector<1x16x16x4xf32> to vector<16x16x4xf32>
    %19 = vector.shape_cast %18 : vector<16x16x4xf32> to vector<256x4xf32>
    %20 = arith.truncf %19 : vector<256x4xf32> to vector<256x4xbf16>
    %c0_14 = arith.constant 0 : index
    %c0_15 = arith.constant 0 : index
    %21 = vector.load %arg6[%c0_14, %c0_15] : memref<4x16xbf16, #tpu.memory_space<vmem>>, vector<4x16xbf16>
    %cst_16 = arith.constant dense<0.000000e+00> : vector<256x16xf32>
    %22 = tpu.matmul %20, %21, %cst_16 {dimension_numbers = #tpu.dot_dimension_numbers<[1], [0], [0], [1], [0, 0, 1, 1], [], []>} : vector<256x4xbf16>, vector<4x16xbf16>, vector<256x16xf32> -> vector<256x16xf32>
    %23 = arith.addf %16, %22 : vector<256x16xf32>
    %cst_17 = arith.constant dense<0.000000e+00> : vector<16xf32>
    %24 = vector.multi_reduction <add>, %23, %cst_17 [0] : vector<256x16xf32> to vector<16xf32>
    %25 = vector.shape_cast %24 : vector<16xf32> to vector<1x16xf32>
    %26 = arith.mulf %23, %23 : vector<256x16xf32>
    %cst_18 = arith.constant dense<0.000000e+00> : vector<16xf32>
    %27 = vector.multi_reduction <add>, %26, %cst_18 [0] : vector<256x16xf32> to vector<16xf32>
    %28 = vector.shape_cast %27 : vector<16xf32> to vector<1x16xf32>
    %cst_19 = arith.constant 0.000000e+00 : f32
    %29 = vector.broadcast %cst_19 : f32 to vector<6x16xf32>
    %30 = tpu.concatenate %25, %28, %29 in 0 : vector<1x16xf32>, vector<1x16xf32>, vector<6x16xf32> -> vector<8x16xf32>
    %c0_20 = arith.constant 0 : index
    %c0_21 = arith.constant 0 : index
    %c0_22 = arith.constant 0 : index
    %31 = vector.load %arg8[%c0_20, %c0_21, %c0_22] : memref<1x8x16xf32, #tpu.memory_space<vmem>>, vector<1x8x16xf32>
    %32 = vector.shape_cast %31 : vector<1x8x16xf32> to vector<8x16xf32>
    %33 = vector.shape_cast %30 : vector<8x16xf32> to vector<1x8x16xf32>
    tpu.vector_store %arg8[%c0_20, %c0_21, %c0_22], %33 {strides = array<i32>} : memref<1x8x16xf32, #tpu.memory_space<vmem>>, vector<1x8x16xf32>,
    %34 = vector.shape_cast %23 : vector<256x16xf32> to vector<16x16x16xf32>
    %35 = arith.truncf %34 : vector<16x16x16xf32> to vector<16x16x16xbf16>
    %c0_23 = arith.constant 0 : index
    %c0_24 = arith.constant 0 : index
    %c0_25 = arith.constant 0 : index
    %c0_26 = arith.constant 0 : index
    %36 = vector.load %arg7[%c0_23, %c0_24, %c0_25, %c0_26] : memref<1x16x16x16xbf16, #tpu.memory_space<vmem>>, vector<1x16x16x16xbf16>
    %37 = vector.shape_cast %36 : vector<1x16x16x16xbf16> to vector<16x16x16xbf16>
    %38 = vector.shape_cast %35 : vector<16x16x16xbf16> to vector<1x16x16x16xbf16>
    tpu.vector_store %arg7[%c0_23, %c0_24, %c0_25, %c0_26], %38 {strides = array<i32>} : memref<1x16x16x16xbf16, #tpu.memory_space<vmem>>, vector<1x16x16x16xbf16>,
    return
  }
  func.func @transform_0(%arg0: i32) -> (i32, i32, i32, i32) {
    %c0_i32 = arith.constant 0 : i32
    %c0_i32_0 = arith.constant 0 : i32
    %c0_i32_1 = arith.constant 0 : i32
    %c0_i32_2 = arith.constant 0 : i32
    return %arg0, %c0_i32, %c0_i32_0, %c0_i32_1 : i32, i32, i32, i32
  }
  func.func @transform_1(%arg0: i32) -> (i32, i32) {
    %c0_i32 = arith.constant 0 : i32
    %c0_i32_0 = arith.constant 0 : i32
    %c0_i32_1 = arith.constant 0 : i32
    return %c0_i32, %c0_i32_0 : i32, i32
  }
  func.func @transform_2(%arg0: i32) -> (i32, i32) {
    %c0_i32 = arith.constant 0 : i32
    %c0_i32_0 = arith.constant 0 : i32
    %c0_i32_1 = arith.constant 0 : i32
    return %c0_i32, %c0_i32_0 : i32, i32
  }
  func.func @transform_3(%arg0: i32) -> (i32, i32) {
    %c0_i32 = arith.constant 0 : i32
    %c0_i32_0 = arith.constant 0 : i32
    %c0_i32_1 = arith.constant 0 : i32
    return %c0_i32, %c0_i32_0 : i32, i32
  }
  func.func @transform_4(%arg0: i32) -> (i32, i32, i32, i32) {
    %c0_i32 = arith.constant 0 : i32
    %c0_i32_0 = arith.constant 0 : i32
    %c0_i32_1 = arith.constant 0 : i32
    %c0_i32_2 = arith.constant 0 : i32
    return %arg0, %c0_i32, %c0_i32_0, %c0_i32_1 : i32, i32, i32, i32
  }
  func.func @transform_5(%arg0: i32) -> (i32, i32) {
    %c0_i32 = arith.constant 0 : i32
    %c0_i32_0 = arith.constant 0 : i32
    %c0_i32_1 = arith.constant 0 : i32
    return %c0_i32, %c0_i32_0 : i32, i32
  }
  func.func @transform_6(%arg0: i32) -> (i32, i32, i32, i32) {
    %c0_i32 = arith.constant 0 : i32
    %c0_i32_0 = arith.constant 0 : i32
    %c0_i32_1 = arith.constant 0 : i32
    %c0_i32_2 = arith.constant 0 : i32
    return %arg0, %c0_i32, %c0_i32_0, %c0_i32_1 : i32, i32, i32, i32
  }
  func.func @transform_7(%arg0: i32) -> (i32, i32, i32) {
    %c0_i32 = arith.constant 0 : i32
    %c0_i32_0 = arith.constant 0 : i32
    %c0_i32_1 = arith.constant 0 : i32
    return %arg0, %c0_i32, %c0_i32_0 : i32, i32, i32
  }
}

module attributes {stable_mosaic.version = 11 : i64} {
  func.func @_final_bn_relu_kernel(%arg0: i32, %arg1: memref<1x16x16x16xbf16, #tpu.memory_space<vmem>>, %arg2: memref<1x16xf32, #tpu.memory_space<vmem>>, %arg3: memref<1x16xf32, #tpu.memory_space<vmem>>, %arg4: memref<1x16x16x16xf32, #tpu.memory_space<vmem>>) attributes {dimension_semantics = [#tpu.dimension_semantics<parallel>], iteration_bounds = array<i64: 2>, scalar_prefetch = 0 : i64, scratch_operands = 0 : i64, tpu.core_type = #tpu.core_type<tc>, window_params = [{transform_indices = @transform_0, window_bounds = array<i64: 1, 16, 16, 16>}, {pipeline_mode = #tpu.pipeline_mode<synchronous>, transform_indices = @transform_1, window_bounds = array<i64: 1, 16>}, {pipeline_mode = #tpu.pipeline_mode<synchronous>, transform_indices = @transform_2, window_bounds = array<i64: 1, 16>}, {transform_indices = @transform_3, window_bounds = array<i64: 1, 16, 16, 16>}]} {
    %c0 = arith.constant 0 : index
    %c0_0 = arith.constant 0 : index
    %c0_1 = arith.constant 0 : index
    %c0_2 = arith.constant 0 : index
    %0 = vector.load %arg1[%c0, %c0_0, %c0_1, %c0_2] : memref<1x16x16x16xbf16, #tpu.memory_space<vmem>>, vector<1x16x16x16xbf16>
    %1 = vector.shape_cast %0 : vector<1x16x16x16xbf16> to vector<16x16x16xbf16>
    %2 = arith.extf %1 : vector<16x16x16xbf16> to vector<16x16x16xf32>
    %c0_3 = arith.constant 0 : index
    %c0_4 = arith.constant 0 : index
    %3 = vector.load %arg2[%c0_3, %c0_4] : memref<1x16xf32, #tpu.memory_space<vmem>>, vector<1x16xf32>
    %4 = vector.shape_cast %3 : vector<1x16xf32> to vector<1x1x16xf32>
    %5 = vector.broadcast %4 : vector<1x1x16xf32> to vector<16x16x16xf32>
    %6 = arith.mulf %2, %5 : vector<16x16x16xf32>
    %c0_5 = arith.constant 0 : index
    %c0_6 = arith.constant 0 : index
    %7 = vector.load %arg3[%c0_5, %c0_6] : memref<1x16xf32, #tpu.memory_space<vmem>>, vector<1x16xf32>
    %8 = vector.shape_cast %7 : vector<1x16xf32> to vector<1x1x16xf32>
    %9 = vector.broadcast %8 : vector<1x1x16xf32> to vector<16x16x16xf32>
    %10 = arith.addf %6, %9 : vector<16x16x16xf32>
    %cst = arith.constant 0.000000e+00 : f32
    %11 = vector.broadcast %cst : f32 to vector<16x16x16xf32>
    %12 = arith.maximumf %10, %11 : vector<16x16x16xf32>
    %c0_7 = arith.constant 0 : index
    %c0_8 = arith.constant 0 : index
    %c0_9 = arith.constant 0 : index
    %c0_10 = arith.constant 0 : index
    %13 = vector.load %arg4[%c0_7, %c0_8, %c0_9, %c0_10] : memref<1x16x16x16xf32, #tpu.memory_space<vmem>>, vector<1x16x16x16xf32>
    %14 = vector.shape_cast %13 : vector<1x16x16x16xf32> to vector<16x16x16xf32>
    %15 = vector.shape_cast %12 : vector<16x16x16xf32> to vector<1x16x16x16xf32>
    tpu.vector_store %arg4[%c0_7, %c0_8, %c0_9, %c0_10], %15 {strides = array<i32>} : memref<1x16x16x16xf32, #tpu.memory_space<vmem>>, vector<1x16x16x16xf32>,
    return
  }
  func.func @transform_0(%arg0: i32) -> (i32, i32, i32, i32) {
    %c0_i32 = arith.constant 0 : i32
    %c0_i32_0 = arith.constant 0 : i32
    %c0_i32_1 = arith.constant 0 : i32
    %c0_i32_2 = arith.constant 0 : i32
    return %arg0, %c0_i32, %c0_i32_0, %c0_i32_1 : i32, i32, i32, i32
  }
  func.func @transform_1(%arg0: i32) -> (i32, i32) {
    %c0_i32 = arith.constant 0 : i32
    %c0_i32_0 = arith.constant 0 : i32
    %c0_i32_1 = arith.constant 0 : i32
    return %c0_i32, %c0_i32_0 : i32, i32
  }
  func.func @transform_2(%arg0: i32) -> (i32, i32) {
    %c0_i32 = arith.constant 0 : i32
    %c0_i32_0 = arith.constant 0 : i32
    %c0_i32_1 = arith.constant 0 : i32
    return %c0_i32, %c0_i32_0 : i32, i32
  }
  func.func @transform_3(%arg0: i32) -> (i32, i32, i32, i32) {
    %c0_i32 = arith.constant 0 : i32
    %c0_i32_0 = arith.constant 0 : i32
    %c0_i32_1 = arith.constant 0 : i32
    %c0_i32_2 = arith.constant 0 : i32
    return %arg0, %c0_i32, %c0_i32_0, %c0_i32_1 : i32, i32, i32, i32
  }
}

</mosaic_0001>

<bundles_post_ra>
// kernel: bottleneck_block_pallas.4
= control target key start
LH: loop header
LB: loop body
LE: loop exit
PB: predicated region body
PF: predicated region fallthrough
CT: control target
= control target key end

     0   :  { %s1053_s12 = smov 0   ;;  %s1378_s0 = inlined_call_operand.vmem [shape: f32[2,16,16,4], index: 0, kind: input, shape index: {}]   ;;  %s1379_s1 = inlined_call_operand.vmem [shape: bf16[4,8], index: 1, kind: input, shape index: {}]   ;;  %s1380_s2 = inlined_call_operand.vmem [shape: bf16[2,16,16,8], index: 2, kind: output, shape index: {0}]   ;;  %s1381_s3 = inlined_call_operand.vmem [shape: f32[2,8,8], index: 3, kind: output, shape index: {1}]  }
   0x1 LB: > { %s868_s13 = sadd.s32 4294967295, %s1031_s12   ;;  %p872_p0 = scmp.ge.s32.totalorder %s1031_s12, 1  ;;  %s1031_s12 = sphi %s1053_s12, %s14_s12  }
   0x2   : > { %p140_p1 = scmp.lt.s32.totalorder %s1031_s12, 3 }
   0x4   : > { %p141_p2 = pnand %p872_p0, %p140_p1 }
   0x5   : > { %v231_v0 = vld [vmem:[%s1379_s1] sm:$0x3] (!%p141_p2)  ;;  %vm281_vm0 = vcmask (!%p141_p2), 1041408   ;;  %p168_p3 = scmp.lt.s32.totalorder (!%p141_p2), %s868_s13, 1  ;;  %vm232_vm1 = vcmask (!%p141_p2), 31744   ;;  %vm749_vm2 = vcmask (!%p141_p2), 60416  }
   0x6   : > { %144 = sbr.rel (%p141_p2) target bundleno = 315 (0x13b), region = 28  ;;  %1015 = vmatprep.subr.msk.bf16.mxu0 (!%p141_p2), %vm281_vm0, %v231_v0  ;;  %v283_v1 = vsel (!%p141_p2), %vm281_vm0, %v231_v0, 0  ;;  %1016 = vmatprep.subr.msk.bf16.mxu1 (!%p141_p2), %vm281_vm0, %v231_v0  ;;  %vm446_vm3 = vcmask (!%p141_p2), 64512   ;;  %vm617_vm4 = vcmask (!%p141_p2), 1040384  }
   0x7   : > { %980 = vmatpush3.bf16.msra.mxu0 (!%p141_p2), %v283_v1  ;;  %1014 = vmatpush3.bf16.msra.mxu1 (!%p141_p2), %v283_v1 }
   0xd   : > { %s1383_s13 = smov (!%p168_p3, %s868_s13), 1 }
   0xe   : > { %s928_s16 = sshll.u32 %s1383_s13, 8  ;;  %s929_s20 = sshll.u32 %s1383_s13, 7 }
   0xf   : > { %s1073_s19 = scalar_lea.vmem %s1378_s0, %s928_s16  ;;  %s1127_s23 = scalar_lea.vmem %s1380_s2, %s929_s20 }
  0x10   : > { %v183_v2 = vld [vmem:[%s1073_s19] sm:$0xff]  ;;  %v184_v3 = vld [vmem:[%s1073_s19 + $0x8] sm:$0xff]  ;;  %v185_v4 = vld [vmem:[%s1073_s19 + $0x10] sm:$0xff]  ;;  %s877_s24 = sshll.u32 %s1383_s13, 3 }
  0x11   : > { %v215_v5 = vpack.c.bf16 %v184_v3, %v183_v2  ;;  %v186_v6 = vld [vmem:[%s1073_s19 + $0x18] sm:$0xff]  ;;  %v187_v7 = vld [vmem:[%s1073_s19 + $0x20] sm:$0xff]  ;;  %v188_v8 = vld [vmem:[%s1073_s19 + $0x28] sm:$0xff]  ;;  %s181_s27 = scalar_lea.vmem %s1381_s3, %s877_s24 }
  0x12   : > { %v216_v9 = vpack.c.bf16 %v186_v6, %v185_v4  ;;  %v217_v10 = vpack.c.bf16 %v188_v8, %v187_v7  ;;  %v189_v11 = vld [vmem:[%s1073_s19 + $0x30] sm:$0xff]  ;;  %v190_v12 = vld [vmem:[%s1073_s19 + $0x38] sm:$0xff]  ;;  %v191_v13 = vld [vmem:[%s1073_s19 + $0x40] sm:$0xff] }
  0x13   : > { %981 = vmatprep.mubr.msk.bf16.mxu0 %vm232_vm1, %v215_v5  ;;  %v192_v14 = vld [vmem:[%s1073_s19 + $0x48] sm:$0xff]  ;;  %v199_v15 = vld [vmem:[%s1073_s19 + $0x80] sm:$0xff]  ;;  %v201_v18 = vld [vmem:[%s1073_s19 + $0x90] sm:$0xff]  ;;  %v218_v23 = vpack.c.bf16 %v190_v12, %v189_v11 }
  0x14   : > { %982 = vmatmul.mubr.msk.bf16.vlgmr.msra.gmra.mrb[0].mxu0 %vm232_vm1, %v216_v9  ;;  %v200_v16 = vld [vmem:[%s1073_s19 + $0x88] sm:$0xff]  ;;  %v202_v19 = vld [vmem:[%s1073_s19 + $0x98] sm:$0xff]  ;;  %v203_v20 = vld [vmem:[%s1073_s19 + $0xa0] sm:$0xff]  ;;  %v219_v25 = vpack.c.bf16 %v192_v14, %v191_v13 }
  0x15   : > { %985 = vmatprep.mubr.msk.bf16.mxu0 %vm232_vm1, %v217_v10  ;;  %v223_v17 = vpack.c.bf16 %v200_v16, %v199_v15  ;;  %v224_v21 = vpack.c.bf16 %v202_v19, %v201_v18  ;;  %v204_v22 = vld [vmem:[%s1073_s19 + $0xa8] sm:$0xff]  ;;  %v205_v26 = vld [vmem:[%s1073_s19 + $0xb0] sm:$0xff]  ;;  %v206_v27 = vld [vmem:[%s1073_s19 + $0xb8] sm:$0xff] }
  0x16   : > { %v225_v24 = vpack.c.bf16 %v204_v22, %v203_v20  ;;  %v207_v28 = vld [vmem:[%s1073_s19 + $0xc0] sm:$0xff]  ;;  %v208_v29 = vld [vmem:[%s1073_s19 + $0xc8] sm:$0xff]  ;;  %v193_v30 = vld [vmem:[%s1073_s19 + $0x50] sm:$0xff]  ;;  %v226_v32 = vpack.c.bf16 %v206_v27, %v205_v26 }
  0x17   : > { %997 = vmatprep.mubr.msk.bf16.mxu1 %vm232_vm1, %v223_v17  ;;  %v194_v31 = vld [vmem:[%s1073_s19 + $0x58] sm:$0xff]  ;;  %v195_v33 = vld [vmem:[%s1073_s19 + $0x60] sm:$0xff]  ;;  %v196_v34 = vld [vmem:[%s1073_s19 + $0x68] sm:$0xff]  ;;  %v227_v35 = vpack.c.bf16 %v208_v29, %v207_v28 }
  0x18   : > { %998 = vmatmul.mubr.msk.bf16.vlgmr.msra.gmra.mrb[0].mxu1 %vm232_vm1, %v224_v21  ;;  %v220_v36 = vpack.c.bf16 %v194_v31, %v193_v30  ;;  %v221_v37 = vpack.c.bf16 %v196_v34, %v195_v33  ;;  %v209_v38 = vld [vmem:[%s1073_s19 + $0xd0] sm:$0xff]  ;;  %v210_v39 = vld [vmem:[%s1073_s19 + $0xd8] sm:$0xff]  ;;  %v211_v40 = vld [vmem:[%s1073_s19 + $0xe0] sm:$0xff] }
  0x19   : > { %1001 = vmatprep.mubr.msk.bf16.mxu1 %vm232_vm1, %v225_v24  ;;  %v212_v41 = vld [vmem:[%s1073_s19 + $0xe8] sm:$0xff]  ;;  %v197_v42 = vld [vmem:[%s1073_s19 + $0x70] sm:$0xff]  ;;  %v198_v43 = vld [vmem:[%s1073_s19 + $0x78] sm:$0xff]  ;;  %v228_v44 = vpack.c.bf16 %v210_v39, %v209_v38 }
  0x1a   : > { %v229_v45 = vpack.c.bf16 %v212_v41, %v211_v40  ;;  %v222_v46 = vpack.c.bf16 %v198_v43, %v197_v42  ;;  %v213_v47 = vld [vmem:[%s1073_s19 + $0xf0] sm:$0xff]  ;;  %v214_v48 = vld [vmem:[%s1073_s19 + $0xf8] sm:$0xff] }
  0x1b   : > { %v230_v49 = vpack.c.bf16 %v214_v48, %v213_v47 }
  0x1c   : > { %986 = vmatmul.mubr.msk.bf16.gmra.mrb[4].mxu0 %vm232_vm1, %v218_v23 }
  0x1d   : > { %989 = vmatprep.mubr.msk.bf16.mxu0 %vm232_vm1, %v219_v25 }
  0x20   : > { %1002 = vmatmul.mubr.msk.bf16.gmra.mrb[4].mxu1 %vm232_vm1, %v226_v32 }
  0x21   : > { %1005 = vmatprep.mubr.msk.bf16.mxu1 %vm232_vm1, %v227_v35 }
  0x24   : > { %990 = vmatmul.mubr.msk.bf16.gmra.mrb[8].mxu0 %vm232_vm1, %v220_v36 }
  0x25   : > { %993 = vmatprep.mubr.msk.bf16.mxu0 %vm232_vm1, %v221_v37 }
  0x28   : > { %1006 = vmatmul.mubr.msk.bf16.gmra.mrb[8].mxu1 %vm232_vm1, %v228_v44 }
  0x29   : > { %1009 = vmatprep.mubr.msk.bf16.mxu1 %vm232_vm1, %v229_v45 }
  0x2c   : > { %994 = vmatmul.mubr.msk.bf16.gmra.mrb[12].mxu0 %vm232_vm1, %v222_v46 }
  0x30   : > { %1010 = vmatmul.mubr.msk.bf16.gmra.mrb[12].mxu1 %vm232_vm1, %v230_v49 }
  0xe7   : > { %v983_v50 = vpop.f32.mrb[0].mxu0 }
  0xe8   : > { %v932_v51 = vpack.c.bf16 %v983_v50, %v983_v50  ;;  %v319_v52 = vpop.f32.mrb[1].mxu0  ;;  %v518_v56 = vmul.f32 %v983_v50, %v983_v50  ;;  %v450_v2 = vsel %vm446_vm3, %v983_v50, 0.0 }
  0xe9   : > { %v516_v53 = vmul.f32 %v319_v52, %v319_v52  ;;  %v930_v54 = vpack.c.bf16 %v319_v52, %v319_v52  ;;  %v984_v55 = vpop.f32.mrb[2].mxu0  ;;  %v447_v59 = vsel %vm446_vm3, %v319_v52, 0.0 }
  0xea   : > { %752 = vst.msk [vmem:[%s1127_s23 + $0x8] sm:$0xf] %vm749_vm2, %v932_v51  ;;  %v933_v57 = vpack.c.bf16 %v984_v55, %v984_v55  ;;  %v322_v58 = vpop.f32.mrb[3].mxu0  ;;  %v519_v63 = vmul.f32 %v984_v55, %v984_v55  ;;  %v551_v10 = vsel %vm446_vm3, %v518_v56, 0.0  ;;  %v452_v14 = vsel %vm446_vm3, %v984_v55, 0.0 }
  0xeb   : > { %750 = vst.msk [vmem:[%s1127_s23] sm:$0xf] %vm749_vm2, %v930_v54  ;;  %v448_v60 = vsel %vm446_vm3, %v322_v58, 0.0  ;;  %v517_v61 = vmul.f32 %v322_v58, %v322_v58  ;;  %v931_v62 = vpack.c.bf16 %v322_v58, %v322_v58  ;;  %v1137_v1 = vpop.f32.mrb[0].mxu1  ;;  %v548_v3 = vsel %vm446_vm3, %v516_v53, 0.0 }
  0xec   : > { %753 = vst.msk [vmem:[%s1127_s23 + $0xc] sm:$0xf] %vm749_vm2, %v933_v57  ;;  %v449_v0 = vadd.f32 %v448_v60, %v447_v59  ;;  %v948_v5 = vpack.c.bf16 %v1137_v1, %v1137_v1  ;;  %v1146_v6 = vpop.f32.mrb[1].mxu1  ;;  %v553_v15 = vsel %vm446_vm3, %v519_v63, 0.0 }
  0xed   : > { %v549_v4 = vsel %vm446_vm3, %v517_v61, 0.0  ;;  %751 = vst.msk [vmem:[%s1127_s23 + $0x4] sm:$0xf] %vm749_vm2, %v931_v62  ;;  %v1148_v9 = vpop.f32.mrb[2].mxu1  ;;  %v946_v12 = vpack.c.bf16 %v1146_v6, %v1146_v6 }
  0xee   : > { %v451_v7 = vadd.f32 %v450_v2, %v449_v0  ;;  %v550_v8 = vadd.f32 %v549_v4, %v548_v3  ;;  %768 = vst.msk [vmem:[%s1127_s23 + $0x48] sm:$0xf] %vm749_vm2, %v948_v5  ;;  %v1155_v13 = vpop.f32.mrb[3].mxu1  ;;  %v949_v36 = vpack.c.bf16 %v1148_v9, %v1148_v9 }
  0xef   : > { %v987_v11 = vpop.f32.mrb[4].mxu0  ;;  %766 = vst.msk [vmem:[%s1127_s23 + $0x40] sm:$0xf] %vm749_vm2, %v946_v12  ;;  %v947_v41 = vpack.c.bf16 %v1155_v13, %v1155_v13 }
  0xf0   : > { %v552_v16 = vadd.f32 %v551_v10, %v550_v8  ;;  %v936_v17 = vpack.c.bf16 %v987_v11, %v987_v11  ;;  %v335_v18 = vpop.f32.mrb[5].mxu0  ;;  %v453_v19 = vadd.f32 %v452_v14, %v451_v7  ;;  %v522_v30 = vmul.f32 %v987_v11, %v987_v11  ;;  %769 = vst.msk [vmem:[%s1127_s23 + $0x4c] sm:$0xf] %vm749_vm2, %v949_v36 }
  0xf1   : > { %v454_v20 = vsel %vm446_vm3, %v335_v18, 0.0  ;;  %v520_v21 = vmul.f32 %v335_v18, %v335_v18  ;;  %v934_v22 = vpack.c.bf16 %v335_v18, %v335_v18  ;;  %v988_v23 = vpop.f32.mrb[6].mxu0  ;;  %v458_v38 = vsel %vm446_vm3, %v987_v11, 0.0  ;;  %767 = vst.msk [vmem:[%s1127_s23 + $0x44] sm:$0xf] %vm749_vm2, %v947_v41 }
  0xf2   : > { %756 = vst.msk [vmem:[%s1127_s23 + $0x18] sm:$0xf] %vm749_vm2, %v936_v17  ;;  %v554_v24 = vadd.f32 %v553_v15, %v552_v16  ;;  %v338_v25 = vpop.f32.mrb[7].mxu0  ;;  %v455_v26 = vadd.f32 %v454_v20, %v453_v19  ;;  %v937_v28 = vpack.c.bf16 %v988_v23, %v988_v23  ;;  %v523_v39 = vmul.f32 %v988_v23, %v988_v23 }
  0xf3   : > { %v555_v27 = vsel %vm446_vm3, %v520_v21, 0.0  ;;  %754 = vst.msk [vmem:[%s1127_s23 + $0x10] sm:$0xf] %vm749_vm2, %v934_v22  ;;  %v456_v29 = vsel %vm446_vm3, %v338_v25, 0.0  ;;  %v521_v32 = vmul.f32 %v338_v25, %v338_v25  ;;  %v935_v33 = vpack.c.bf16 %v338_v25, %v338_v25  ;;  %v1168_v34 = vpop.f32.mrb[4].mxu1 }
  0xf4   : > { %v556_v31 = vadd.f32 %v555_v27, %v554_v24  ;;  %757 = vst.msk [vmem:[%s1127_s23 + $0x1c] sm:$0xf] %vm749_vm2, %v937_v28  ;;  %v457_v35 = vadd.f32 %v456_v29, %v455_v26  ;;  %v1174_v37 = vpop.f32.mrb[5].mxu1  ;;  %v559_v47 = vsel %vm446_vm3, %v522_v30, 0.0  ;;  %v460_v48 = vsel %vm446_vm3, %v988_v23, 0.0 }
  0xf5   : > { %v557_v40 = vsel %vm446_vm3, %v521_v32, 0.0  ;;  %755 = vst.msk [vmem:[%s1127_s23 + $0x14] sm:$0xf] %vm749_vm2, %v935_v33  ;;  %v1182_v42 = vpop.f32.mrb[6].mxu1  ;;  %v561_v56 = vsel %vm446_vm3, %v523_v39, 0.0  ;;  %v952_v8 = vpack.c.bf16 %v1168_v34, %v1168_v34  ;;  %v950_v15 = vpack.c.bf16 %v1174_v37, %v1174_v37 }
  0xf6   : > { %v459_v43 = vadd.f32 %v458_v38, %v457_v35  ;;  %v558_v44 = vadd.f32 %v557_v40, %v556_v31  ;;  %v1186_v46 = vpop.f32.mrb[7].mxu1 }
  0xf7   : > { %v991_v45 = vpop.f32.mrb[8].mxu0  ;;  %772 = vst.msk [vmem:[%s1127_s23 + $0x58] sm:$0xf] %vm749_vm2, %v952_v8  ;;  %770 = vst.msk [vmem:[%s1127_s23 + $0x50] sm:$0xf] %vm749_vm2, %v950_v15 }
  0xf8   : > { %v940_v49 = vpack.c.bf16 %v991_v45, %v991_v45  ;;  %v351_v50 = vpop.f32.mrb[9].mxu0  ;;  %v560_v51 = vadd.f32 %v559_v47, %v558_v44  ;;  %v461_v52 = vadd.f32 %v460_v48, %v459_v43  ;;  %v526_v63 = vmul.f32 %v991_v45, %v991_v45 }
  0xf9   : > { %v462_v53 = vsel %vm446_vm3, %v351_v50, 0.0  ;;  %v524_v54 = vmul.f32 %v351_v50, %v351_v50  ;;  %v992_v55 = vpop.f32.mrb[10].mxu0  ;;  %v938_v57 = vpack.c.bf16 %v351_v50, %v351_v50  ;;  %v466_v11 = vsel %vm446_vm3, %v991_v45, 0.0 }
  0xfa   : > { %760 = vst.msk [vmem:[%s1127_s23 + $0x28] sm:$0xf] %vm749_vm2, %v940_v49  ;;  %v354_v58 = vpop.f32.mrb[11].mxu0  ;;  %v463_v59 = vadd.f32 %v462_v53, %v461_v52  ;;  %v562_v60 = vadd.f32 %v561_v56, %v560_v51  ;;  %v941_v62 = vpack.c.bf16 %v992_v55, %v992_v55  ;;  %v527_v12 = vmul.f32 %v992_v55, %v992_v55 }
  0xfb   : > { %v563_v61 = vsel %vm446_vm3, %v524_v54, 0.0  ;;  %758 = vst.msk [vmem:[%s1127_s23 + $0x20] sm:$0xf] %vm749_vm2, %v938_v57  ;;  %v464_v0 = vsel %vm446_vm3, %v354_v58, 0.0  ;;  %v525_v2 = vmul.f32 %v354_v58, %v354_v58  ;;  %v939_v3 = vpack.c.bf16 %v354_v58, %v354_v58  ;;  %v1200_v4 = vpop.f32.mrb[8].mxu1 }
  0xfc   : > { %v564_v5 = vadd.f32 %v563_v61, %v562_v60  ;;  %761 = vst.msk [vmem:[%s1127_s23 + $0x2c] sm:$0xf] %vm749_vm2, %v941_v62  ;;  %v465_v7 = vadd.f32 %v464_v0, %v463_v59  ;;  %v1206_v10 = vpop.f32.mrb[9].mxu1  ;;  %v567_v21 = vsel %vm446_vm3, %v526_v63, 0.0  ;;  %v468_v22 = vsel %vm446_vm3, %v992_v55, 0.0 }
  0xfd   : > { %v565_v14 = vsel %vm446_vm3, %v525_v2, 0.0  ;;  %759 = vst.msk [vmem:[%s1127_s23 + $0x24] sm:$0xf] %vm749_vm2, %v939_v3  ;;  %v1214_v16 = vpop.f32.mrb[10].mxu1  ;;  %v569_v30 = vsel %vm446_vm3, %v527_v12, 0.0  ;;  %v532_v48 = vmul.f32 %v1146_v6, %v1146_v6  ;;  %v953_v49 = vpack.c.bf16 %v1182_v42, %v1182_v42 }
  0xfe   : > { %v467_v17 = vadd.f32 %v466_v11, %v465_v7  ;;  %v566_v18 = vadd.f32 %v565_v14, %v564_v5  ;;  %v1218_v20 = vpop.f32.mrb[11].mxu1  ;;  %v951_v54 = vpack.c.bf16 %v1186_v46, %v1186_v46  ;;  %v478_v61 = vsel %vm446_vm3, %v1146_v6, 0.0 }
  0xff   : > { %v995_v19 = vpop.f32.mrb[12].mxu0  ;;  %773 = vst.msk [vmem:[%s1127_s23 + $0x5c] sm:$0xf] %vm749_vm2, %v953_v49  ;;  %v956_v62 = vpack.c.bf16 %v1200_v4, %v1200_v4  ;;  %v954_v2 = vpack.c.bf16 %v1206_v10, %v1206_v10  ;;  %v579_v5 = vsel %vm446_vm3, %v532_v48, 0.0  ;;  %v533_v7 = vmul.f32 %v1155_v13, %v1155_v13 }
 0x100   : > { %v944_v23 = vpack.c.bf16 %v995_v19, %v995_v19  ;;  %v367_v24 = vpop.f32.mrb[13].mxu0  ;;  %v568_v25 = vadd.f32 %v567_v21, %v566_v18  ;;  %v469_v26 = vadd.f32 %v468_v22, %v467_v17  ;;  %v530_v39 = vmul.f32 %v995_v19, %v995_v19  ;;  %771 = vst.msk [vmem:[%s1127_s23 + $0x54] sm:$0xf] %vm749_vm2, %v951_v54 }
 0x101   : > { %v470_v27 = vsel %vm446_vm3, %v367_v24, 0.0  ;;  %v528_v28 = vmul.f32 %v367_v24, %v367_v24  ;;  %v996_v29 = vpop.f32.mrb[14].mxu0  ;;  %v942_v31 = vpack.c.bf16 %v367_v24, %v367_v24  ;;  %v474_v51 = vsel %vm446_vm3, %v995_v19, 0.0  ;;  %776 = vst.msk [vmem:[%s1127_s23 + $0x68] sm:$0xf] %vm749_vm2, %v956_v62 }
 0x102   : > { %764 = vst.msk [vmem:[%s1127_s23 + $0x38] sm:$0xf] %vm749_vm2, %v944_v23  ;;  %v370_v32 = vpop.f32.mrb[15].mxu0  ;;  %v471_v33 = vadd.f32 %v470_v27, %v469_v26  ;;  %v570_v35 = vadd.f32 %v569_v30, %v568_v25  ;;  %v945_v38 = vpack.c.bf16 %v996_v29, %v996_v29  ;;  %v531_v52 = vmul.f32 %v996_v29, %v996_v29 }
 0x103   : > { %v571_v36 = vsel %vm446_vm3, %v528_v28, 0.0  ;;  %762 = vst.msk [vmem:[%s1127_s23 + $0x30] sm:$0xf] %vm749_vm2, %v942_v31  ;;  %v472_v40 = vsel %vm446_vm3, %v370_v32, 0.0  ;;  %v529_v41 = vmul.f32 %v370_v32, %v370_v32  ;;  %v943_v43 = vpack.c.bf16 %v370_v32, %v370_v32  ;;  %v1232_v44 = vpop.f32.mrb[12].mxu1 }
 0x104   : > { %v572_v45 = vadd.f32 %v571_v36, %v570_v35  ;;  %765 = vst.msk [vmem:[%s1127_s23 + $0x3c] sm:$0xf] %vm749_vm2, %v945_v38  ;;  %v473_v47 = vadd.f32 %v472_v40, %v471_v33  ;;  %v1240_v50 = vpop.f32.mrb[13].mxu1  ;;  %v575_v59 = vsel %vm446_vm3, %v530_v39, 0.0  ;;  %v476_v60 = vsel %vm446_vm3, %v996_v29, 0.0 }
 0x105   : > { %v573_v53 = vsel %vm446_vm3, %v529_v41, 0.0  ;;  %763 = vst.msk [vmem:[%s1127_s23 + $0x34] sm:$0xf] %vm749_vm2, %v943_v43  ;;  %v1248_v55 = vpop.f32.mrb[14].mxu1  ;;  %v577_v3 = vsel %vm446_vm3, %v531_v52, 0.0  ;;  %v957_v6 = vpack.c.bf16 %v1214_v16, %v1214_v16  ;;  %v534_v12 = vmul.f32 %v1137_v1, %v1137_v1 }
 0x106   : > { %v475_v56 = vadd.f32 %v474_v51, %v473_v47  ;;  %v574_v57 = vadd.f32 %v573_v53, %v572_v45  ;;  %v1252_v58 = vpop.f32.mrb[15].mxu1  ;;  %774 = vst.msk [vmem:[%s1127_s23 + $0x60] sm:$0xf] %vm749_vm2, %v954_v2  ;;  %v480_v14 = vsel %vm446_vm3, %v1155_v13, 0.0  ;;  %v955_v15 = vpack.c.bf16 %v1218_v20, %v1218_v20 }
 0x107   : > { %777 = vst.msk [vmem:[%s1127_s23 + $0x6c] sm:$0xf] %vm749_vm2, %v957_v6  ;;  %v482_v17 = vsel %vm446_vm3, %v1137_v1, 0.0  ;;  %v960_v21 = vpack.c.bf16 %v1232_v44, %v1232_v44  ;;  %v535_v22 = vmul.f32 %v1148_v9, %v1148_v9  ;;  %v581_v23 = vsel %vm446_vm3, %v533_v7, 0.0 }
 0x108   : > { %v576_v63 = vadd.f32 %v575_v59, %v574_v57  ;;  %v477_v0 = vadd.f32 %v476_v60, %v475_v56  ;;  %v536_v13 = vmul.f32 %v1174_v37, %v1174_v37  ;;  %775 = vst.msk [vmem:[%s1127_s23 + $0x64] sm:$0xf] %vm749_vm2, %v955_v15  ;;  %v958_v24 = vpack.c.bf16 %v1240_v50, %v1240_v50 }
 0x109   : > { %780 = vst.msk [vmem:[%s1127_s23 + $0x78] sm:$0xf] %vm749_vm2, %v960_v21  ;;  %v583_v26 = vsel %vm446_vm3, %v534_v12, 0.0  ;;  %v484_v27 = vsel %vm446_vm3, %v1148_v9, 0.0  ;;  %v486_v28 = vsel %vm446_vm3, %v1174_v37, 0.0  ;;  %v961_v29 = vpack.c.bf16 %v1248_v55, %v1248_v55 }
 0x10a   : > { %v479_v8 = vadd.f32 %v478_v61, %v477_v0  ;;  %v578_v11 = vadd.f32 %v577_v3, %v576_v63  ;;  %778 = vst.msk [vmem:[%s1127_s23 + $0x70] sm:$0xf] %vm749_vm2, %v958_v24  ;;  %v959_v32 = vpack.c.bf16 %v1252_v58, %v1252_v58  ;;  %v585_v33 = vsel %vm446_vm3, %v535_v22, 0.0 }
 0x10b   : > { %v587_v35 = vsel %vm446_vm3, %v536_v13, 0.0  ;;  %v537_v9 = vmul.f32 %v1186_v46, %v1186_v46  ;;  %781 = vst.msk [vmem:[%s1127_s23 + $0x7c] sm:$0xf] %vm749_vm2, %v961_v29  ;;  %v538_v38 = vmul.f32 %v1168_v34, %v1168_v34  ;;  %v488_v39 = vsel %vm446_vm3, %v1186_v46, 0.0 }
 0x10c   : > { %v580_v18 = vadd.f32 %v579_v5, %v578_v11  ;;  %v481_v19 = vadd.f32 %v480_v14, %v479_v8  ;;  %779 = vst.msk [vmem:[%s1127_s23 + $0x74] sm:$0xf] %vm749_vm2, %v959_v32  ;;  %v490_v43 = vsel %vm446_vm3, %v1168_v34, 0.0  ;;  %v539_v45 = vmul.f32 %v1182_v42, %v1182_v42 }
 0x10d   : > { %v589_v47 = vsel %vm446_vm3, %v537_v9, 0.0  ;;  %v540_v48 = vmul.f32 %v1206_v10, %v1206_v10  ;;  %v591_v52 = vsel %vm446_vm3, %v538_v38, 0.0  ;;  %v492_v46 = vsel %vm446_vm3, %v1182_v42, 0.0 }
 0x10e   : > { %v483_v1 = vadd.f32 %v482_v17, %v481_v19  ;;  %v582_v25 = vadd.f32 %v581_v23, %v580_v18  ;;  %v494_v53 = vsel %vm446_vm3, %v1206_v10, 0.0  ;;  %v593_v56 = vsel %vm446_vm3, %v539_v45, 0.0 }
 0x10f   : > { %v595_v57 = vsel %vm446_vm3, %v540_v48, 0.0  ;;  %v541_v59 = vmul.f32 %v1218_v20, %v1218_v20  ;;  %v542_v62 = vmul.f32 %v1200_v4, %v1200_v4  ;;  %v496_v42 = vsel %vm446_vm3, %v1218_v20, 0.0 }
 0x110   : > { %v584_v30 = vadd.f32 %v583_v26, %v582_v25  ;;  %v485_v31 = vadd.f32 %v484_v27, %v483_v1  ;;  %v498_v10 = vsel %vm446_vm3, %v1200_v4, 0.0  ;;  %v543_v2 = vmul.f32 %v1214_v16, %v1214_v16 }
 0x111   : > { %v597_v3 = vsel %vm446_vm3, %v541_v59, 0.0  ;;  %v544_v5 = vmul.f32 %v1240_v50, %v1240_v50  ;;  %v599_v8 = vsel %vm446_vm3, %v542_v62, 0.0  ;;  %v500_v20 = vsel %vm446_vm3, %v1214_v16, 0.0 }
 0x112   : > { %v487_v37 = vadd.f32 %v486_v28, %v485_v31  ;;  %v586_v36 = vadd.f32 %v585_v33, %v584_v30  ;;  %v502_v11 = vsel %vm446_vm3, %v1240_v50, 0.0  ;;  %v601_v14 = vsel %vm446_vm3, %v543_v2, 0.0 }
 0x113   : > { %v603_v15 = vsel %vm446_vm3, %v544_v5, 0.0  ;;  %v545_v17 = vmul.f32 %v1252_v58, %v1252_v58  ;;  %v546_v21 = vmul.f32 %v1232_v44, %v1232_v44  ;;  %v504_v16 = vsel %vm446_vm3, %v1252_v58, 0.0 }
 0x114   : > { %v588_v40 = vadd.f32 %v587_v35, %v586_v36  ;;  %v489_v41 = vadd.f32 %v488_v39, %v487_v37  ;;  %v506_v50 = vsel %vm446_vm3, %v1232_v44, 0.0  ;;  %v547_v13 = vmul.f32 %v1248_v55, %v1248_v55 }
 0x115   : > { %v605_v24 = vsel %vm446_vm3, %v545_v17, 0.0  ;;  %v607_v26 = vsel %vm446_vm3, %v546_v21, 0.0  ;;  %v508_v27 = vsel %vm446_vm3, %v1248_v55, 0.0 }
 0x116   : > { %v491_v49 = vadd.f32 %v490_v43, %v489_v41  ;;  %v590_v51 = vadd.f32 %v589_v47, %v588_v40  ;;  %v609_v29 = vsel %vm446_vm3, %v547_v13, 0.0 }
 0x118   : > { %v592_v54 = vadd.f32 %v591_v52, %v590_v51  ;;  %v493_v34 = vadd.f32 %v492_v46, %v491_v49 }
 0x11a   : > { %v495_v60 = vadd.f32 %v494_v53, %v493_v34  ;;  %v594_v61 = vadd.f32 %v593_v56, %v592_v54 }
 0x11c   : > { %v596_v63 = vadd.f32 %v595_v57, %v594_v61  ;;  %v497_v0 = vadd.f32 %v496_v42, %v495_v60 }
 0x11e   : > { %v499_v7 = vadd.f32 %v498_v10, %v497_v0  ;;  %v598_v6 = vadd.f32 %v597_v3, %v596_v63 }
 0x120   : > { %v600_v12 = vadd.f32 %v599_v8, %v598_v6  ;;  %v501_v4 = vadd.f32 %v500_v20, %v499_v7 }
 0x122   : > { %v503_v18 = vadd.f32 %v502_v11, %v501_v4  ;;  %v602_v19 = vadd.f32 %v601_v14, %v600_v12 }
 0x124   : > { %v604_v22 = vadd.f32 %v603_v15, %v602_v19  ;;  %v505_v23 = vadd.f32 %v504_v16, %v503_v18 }
 0x126   : > { %v507_v1 = vadd.f32 %v506_v50, %v505_v23  ;;  %v606_v25 = vadd.f32 %v605_v24, %v604_v22 }
 0x128   : > { %v509_v28 = vadd.f32 %v508_v27, %v507_v1  ;;  %v608_v58 = vadd.f32 %v607_v26, %v606_v25 }
 0x12a   : > { %v510_v30 = vrot.slane %v509_v28, 4  ;;  %v610_v31 = vadd.f32 %v609_v29, %v608_v58 }
 0x12c   : > { %v511_v44 = vadd.f32 %v510_v30, %v509_v28  ;;  %v611_v32 = vrot.slane %v610_v31, 4 }
 0x12e   : > { %v512_v33 = vrot.slane %v511_v44, 2  ;;  %v612_v35 = vadd.f32 %v611_v32, %v610_v31 }
 0x130   : > { %v513_v9 = vadd.f32 %v512_v33, %v511_v44  ;;  %v613_v37 = vrot.slane %v612_v35, 2 }
 0x132   : > { %v514_v36 = vrot.slane %v513_v9, 1  ;;  %v614_v38 = vadd.f32 %v613_v37, %v612_v35 }
 0x134   : > { %v615_v39 = vrot.slane %v614_v38, 1  ;;  %v515_v40 = vadd.f32 %v514_v36, %v513_v9 }
 0x136   : > { %v616_v41 = vadd.f32 %v615_v39, %v614_v38 }
 0x138   : > { %v618_v55 = vsel %vm617_vm4, %v515_v40, %v616_v41 }
 0x139   : > { %v619_v43 = vsel %vm281_vm0, %v618_v55, 0.0 }
 0x13a   : > { %620 = vst.msk [vmem:[%s181_s27] sm:$0xff] %vm446_vm3, %v619_v43 }
 0x13b PF: > { %s14_s12 = sadd.s32 1, %s1031_s12  }
 0x13c   : > { %p11_p4 = scmp.ge.s32.totalorder %s14_s12, 4  }
 0x13e   :  { %13 = sbr.rel (!%p11_p4) target bundleno = 1 (0x1), region = 70 }

// kernel: bottleneck_block_pallas.7
= control target key start
LH: loop header
LB: loop body
LE: loop exit
PB: predicated region body
PF: predicated region fallthrough
CT: control target
= control target key end

     0   :  { %8 = vsyncpa [#allocation3], 0  ;;  %s941_s0 = inlined_call_operand.vmem [shape: bf16[2,16,16,16], index: 0, kind: input, shape index: {}]   ;;  %s942_s1 = inlined_call_operand.vmem [shape: f32[1,16], index: 1, kind: input, shape index: {}]   ;;  %s943_s2 = inlined_call_operand.vmem [shape: f32[1,16], index: 2, kind: input, shape index: {}]   ;;  %s944_s3 = inlined_call_operand.hbm [shape: f32[2,16,16,16], index: 3, kind: output, shape index: {}]  }
   0x1   :  { %10 = vsyncpa [#allocation3 + $0x1], 0  ;;  %s675_s12 = smov 0   ;;  %s677_s13 = smov 0  }
   0x2   :  { %s679_s14 = smov 0   ;;  %s681_s15 = smov 0  }
   0x3 LB: > { %s696_s16 = sadd.s32 4294967295, %s650_s15   ;;  %s452_s17 = sadd.s32 4294967294, %s650_s15   ;;  %s650_s15 = sphi %s681_s15, %s950_s15   ;;  %s646_s14 = sphi %s679_s14, %s949_s14   ;;  %s642_s13 = sphi %s677_s13, %s948_s13   ;;  %s638_s12 = sphi %s675_s12, %s947_s12  }
   0x4   : > { %s700_s18 = sadd.s32 1, %s650_s15   ;;  %s91_s19 = sadd.s32 1, %s646_s14 }
   0x5   : > { %s88_s20 = ssub.s32 %s650_s15, %s700_s18  ;;  %p101_p0 = scmp.ne.s32.totalorder %s646_s14, %s642_s13 }
   0x6   : > { %p89_p1 = scmp.eq.s32.totalorder %s88_s20, 0  ;;  %p102_p2 = scmp.eq.s32.totalorder %s696_s16, 1 }
   0x7   : > { %p107_p3 = scmp.ne.s32.totalorder %s642_s13, %s638_s12  ;;  %p108_p4 = scmp.eq.s32.totalorder %s452_s17, 1 }
   0x8   : > { %s711_s21 = scalar_select %p89_p1, %s646_s14, %s91_s19  }
   0x9   : > { %p713_p5 = por %p102_p2, %p101_p0  ;;  %p717_p6 = por %p108_p4, %p107_p3 }
   0xa   : > { %p455_p7 = scmp.ge.s32.totalorder %s650_s15, 1  ;;  %p140_p8 = scmp.lt.s32.totalorder %s650_s15, 3 }
   0xc   : > { %p141_p9 = pnand %p455_p7, %p140_p8 }
   0xd   : > { %p164_p10 = scmp.lt.s32.totalorder (!%p141_p9), %s696_s16, 1  ;;  %v733_v0 = vld [vmem:[%s942_s1] ss:$0 sm:$0xff] (!%p141_p9)  ;;  %s161_s4 = sand.u32 (!%p141_p9), 1, %s642_s13   ;;  %vm343_vm0 = vcmask (!%p141_p9), 130048  }
   0xe   : > { %144 = sbr.rel (%p141_p9) target bundleno = 76 (0x4c), region = 32  ;;  %v743_v9 = vld [vmem:[%s943_s2] ss:$0 sm:$0xff] (!%p141_p9)  ;;  %s456_s7 = sshll.u32 (!%p141_p9), %s161_s4, 8 }
   0xf   : > { %s767_s8 = scalar_lea.vmem (!%p141_p9), [#allocation2], %s456_s7  ;;  %s467_s9 = sshll.u32 (!%p141_p9), %s696_s16, 12 }
  0x10   : > { %s390_s10 = sshll.u32 (!%p141_p9), %s767_s8, 4  ;;  %s878_s17 = scalar_lea.hbm (!%p141_p9), %s944_s3, %s467_s9  ;;  %s880_s10 = int_to_ptr.vmem [resolvable:$true] %s390_s10 }
  0x11   : > { %s900_s19 = scalar_lea.sflag (!%p141_p9), [#allocation3], %s161_s4  ;;  %s588_s20 = scalar_lea.vmem (!%p141_p9), %s880_s10, 4096 }
  0x12   : > { %p589_p11 = scmp.ne.s32.totalorder (!%p141_p9), %s880_s10, %s588_s20 }
  0x14   : > { %p590_p12 = pnand (!%p141_p9), %p589_p11, %p713_p5 }
  0x15   : > { %s165_s24 = scalar_select %p164_p10, %s696_s16, 1 }
  0x16   : > { %p591_p13 = pneg %p590_p12 }
  0x17   : > { %s466_s25 = sshll.u32 %s165_s24, 7  ;;  %s652_s24 = smov [#allocation2]  }
  0x18   : > { %s728_s28 = scalar_lea.vmem %s941_s0, %s466_s25  ;;  %s592_s25 = sshll.u32 %s652_s24, 4  ;;  %s593_s25 = int_to_ptr.vmem [resolvable:$false] %s592_s25 }
  0x19   : > { %v469_v1 = vld [vmem:[%s728_s28] sm:$0xff]   ;;  %v532_v2 = vld [vmem:[%s728_s28 + $0x8] sm:$0xff]   ;;  %v533_v3 = vld [vmem:[%s728_s28 + $0x10] sm:$0xff]   ;;  %s594_s26 = scalar_lea.vmem %s593_s25, 8192  ;;  %p595_p0 = scmp.lt.s32.totalorder %s880_s10, %s593_s25 }
  0x1a   : > { %v470_v4 = vunpack.c.l.bf16 %v469_v1  ;;  %v471_v5 = vunpack.c.h.bf16 %v469_v1  ;;  %v474_v6 = vunpack.c.l.bf16 %v532_v2  ;;  %v475_v7 = vunpack.c.h.bf16 %v532_v2  ;;  %v534_v8 = vld [vmem:[%s728_s28 + $0x18] sm:$0xff]   ;;  %v535_v30 = vld [vmem:[%s728_s28 + $0x20] sm:$0xff]   ;;  %v536_v31 = vld [vmem:[%s728_s28 + $0x28] sm:$0xff]   ;;  %p596_p1 = scmp.lt.s32.totalorder %s594_s26, %s588_s20 }
  0x1b   : > { %v478_v10 = vunpack.c.l.bf16 %v533_v3  ;;  %v479_v11 = vunpack.c.h.bf16 %v533_v3  ;;  %v482_v12 = vunpack.c.l.bf16 %v534_v8  ;;  %v483_v13 = vunpack.c.h.bf16 %v534_v8  ;;  %v537_v36 = vld [vmem:[%s728_s28 + $0x30] sm:$0xff]   ;;  %v538_v37 = vld [vmem:[%s728_s28 + $0x38] sm:$0xff]   ;;  %v539_v3 = vld [vmem:[%s728_s28 + $0x40] sm:$0xff]  }
  0x1c   : > { %v240_v14 = vmul.f32 %v470_v4, %v733_v0  ;;  %v241_v15 = vmul.f32 %v471_v5, %v733_v0  ;;  %v242_v16 = vmul.f32 %v474_v6, %v733_v0  ;;  %v243_v17 = vmul.f32 %v475_v7, %v733_v0  ;;  %v540_v4 = vld [vmem:[%s728_s28 + $0x48] sm:$0xff]   ;;  %p597_p2 = por %p596_p1, %p595_p0 }
  0x1d   : > { %v244_v18 = vmul.f32 %v478_v10, %v733_v0  ;;  %v245_v19 = vmul.f32 %v479_v11, %v733_v0  ;;  %v246_v20 = vmul.f32 %v482_v12, %v733_v0  ;;  %v247_v21 = vmul.f32 %v483_v13, %v733_v0  ;;  %v541_v10 = vld [vmem:[%s728_s28 + $0x50] sm:$0xff]   ;;  %v542_v11 = vld [vmem:[%s728_s28 + $0x58] sm:$0xff]  }
  0x1e   : > { %v279_v22 = vadd.f32 %v743_v9, %v240_v14  ;;  %v280_v23 = vadd.f32 %v743_v9, %v241_v15  ;;  %v281_v24 = vadd.f32 %v743_v9, %v242_v16  ;;  %v282_v25 = vadd.f32 %v743_v9, %v243_v17  ;;  %p598_p3 = pnand %p597_p2, %p591_p13 }
  0x1f   : > { %v283_v26 = vadd.f32 %v743_v9, %v244_v18  ;;  %v284_v27 = vadd.f32 %v743_v9, %v245_v19  ;;  %v285_v28 = vadd.f32 %v743_v9, %v246_v20  ;;  %v286_v29 = vadd.f32 %v743_v9, %v247_v21 }
  0x20   : > { %v311_v32 = vmax.f32 %v279_v22, 0.0  ;;  %v312_v33 = vmax.f32 %v280_v23, 0.0  ;;  %v313_v34 = vmax.f32 %v281_v24, 0.0  ;;  %v314_v35 = vmax.f32 %v282_v25, 0.0 }
  0x21   : > { %v315_v38 = vmax.f32 %v283_v26, 0.0  ;;  %v316_v39 = vmax.f32 %v284_v27, 0.0  ;;  %v317_v40 = vmax.f32 %v285_v28, 0.0  ;;  %v318_v41 = vmax.f32 %v286_v29, 0.0 }
  0x22   : > { %344 = vst.msk [vmem:[%s767_s8] sm:$0xff] %vm343_vm0, %v311_v32  ;;  %345 = vst.msk [vmem:[%s767_s8 + $0x8] sm:$0xff] %vm343_vm0, %v312_v33  ;;  %v486_v42 = vunpack.c.l.bf16 %v535_v30  ;;  %v487_v43 = vunpack.c.h.bf16 %v535_v30  ;;  %v490_v44 = vunpack.c.l.bf16 %v536_v31  ;;  %v491_v45 = vunpack.c.h.bf16 %v536_v31 }
  0x23   : > { %346 = vst.msk [vmem:[%s767_s8 + $0x10] sm:$0xff] %vm343_vm0, %v313_v34  ;;  %347 = vst.msk [vmem:[%s767_s8 + $0x18] sm:$0xff] %vm343_vm0, %v314_v35  ;;  %v494_v46 = vunpack.c.l.bf16 %v537_v36  ;;  %v495_v47 = vunpack.c.h.bf16 %v537_v36  ;;  %v498_v48 = vunpack.c.l.bf16 %v538_v37  ;;  %v499_v49 = vunpack.c.h.bf16 %v538_v37 }
  0x24   : > { %348 = vst.msk [vmem:[%s767_s8 + $0x20] sm:$0xff] %vm343_vm0, %v315_v38  ;;  %349 = vst.msk [vmem:[%s767_s8 + $0x28] sm:$0xff] %vm343_vm0, %v316_v39  ;;  %v248_v50 = vmul.f32 %v486_v42, %v733_v0  ;;  %v249_v51 = vmul.f32 %v487_v43, %v733_v0  ;;  %v250_v52 = vmul.f32 %v490_v44, %v733_v0  ;;  %v502_v16 = vunpack.c.l.bf16 %v539_v3 }
  0x25   : > { %350 = vst.msk [vmem:[%s767_s8 + $0x30] sm:$0xff] %vm343_vm0, %v317_v40  ;;  %351 = vst.msk [vmem:[%s767_s8 + $0x38] sm:$0xff] %vm343_vm0, %v318_v41  ;;  %v251_v53 = vmul.f32 %v491_v45, %v733_v0  ;;  %v252_v54 = vmul.f32 %v494_v46, %v733_v0  ;;  %v253_v55 = vmul.f32 %v495_v47, %v733_v0  ;;  %v503_v17 = vunpack.c.h.bf16 %v539_v3  ;;  %v543_v40 = vld [vmem:[%s728_s28 + $0x60] sm:$0xff]   ;;  %v544_v41 = vld [vmem:[%s728_s28 + $0x68] sm:$0xff]  }
  0x26   : > { %v254_v56 = vmul.f32 %v498_v48, %v733_v0  ;;  %v255_v57 = vmul.f32 %v499_v49, %v733_v0  ;;  %v287_v58 = vadd.f32 %v743_v9, %v248_v50  ;;  %v288_v59 = vadd.f32 %v743_v9, %v249_v51  ;;  %v545_v46 = vld [vmem:[%s728_s28 + $0x70] sm:$0xff]   ;;  %v546_v47 = vld [vmem:[%s728_s28 + $0x78] sm:$0xff]  }
  0x27   : > { %v289_v60 = vadd.f32 %v743_v9, %v250_v52  ;;  %v290_v61 = vadd.f32 %v743_v9, %v251_v53  ;;  %v291_v62 = vadd.f32 %v743_v9, %v252_v54  ;;  %v292_v63 = vadd.f32 %v743_v9, %v253_v55 }
  0x28   : > { %v293_v1 = vadd.f32 %v743_v9, %v254_v56  ;;  %v294_v2 = vadd.f32 %v743_v9, %v255_v57  ;;  %v319_v5 = vmax.f32 %v287_v58, 0.0  ;;  %v320_v6 = vmax.f32 %v288_v59, 0.0 }
  0x29   : > { %v321_v7 = vmax.f32 %v289_v60, 0.0  ;;  %v322_v8 = vmax.f32 %v290_v61, 0.0  ;;  %v323_v12 = vmax.f32 %v291_v62, 0.0  ;;  %v324_v13 = vmax.f32 %v292_v63, 0.0 }
  0x2a   : > { %v325_v14 = vmax.f32 %v293_v1, 0.0  ;;  %v326_v15 = vmax.f32 %v294_v2, 0.0  ;;  %352 = vst.msk [vmem:[%s767_s8 + $0x40] sm:$0xff] %vm343_vm0, %v319_v5  ;;  %353 = vst.msk [vmem:[%s767_s8 + $0x48] sm:$0xff] %vm343_vm0, %v320_v6  ;;  %v506_v18 = vunpack.c.l.bf16 %v540_v4  ;;  %v507_v19 = vunpack.c.h.bf16 %v540_v4 }
  0x2b   : > { %354 = vst.msk [vmem:[%s767_s8 + $0x50] sm:$0xff] %vm343_vm0, %v321_v7  ;;  %355 = vst.msk [vmem:[%s767_s8 + $0x58] sm:$0xff] %vm343_vm0, %v322_v8  ;;  %v510_v20 = vunpack.c.l.bf16 %v541_v10  ;;  %v511_v21 = vunpack.c.h.bf16 %v541_v10  ;;  %v514_v22 = vunpack.c.l.bf16 %v542_v11  ;;  %v515_v23 = vunpack.c.h.bf16 %v542_v11 }
  0x2c   : > { %356 = vst.msk [vmem:[%s767_s8 + $0x60] sm:$0xff] %vm343_vm0, %v323_v12  ;;  %357 = vst.msk [vmem:[%s767_s8 + $0x68] sm:$0xff] %vm343_vm0, %v324_v13  ;;  %v256_v24 = vmul.f32 %v502_v16, %v733_v0  ;;  %v257_v25 = vmul.f32 %v503_v17, %v733_v0  ;;  %v258_v26 = vmul.f32 %v506_v18, %v733_v0  ;;  %v518_v52 = vunpack.c.l.bf16 %v543_v40 }
  0x2d   : > { %358 = vst.msk [vmem:[%s767_s8 + $0x70] sm:$0xff] %vm343_vm0, %v325_v14  ;;  %359 = vst.msk [vmem:[%s767_s8 + $0x78] sm:$0xff] %vm343_vm0, %v326_v15  ;;  %v259_v27 = vmul.f32 %v507_v19, %v733_v0  ;;  %v260_v28 = vmul.f32 %v510_v20, %v733_v0  ;;  %v261_v29 = vmul.f32 %v511_v21, %v733_v0  ;;  %v519_v53 = vunpack.c.h.bf16 %v543_v40 }
  0x2e   : > { %v262_v30 = vmul.f32 %v514_v22, %v733_v0  ;;  %v263_v31 = vmul.f32 %v515_v23, %v733_v0  ;;  %v295_v32 = vadd.f32 %v743_v9, %v256_v24  ;;  %v296_v33 = vadd.f32 %v743_v9, %v257_v25 }
  0x2f   : > { %v297_v34 = vadd.f32 %v743_v9, %v258_v26  ;;  %v298_v35 = vadd.f32 %v743_v9, %v259_v27  ;;  %v299_v36 = vadd.f32 %v743_v9, %v260_v28  ;;  %v300_v37 = vadd.f32 %v743_v9, %v261_v29 }
  0x30   : > { %v301_v38 = vadd.f32 %v743_v9, %v262_v30  ;;  %v302_v39 = vadd.f32 %v743_v9, %v263_v31  ;;  %v327_v42 = vmax.f32 %v295_v32, 0.0  ;;  %v328_v43 = vmax.f32 %v296_v33, 0.0 }
  0x31   : > { %v329_v44 = vmax.f32 %v297_v34, 0.0  ;;  %v330_v45 = vmax.f32 %v298_v35, 0.0  ;;  %v331_v48 = vmax.f32 %v299_v36, 0.0  ;;  %v332_v49 = vmax.f32 %v300_v37, 0.0 }
  0x32   : > { %v333_v50 = vmax.f32 %v301_v38, 0.0  ;;  %v334_v51 = vmax.f32 %v302_v39, 0.0  ;;  %360 = vst.msk [vmem:[%s767_s8 + $0x80] sm:$0xff] %vm343_vm0, %v327_v42  ;;  %361 = vst.msk [vmem:[%s767_s8 + $0x88] sm:$0xff] %vm343_vm0, %v328_v43  ;;  %v522_v54 = vunpack.c.l.bf16 %v544_v41  ;;  %v523_v55 = vunpack.c.h.bf16 %v544_v41 }
  0x33   : > { %362 = vst.msk [vmem:[%s767_s8 + $0x90] sm:$0xff] %vm343_vm0, %v329_v44  ;;  %363 = vst.msk [vmem:[%s767_s8 + $0x98] sm:$0xff] %vm343_vm0, %v330_v45  ;;  %v526_v56 = vunpack.c.l.bf16 %v545_v46  ;;  %v527_v57 = vunpack.c.h.bf16 %v545_v46  ;;  %v530_v58 = vunpack.c.l.bf16 %v546_v47  ;;  %v531_v59 = vunpack.c.h.bf16 %v546_v47 }
  0x34   : > { %364 = vst.msk [vmem:[%s767_s8 + $0xa0] sm:$0xff] %vm343_vm0, %v331_v48  ;;  %365 = vst.msk [vmem:[%s767_s8 + $0xa8] sm:$0xff] %vm343_vm0, %v332_v49  ;;  %v264_v60 = vmul.f32 %v518_v52, %v733_v0  ;;  %v265_v61 = vmul.f32 %v519_v53, %v733_v0  ;;  %v266_v62 = vmul.f32 %v522_v54, %v733_v0 }
  0x35   : > { %366 = vst.msk [vmem:[%s767_s8 + $0xb0] sm:$0xff] %vm343_vm0, %v333_v50  ;;  %367 = vst.msk [vmem:[%s767_s8 + $0xb8] sm:$0xff] %vm343_vm0, %v334_v51  ;;  %v267_v63 = vmul.f32 %v523_v55, %v733_v0  ;;  %v268_v1 = vmul.f32 %v526_v56, %v733_v0  ;;  %v269_v2 = vmul.f32 %v527_v57, %v733_v0 }
  0x36   : > { %v270_v3 = vmul.f32 %v530_v58, %v733_v0  ;;  %v271_v4 = vmul.f32 %v531_v59, %v733_v0  ;;  %v303_v5 = vadd.f32 %v743_v9, %v264_v60  ;;  %v304_v6 = vadd.f32 %v743_v9, %v265_v61 }
  0x37   : > { %v305_v7 = vadd.f32 %v743_v9, %v266_v62  ;;  %v306_v8 = vadd.f32 %v743_v9, %v267_v63  ;;  %v307_v10 = vadd.f32 %v743_v9, %v268_v1  ;;  %v308_v11 = vadd.f32 %v743_v9, %v269_v2 }
  0x38   : > { %v309_v0 = vadd.f32 %v743_v9, %v270_v3  ;;  %v310_v12 = vadd.f32 %v743_v9, %v271_v4  ;;  %v335_v13 = vmax.f32 %v303_v5, 0.0  ;;  %v336_v14 = vmax.f32 %v304_v6, 0.0 }
  0x39   : > { %v337_v15 = vmax.f32 %v305_v7, 0.0  ;;  %v338_v16 = vmax.f32 %v306_v8, 0.0  ;;  %v339_v17 = vmax.f32 %v307_v10, 0.0  ;;  %v340_v9 = vmax.f32 %v308_v11, 0.0 }
  0x3a   : > { %v341_v18 = vmax.f32 %v309_v0, 0.0  ;;  %v342_v19 = vmax.f32 %v310_v12, 0.0  ;;  %368 = vst.msk [vmem:[%s767_s8 + $0xc0] sm:$0xff] %vm343_vm0, %v335_v13  ;;  %369 = vst.msk [vmem:[%s767_s8 + $0xc8] sm:$0xff] %vm343_vm0, %v336_v14 }
  0x3b   : > { %370 = vst.msk [vmem:[%s767_s8 + $0xd0] sm:$0xff] %vm343_vm0, %v337_v15  ;;  %371 = vst.msk [vmem:[%s767_s8 + $0xd8] sm:$0xff] %vm343_vm0, %v338_v16 }
  0x3c   : > { %372 = vst.msk [vmem:[%s767_s8 + $0xe0] sm:$0xff] %vm343_vm0, %v339_v17  ;;  %373 = vst.msk [vmem:[%s767_s8 + $0xe8] sm:$0xff] %vm343_vm0, %v340_v9 }
  0x3d   : > { %374 = vst.msk [vmem:[%s767_s8 + $0xf0] sm:$0xff] %vm343_vm0, %v341_v18  ;;  %375 = vst.msk [vmem:[%s767_s8 + $0xf8] sm:$0xff] %vm343_vm0, %v342_v19 }
  0x3e   : > { %601 = shalt.err (!%p598_p3)
}
  0x3f   : > { %s602_s27 = scalar_lea.hbm %s878_s17, 4096  ;;  %s606_s30 = scalar_lea.hbm %s944_s3, 8192 }
  0x40   : > { %p603_p4 = scmp.ne.s32.totalorder %s878_s17, %s602_s27  ;;  %p607_p9 = scmp.lt.u32.totalorder %s878_s17, %s944_s3 }
  0x41   : > { %p608_p10 = scmp.lt.u32.totalorder %s606_s30, %s602_s27  ;;  %p610_p12 = scmp.lt.u32.totalorder %s602_s27, %s878_s17 }
  0x42   : > { %p604_p7 = pnand %p603_p4, %p713_p5 }
  0x43   : > { %p609_p11 = por %p608_p10, %p607_p9 }
  0x44   : > { %p605_p8 = pneg %p604_p7 }
  0x45   : > { %p611_p13 = por %p610_p12, %p609_p11 }
  0x47   : > { %p612_p0 = pnand %p611_p13, %p605_p8 }
  0x49   : > { %615 = shalt.err (!%p612_p0)
}
  0x4a   : > { %s653_s6 = smov 128   ;;  %s654_s7 = smov 8  }
  0x4b   : > { %547 = dma.vmem_to_hbm [thread:$0]  (%p713_p5), %s880_s10, 4096, %s878_s17, %s900_s19, %s653_s6, %s653_s6, %s654_s7  }
  0x4c PF: > { %p553_p1 = scmp.ge.s32.totalorder %s650_s15, 2  ;;  %s405_s8 = sand.u32 1, %s638_s12  }
  0x4d   : > { %s406_s9 = scalar_lea.sflag [#allocation3], %s405_s8 }
  0x4e   : > { %p550_p2 = pnand %p553_p1, %p717_p6 }
  0x50   : > { %633 = dma.done.wait (!%p550_p2), %s406_s9, 4096  }
  0x51   : > { %635 = vsyncadd (!%p550_p2), %s406_s9, 4294963200  ;;  %p13_p3 = scmp.ge.s32.totalorder %s700_s18, 4   ;;  %s947_s12 = smov %s642_s13 }
  0x52   : > { %s948_s13 = smov %s646_s14  ;;  %s949_s14 = smov %s711_s21 }
  0x53   : > { %s950_s15 = smov %s700_s18  ;;  %15 = sbr.rel (!%p13_p3) target bundleno = 3 (0x3), region = 67 }
  0x5a   :  { %411 = vsyncpa [#allocation3], 1 }
  0x5b   :  { %413 = vsyncpa [#allocation3 + $0x1], 1 }

// kernel: bottleneck_block_pallas.6
= control target key start
LH: loop header
LB: loop body
LE: loop exit
PB: predicated region body
PF: predicated region fallthrough
CT: control target
= control target key end

     0   :  { %s1799_s24 = smov 0   ;;  %s2129_s0 = inlined_call_operand.vmem [shape: bf16[2,16,16,8], index: 0, kind: input, shape index: {}]   ;;  %s2130_s1 = inlined_call_operand.vmem [shape: f32[1,8], index: 1, kind: input, shape index: {}]   ;;  %s2131_s2 = inlined_call_operand.vmem [shape: f32[1,8], index: 2, kind: input, shape index: {}]   ;;  %s2132_s3 = inlined_call_operand.vmem [shape: bf16[8,16], index: 3, kind: input, shape index: {}]   ;;  %s2133_s4 = inlined_call_operand.vmem [shape: f32[2,16,16,4], index: 4, kind: input, shape index: {}]   ;;  %s2134_s5 = inlined_call_operand.vmem [shape: bf16[4,16], index: 5, kind: input, shape index: {}]   ;;  %s2135_s6 = inlined_call_operand.vmem [shape: bf16[2,16,16,16], index: 6, kind: output, shape index: {0}]   ;;  %s2136_s7 = inlined_call_operand.vmem [shape: f32[2,8,16], index: 7, kind: output, shape index: {1}]  }
   0x1 LB: > { %s1413_s25 = sadd.s32 4294967295, %s1757_s24   ;;  %p1417_p0 = scmp.ge.s32.totalorder %s1757_s24, 1  ;;  %s1757_s24 = sphi %s1799_s24, %s18_s24  }
   0x2   : > { %p250_p1 = scmp.lt.s32.totalorder %s1757_s24, 3 }
   0x4   : > { %p251_p2 = pnand %p1417_p0, %p250_p1 }
   0x5   : > { %v550_v0 = vld [vmem:[%s2134_s5] sm:$0x3] (!%p251_p2)  ;;  %vm600_vm0 = vcmask (!%p251_p2), 1041408   ;;  %p291_p3 = scmp.lt.s32.totalorder (!%p251_p2), %s1413_s25, 1  ;;  %vm814_vm1 = vcmask (!%p251_p2), 1043456   ;;  %vm551_vm2 = vcmask (!%p251_p2), 31744  }
   0x6   : > { %254 = sbr.rel (%p251_p2) target bundleno = 326 (0x146), region = 44  ;;  %1741 = vmatprep.subr.msk.bf16.mxu1 (!%p251_p2), %vm600_vm0, %v550_v0  ;;  %v602_v1 = vsel (!%p251_p2), %vm600_vm0, %v550_v0, 0  ;;  %v501_v2 = vld [vmem:[%s2132_s3] sm:$0xf] (!%p251_p2)  ;;  %vm765_vm3 = vcmask (!%p251_p2), 64512   ;;  %vm1282_vm4 = vcmask (!%p251_p2), 125952  }
   0x7   : > { %1642 = vmatpush3.bf16.msra.mxu1 (!%p251_p2), %v602_v1  ;;  %1742 = vmatprep.subr.msk.bf16.mxu0 (!%p251_p2), %vm814_vm1, %v501_v2  ;;  %v816_v3 = vsel (!%p251_p2), %vm814_vm1, %v501_v2, 0  ;;  %v1834_v4 = vld [vmem:[%s2130_s1] ss:$0 sm:$0xff] (!%p251_p2)  ;;  %vm979_vm5 = vcmask (!%p251_p2), 130048   ;;  %vm1150_vm6 = vcmask (!%p251_p2), 1040384  }
   0x8   : > { %1676 = vmatpush3.bf16.msra.mxu0 (!%p251_p2), %v816_v3  ;;  %v1844_v11 = vld [vmem:[%s2131_s2] ss:$0 sm:$0xff] (!%p251_p2) }
   0xd   : > { %s2138_s25 = smov (!%p291_p3, %s1413_s25), 1 }
   0xe   : > { %s1494_s30 = sshll.u32 %s2138_s25, 8  ;;  %s1493_s8 = sshll.u32 %s2138_s25, 7 }
   0xf   : > { %s1822_s11 = scalar_lea.vmem %s2133_s4, %s1494_s30  ;;  %s1829_s14 = scalar_lea.vmem %s2129_s0, %s1493_s8 }
  0x10   : > { %v502_v5 = vld [vmem:[%s1822_s11] sm:$0xff]  ;;  %v503_v6 = vld [vmem:[%s1822_s11 + $0x8] sm:$0xff]  ;;  %v504_v7 = vld [vmem:[%s1822_s11 + $0x10] sm:$0xff]  ;;  %s1990_s21 = scalar_lea.vmem %s2135_s6, %s1493_s8  ;;  %s1424_s22 = sshll.u32 %s2138_s25, 3 }
  0x11   : > { %v534_v8 = vpack.c.bf16 %v503_v6, %v502_v5  ;;  %v505_v9 = vld [vmem:[%s1822_s11 + $0x18] sm:$0xff]  ;;  %v1529_v10 = vld [vmem:[%s1829_s14] sm:$0xff]   ;;  %v1592_v12 = vld [vmem:[%s1829_s14 + $0x8] sm:$0xff]   ;;  %s309_s27 = scalar_lea.vmem %s2136_s7, %s1424_s22 }
  0x12   : > { %v535_v13 = vpack.c.bf16 %v505_v9, %v504_v7  ;;  %v1530_v14 = vunpack.c.l.bf16 %v1529_v10  ;;  %v1531_v15 = vunpack.c.h.bf16 %v1529_v10  ;;  %v1534_v16 = vunpack.c.l.bf16 %v1592_v12  ;;  %v506_v17 = vld [vmem:[%s1822_s11 + $0x20] sm:$0xff]  ;;  %v507_v18 = vld [vmem:[%s1822_s11 + $0x28] sm:$0xff]  ;;  %v508_v19 = vld [vmem:[%s1822_s11 + $0x30] sm:$0xff] }
  0x13   : > { %1643 = vmatprep.mubr.msk.bf16.mxu1 %vm551_vm2, %v534_v8  ;;  %v1535_v20 = vunpack.c.h.bf16 %v1592_v12  ;;  %v536_v21 = vpack.c.bf16 %v507_v18, %v506_v17  ;;  %v509_v22 = vld [vmem:[%s1822_s11 + $0x38] sm:$0xff]  ;;  %v1593_v23 = vld [vmem:[%s1829_s14 + $0x10] sm:$0xff]   ;;  %v510_v41 = vld [vmem:[%s1822_s11 + $0x40] sm:$0xff] }
  0x14   : > { %v1594_v24 = vld [vmem:[%s1829_s14 + $0x18] sm:$0xff]   ;;  %1644 = vmatmul.mubr.msk.bf16.vlgmr.msra.gmra.mrb[0].mxu1 %vm551_vm2, %v535_v13  ;;  %v382_v25 = vmul.f32 %v1530_v14, %v1834_v4  ;;  %v383_v26 = vmul.f32 %v1531_v15, %v1834_v4  ;;  %v384_v27 = vmul.f32 %v1534_v16, %v1834_v4  ;;  %v537_v28 = vpack.c.bf16 %v509_v22, %v508_v19  ;;  %v511_v42 = vld [vmem:[%s1822_s11 + $0x48] sm:$0xff]  ;;  %v1595_v51 = vld [vmem:[%s1829_s14 + $0x20] sm:$0xff]  }
  0x15   : > { %v385_v29 = vmul.f32 %v1535_v20, %v1834_v4  ;;  %1647 = vmatprep.mubr.msk.bf16.mxu1 %vm551_vm2, %v536_v21  ;;  %v1538_v30 = vunpack.c.l.bf16 %v1593_v23  ;;  %v1539_v31 = vunpack.c.h.bf16 %v1593_v23  ;;  %v1542_v32 = vunpack.c.l.bf16 %v1594_v24  ;;  %v1596_v52 = vld [vmem:[%s1829_s14 + $0x28] sm:$0xff]   ;;  %v512_v56 = vld [vmem:[%s1822_s11 + $0x50] sm:$0xff]  ;;  %v513_v57 = vld [vmem:[%s1822_s11 + $0x58] sm:$0xff] }
  0x16   : > { %v421_v33 = vadd.f32 %v1844_v11, %v382_v25  ;;  %v422_v34 = vadd.f32 %v1844_v11, %v383_v26  ;;  %v423_v35 = vadd.f32 %v1844_v11, %v384_v27  ;;  %v1543_v36 = vunpack.c.h.bf16 %v1594_v24  ;;  %v514_v62 = vld [vmem:[%s1822_s11 + $0x60] sm:$0xff]  ;;  %v515_v63 = vld [vmem:[%s1822_s11 + $0x68] sm:$0xff]  ;;  %v1597_v5 = vld [vmem:[%s1829_s14 + $0x30] sm:$0xff]  }
  0x17   : > { %v424_v37 = vadd.f32 %v1844_v11, %v385_v29  ;;  %v386_v38 = vmul.f32 %v1538_v30, %v1834_v4  ;;  %v387_v39 = vmul.f32 %v1539_v31, %v1834_v4  ;;  %v388_v40 = vmul.f32 %v1542_v32, %v1834_v4  ;;  %v1598_v6 = vld [vmem:[%s1829_s14 + $0x38] sm:$0xff]  }
  0x18   : > { %v453_v43 = vmax.f32 %v421_v33, 0.0  ;;  %v454_v44 = vmax.f32 %v422_v34, 0.0  ;;  %v455_v45 = vmax.f32 %v423_v35, 0.0  ;;  %v389_v46 = vmul.f32 %v1543_v36, %v1834_v4  ;;  %v1599_v33 = vld [vmem:[%s1829_s14 + $0x40] sm:$0xff]   ;;  %v516_v35 = vld [vmem:[%s1822_s11 + $0x70] sm:$0xff]  ;;  %v517_v36 = vld [vmem:[%s1822_s11 + $0x78] sm:$0xff] }
  0x19   : > { %v456_v47 = vmax.f32 %v424_v37, 0.0  ;;  %v425_v48 = vadd.f32 %v1844_v11, %v386_v38  ;;  %v426_v49 = vadd.f32 %v1844_v11, %v387_v39  ;;  %v427_v50 = vadd.f32 %v1844_v11, %v388_v40  ;;  %v518_v39 = vld [vmem:[%s1822_s11 + $0x80] sm:$0xff]  ;;  %v519_v40 = vld [vmem:[%s1822_s11 + $0x88] sm:$0xff] }
  0x1a   : > { %v485_v53 = vpack.c.bf16 %v454_v44, %v453_v43  ;;  %v428_v54 = vadd.f32 %v1844_v11, %v389_v46  ;;  %v538_v55 = vpack.c.bf16 %v511_v42, %v510_v41  ;;  %v1546_v1 = vunpack.c.l.bf16 %v1595_v51  ;;  %v1600_v41 = vld [vmem:[%s1829_s14 + $0x48] sm:$0xff]   ;;  %v1601_v46 = vld [vmem:[%s1829_s14 + $0x50] sm:$0xff]  }
  0x1b   : > { %v486_v58 = vpack.c.bf16 %v456_v47, %v455_v45  ;;  %v457_v59 = vmax.f32 %v425_v48, 0.0  ;;  %v458_v60 = vmax.f32 %v426_v49, 0.0  ;;  %v459_v61 = vmax.f32 %v427_v50, 0.0 }
  0x1c   : > { %1677 = vmatprep.mubr.msk.bf16.mxu0 %vm765_vm3, %v485_v53  ;;  %1648 = vmatmul.mubr.msk.bf16.gmra.mrb[4].mxu1 %vm551_vm2, %v537_v28  ;;  %v460_v0 = vmax.f32 %v428_v54, 0.0  ;;  %v1547_v2 = vunpack.c.h.bf16 %v1595_v51  ;;  %v1550_v3 = vunpack.c.l.bf16 %v1596_v52  ;;  %v539_v8 = vpack.c.bf16 %v513_v57, %v512_v56 }
  0x1d   : > { %1678 = vmatmul.mubr.msk.bf16.vlgmr.msra.gmra.mrb[0].mxu0 %vm765_vm3, %v486_v58  ;;  %v487_v7 = vpack.c.bf16 %v458_v60, %v457_v59  ;;  %1651 = vmatprep.mubr.msk.bf16.mxu1 %vm551_vm2, %v538_v55  ;;  %v1551_v9 = vunpack.c.h.bf16 %v1596_v52  ;;  %v390_v10 = vmul.f32 %v1546_v1, %v1834_v4  ;;  %v540_v14 = vpack.c.bf16 %v515_v63, %v514_v62  ;;  %v520_v63 = vld [vmem:[%s1822_s11 + $0x90] sm:$0xff] }
  0x1e   : > { %v391_v12 = vmul.f32 %v1547_v2, %v1834_v4  ;;  %v392_v13 = vmul.f32 %v1550_v3, %v1834_v4  ;;  %v1554_v16 = vunpack.c.l.bf16 %v1597_v5  ;;  %v1555_v17 = vunpack.c.h.bf16 %v1597_v5  ;;  %v522_v3 = vld [vmem:[%s1822_s11 + $0xa0] sm:$0xff]  ;;  %v523_v5 = vld [vmem:[%s1822_s11 + $0xa8] sm:$0xff] }
  0x1f   : > { %1681 = vmatprep.mubr.msk.bf16.mxu0 %vm765_vm3, %v487_v7  ;;  %v393_v15 = vmul.f32 %v1551_v9, %v1834_v4  ;;  %v1558_v18 = vunpack.c.l.bf16 %v1598_v6  ;;  %v488_v19 = vpack.c.bf16 %v460_v0, %v459_v61  ;;  %v429_v20 = vadd.f32 %v1844_v11, %v390_v10  ;;  %v521_v0 = vld [vmem:[%s1822_s11 + $0x98] sm:$0xff] }
  0x20   : > { %v430_v21 = vadd.f32 %v1844_v11, %v391_v12  ;;  %v1559_v22 = vunpack.c.h.bf16 %v1598_v6  ;;  %v431_v23 = vadd.f32 %v1844_v11, %v392_v13  ;;  %v394_v25 = vmul.f32 %v1554_v16, %v1834_v4  ;;  %v1603_v13 = vld [vmem:[%s1829_s14 + $0x60] sm:$0xff]  }
  0x21   : > { %v432_v24 = vadd.f32 %v1844_v11, %v393_v15  ;;  %v395_v26 = vmul.f32 %v1555_v17, %v1834_v4  ;;  %v461_v27 = vmax.f32 %v429_v20, 0.0  ;;  %v396_v31 = vmul.f32 %v1558_v18, %v1834_v4 }
  0x22   : > { %v462_v28 = vmax.f32 %v430_v21, 0.0  ;;  %v433_v29 = vadd.f32 %v1844_v11, %v394_v25  ;;  %v397_v32 = vmul.f32 %v1559_v22, %v1834_v4  ;;  %v463_v37 = vmax.f32 %v431_v23, 0.0  ;;  %v524_v25 = vld [vmem:[%s1822_s11 + $0xb0] sm:$0xff] }
  0x23   : > { %v434_v30 = vadd.f32 %v1844_v11, %v395_v26  ;;  %v464_v38 = vmax.f32 %v432_v24, 0.0  ;;  %v1562_v44 = vunpack.c.l.bf16 %v1599_v33  ;;  %v1563_v45 = vunpack.c.h.bf16 %v1599_v33  ;;  %v525_v26 = vld [vmem:[%s1822_s11 + $0xb8] sm:$0xff]  ;;  %v526_v33 = vld [vmem:[%s1822_s11 + $0xc0] sm:$0xff] }
  0x24   : > { %1652 = vmatmul.mubr.msk.bf16.gmra.mrb[8].mxu1 %vm551_vm2, %v539_v8  ;;  %v489_v34 = vpack.c.bf16 %v462_v28, %v461_v27  ;;  %v465_v42 = vmax.f32 %v433_v29, 0.0  ;;  %v541_v47 = vpack.c.bf16 %v517_v36, %v516_v35  ;;  %v435_v48 = vadd.f32 %v1844_v11, %v396_v31  ;;  %v1602_v8 = vld [vmem:[%s1829_s14 + $0x58] sm:$0xff]  }
  0x25   : > { %1682 = vmatmul.mubr.msk.bf16.gmra.mrb[4].mxu0 %vm765_vm3, %v488_v19  ;;  %1655 = vmatprep.mubr.msk.bf16.mxu1 %vm551_vm2, %v540_v14  ;;  %v466_v43 = vmax.f32 %v434_v30, 0.0  ;;  %v436_v49 = vadd.f32 %v1844_v11, %v397_v32  ;;  %v542_v50 = vpack.c.bf16 %v519_v40, %v518_v39  ;;  %v398_v51 = vmul.f32 %v1562_v44, %v1834_v4 }
  0x26   : > { %1685 = vmatprep.mubr.msk.bf16.mxu0 %vm765_vm3, %v489_v34  ;;  %v399_v52 = vmul.f32 %v1563_v45, %v1834_v4  ;;  %v1566_v53 = vunpack.c.l.bf16 %v1600_v41  ;;  %v490_v54 = vpack.c.bf16 %v464_v38, %v463_v37  ;;  %v1567_v55 = vunpack.c.h.bf16 %v1600_v41  ;;  %v527_v34 = vld [vmem:[%s1822_s11 + $0xc8] sm:$0xff]  ;;  %v1605_v38 = vld [vmem:[%s1829_s14 + $0x70] sm:$0xff]  }
  0x27   : > { %v1570_v56 = vunpack.c.l.bf16 %v1601_v46  ;;  %v1571_v57 = vunpack.c.h.bf16 %v1601_v46  ;;  %v491_v58 = vpack.c.bf16 %v466_v43, %v465_v42  ;;  %v437_v59 = vadd.f32 %v1844_v11, %v398_v51  ;;  %v1604_v37 = vld [vmem:[%s1829_s14 + $0x68] sm:$0xff]  }
  0x28   : > { %v438_v60 = vadd.f32 %v1844_v11, %v399_v52  ;;  %v467_v61 = vmax.f32 %v435_v48, 0.0  ;;  %v468_v62 = vmax.f32 %v436_v49, 0.0  ;;  %v400_v1 = vmul.f32 %v1566_v53, %v1834_v4  ;;  %v528_v53 = vld [vmem:[%s1822_s11 + $0xd0] sm:$0xff] }
  0x29   : > { %v401_v2 = vmul.f32 %v1567_v55, %v1834_v4  ;;  %v402_v6 = vmul.f32 %v1570_v56, %v1834_v4  ;;  %v403_v7 = vmul.f32 %v1571_v57, %v1834_v4  ;;  %v469_v9 = vmax.f32 %v437_v59, 0.0  ;;  %v530_v57 = vld [vmem:[%s1822_s11 + $0xe0] sm:$0xff] }
  0x2a   : > { %v470_v10 = vmax.f32 %v438_v60, 0.0  ;;  %v543_v12 = vpack.c.bf16 %v521_v0, %v520_v63  ;;  %v492_v14 = vpack.c.bf16 %v468_v62, %v467_v61  ;;  %v544_v15 = vpack.c.bf16 %v523_v5, %v522_v3  ;;  %v1606_v63 = vld [vmem:[%s1829_s14 + $0x78] sm:$0xff]  }
  0x2b   : > { %v1574_v16 = vunpack.c.l.bf16 %v1602_v8  ;;  %v1575_v17 = vunpack.c.h.bf16 %v1602_v8  ;;  %v439_v18 = vadd.f32 %v1844_v11, %v400_v1  ;;  %v440_v19 = vadd.f32 %v1844_v11, %v401_v2 }
  0x2c   : > { %1656 = vmatmul.mubr.msk.bf16.gmra.mrb[12].mxu1 %vm551_vm2, %v541_v47  ;;  %v441_v20 = vadd.f32 %v1844_v11, %v402_v6  ;;  %v442_v21 = vadd.f32 %v1844_v11, %v403_v7  ;;  %v493_v22 = vpack.c.bf16 %v470_v10, %v469_v9  ;;  %v1578_v23 = vunpack.c.l.bf16 %v1603_v13 }
  0x2d   : > { %1686 = vmatmul.mubr.msk.bf16.gmra.mrb[8].mxu0 %vm765_vm3, %v490_v54  ;;  %1659 = vmatprep.mubr.msk.bf16.mxu1 %vm551_vm2, %v542_v50  ;;  %v1579_v24 = vunpack.c.h.bf16 %v1603_v13  ;;  %v404_v27 = vmul.f32 %v1574_v16, %v1834_v4  ;;  %v405_v28 = vmul.f32 %v1575_v17, %v1834_v4  ;;  %v471_v29 = vmax.f32 %v439_v18, 0.0  ;;  %v529_v54 = vld [vmem:[%s1822_s11 + $0xd8] sm:$0xff] }
  0x2e   : > { %1689 = vmatprep.mubr.msk.bf16.mxu0 %vm765_vm3, %v491_v58  ;;  %v472_v30 = vmax.f32 %v440_v19, 0.0  ;;  %v473_v31 = vmax.f32 %v441_v20, 0.0  ;;  %v474_v32 = vmax.f32 %v442_v21, 0.0  ;;  %v406_v35 = vmul.f32 %v1578_v23, %v1834_v4  ;;  %v531_v58 = vld [vmem:[%s1822_s11 + $0xe8] sm:$0xff] }
  0x2f   : > { %v407_v36 = vmul.f32 %v1579_v24, %v1834_v4  ;;  %v545_v39 = vpack.c.bf16 %v525_v26, %v524_v25  ;;  %v443_v40 = vadd.f32 %v1844_v11, %v404_v27  ;;  %v444_v41 = vadd.f32 %v1844_v11, %v405_v28 }
  0x30   : > { %v546_v42 = vpack.c.bf16 %v527_v34, %v526_v33  ;;  %v494_v43 = vpack.c.bf16 %v472_v30, %v471_v29  ;;  %v495_v44 = vpack.c.bf16 %v474_v32, %v473_v31  ;;  %v1582_v45 = vunpack.c.l.bf16 %v1604_v37 }
  0x31   : > { %v1583_v46 = vunpack.c.h.bf16 %v1604_v37  ;;  %v445_v47 = vadd.f32 %v1844_v11, %v406_v35  ;;  %v446_v48 = vadd.f32 %v1844_v11, %v407_v36  ;;  %v1586_v49 = vunpack.c.l.bf16 %v1605_v38 }
  0x32   : > { %v1587_v50 = vunpack.c.h.bf16 %v1605_v38  ;;  %v475_v51 = vmax.f32 %v443_v40, 0.0  ;;  %v476_v52 = vmax.f32 %v444_v41, 0.0  ;;  %v408_v55 = vmul.f32 %v1582_v45, %v1834_v4 }
  0x33   : > { %v409_v56 = vmul.f32 %v1583_v46, %v1834_v4  ;;  %v477_v59 = vmax.f32 %v445_v47, 0.0  ;;  %v478_v60 = vmax.f32 %v446_v48, 0.0  ;;  %v410_v61 = vmul.f32 %v1586_v49, %v1834_v4 }
  0x34   : > { %1660 = vmatmul.mubr.msk.bf16.gmra.mrb[16].mxu1 %vm551_vm2, %v543_v12  ;;  %v411_v62 = vmul.f32 %v1587_v50, %v1834_v4  ;;  %v496_v0 = vpack.c.bf16 %v476_v52, %v475_v51  ;;  %v547_v1 = vpack.c.bf16 %v529_v54, %v528_v53  ;;  %v548_v2 = vpack.c.bf16 %v531_v58, %v530_v57 }
  0x35   : > { %1690 = vmatmul.mubr.msk.bf16.gmra.mrb[12].mxu0 %vm765_vm3, %v492_v14  ;;  %1663 = vmatprep.mubr.msk.bf16.mxu1 %vm551_vm2, %v544_v15  ;;  %v447_v3 = vadd.f32 %v1844_v11, %v408_v55  ;;  %v448_v5 = vadd.f32 %v1844_v11, %v409_v56  ;;  %v1590_v6 = vunpack.c.l.bf16 %v1606_v63  ;;  %v1591_v7 = vunpack.c.h.bf16 %v1606_v63  ;;  %v532_v14 = vld [vmem:[%s1822_s11 + $0xf0] sm:$0xff]  ;;  %v533_v15 = vld [vmem:[%s1822_s11 + $0xf8] sm:$0xff] }
  0x36   : > { %1693 = vmatprep.mubr.msk.bf16.mxu0 %vm765_vm3, %v493_v22  ;;  %v497_v8 = vpack.c.bf16 %v478_v60, %v477_v59  ;;  %v449_v9 = vadd.f32 %v1844_v11, %v410_v61  ;;  %v450_v10 = vadd.f32 %v1844_v11, %v411_v62  ;;  %v549_v20 = vpack.c.bf16 %v533_v15, %v532_v14 }
  0x37   : > { %v479_v12 = vmax.f32 %v447_v3, 0.0  ;;  %v480_v13 = vmax.f32 %v448_v5, 0.0  ;;  %v412_v16 = vmul.f32 %v1590_v6, %v1834_v4  ;;  %v413_v17 = vmul.f32 %v1591_v7, %v1834_v4 }
  0x38   : > { %v481_v18 = vmax.f32 %v449_v9, 0.0  ;;  %v482_v19 = vmax.f32 %v450_v10, 0.0 }
  0x39   : > { %v498_v21 = vpack.c.bf16 %v480_v13, %v479_v12  ;;  %v451_v22 = vadd.f32 %v1844_v11, %v412_v16  ;;  %v452_v23 = vadd.f32 %v1844_v11, %v413_v17 }
  0x3a   : > { %v499_v24 = vpack.c.bf16 %v482_v19, %v481_v18 }
  0x3b   : > { %v483_v25 = vmax.f32 %v451_v22, 0.0  ;;  %v484_v26 = vmax.f32 %v452_v23, 0.0 }
  0x3c   : > { %1664 = vmatmul.mubr.msk.bf16.gmra.mrb[20].mxu1 %vm551_vm2, %v545_v39 }
  0x3d   : > { %1694 = vmatmul.mubr.msk.bf16.gmra.mrb[16].mxu0 %vm765_vm3, %v494_v43  ;;  %1667 = vmatprep.mubr.msk.bf16.mxu1 %vm551_vm2, %v546_v42  ;;  %v500_v4 = vpack.c.bf16 %v484_v26, %v483_v25 }
  0x3e   : > { %1697 = vmatprep.mubr.msk.bf16.mxu0 %vm765_vm3, %v495_v44 }
  0x44   : > { %1668 = vmatmul.mubr.msk.bf16.gmra.mrb[24].mxu1 %vm551_vm2, %v547_v1 }
  0x45   : > { %1698 = vmatmul.mubr.msk.bf16.gmra.mrb[20].mxu0 %vm765_vm3, %v496_v0  ;;  %1671 = vmatprep.mubr.msk.bf16.mxu1 %vm551_vm2, %v548_v2 }
  0x46   : > { %1701 = vmatprep.mubr.msk.bf16.mxu0 %vm765_vm3, %v497_v8 }
  0x4c   : > { %1672 = vmatmul.mubr.msk.bf16.gmra.mrb[28].mxu1 %vm551_vm2, %v549_v20 }
  0x4d   : > { %1702 = vmatmul.mubr.msk.bf16.gmra.mrb[24].mxu0 %vm765_vm3, %v498_v21 }
  0x4e   : > { %1705 = vmatprep.mubr.msk.bf16.mxu0 %vm765_vm3, %v499_v24 }
  0x55   : > { %1706 = vmatmul.mubr.msk.bf16.gmra.mrb[28].mxu0 %vm765_vm3, %v500_v4 }
  0xe7   : > { %v1645_v27 = vpop.f32.mrb[0].mxu1 }
  0xe8   : > { %v638_v28 = vpop.f32.mrb[1].mxu1 }
  0xe9   : > { %v1646_v29 = vpop.f32.mrb[2].mxu1 }
  0xea   : > { %v641_v30 = vpop.f32.mrb[3].mxu1 }
  0xef   : > { %v1649_v31 = vpop.f32.mrb[4].mxu1 }
  0xf0   : > { %v1679_v32 = vpop.f32.mrb[0].mxu0  ;;  %v654_v11 = vpop.f32.mrb[5].mxu1 }
  0xf1   : > { %v861_v33 = vadd.f32 %v1679_v32, %v1645_v27  ;;  %v852_v34 = vpop.f32.mrb[1].mxu0  ;;  %v1650_v35 = vpop.f32.mrb[6].mxu1 }
  0xf2   : > { %v853_v36 = vadd.f32 %v852_v34, %v638_v28  ;;  %v1680_v37 = vpop.f32.mrb[2].mxu0  ;;  %v657_v38 = vpop.f32.mrb[7].mxu1 }
  0xf3   : > { %v1498_v39 = vpack.c.bf16 %v861_v33, %v861_v33  ;;  %v864_v40 = vadd.f32 %v1680_v37, %v1646_v29  ;;  %v855_v41 = vpop.f32.mrb[3].mxu0  ;;  %v1051_v45 = vmul.f32 %v861_v33, %v861_v33  ;;  %v983_v54 = vsel %vm979_vm5, %v861_v33, 0.0 }
  0xf4   : > { %v1049_v42 = vmul.f32 %v853_v36, %v853_v36  ;;  %v1496_v43 = vpack.c.bf16 %v853_v36, %v853_v36  ;;  %v856_v44 = vadd.f32 %v855_v41, %v641_v30  ;;  %v980_v47 = vsel %vm979_vm5, %v853_v36, 0.0 }
  0xf5   : > { %1285 = vst.msk [vmem:[%s1990_s21 + $0x8] sm:$0xf] %vm1282_vm4, %v1498_v39  ;;  %v1499_v46 = vpack.c.bf16 %v864_v40, %v864_v40  ;;  %v1052_v51 = vmul.f32 %v864_v40, %v864_v40  ;;  %v1084_v0 = vsel %vm979_vm5, %v1051_v45, 0.0  ;;  %v985_v5 = vsel %vm979_vm5, %v864_v40, 0.0 }
  0xf6   : > { %1283 = vst.msk [vmem:[%s1990_s21] sm:$0xf] %vm1282_vm4, %v1496_v43  ;;  %v981_v48 = vsel %vm979_vm5, %v856_v44, 0.0  ;;  %v1050_v49 = vmul.f32 %v856_v44, %v856_v44  ;;  %v1497_v50 = vpack.c.bf16 %v856_v44, %v856_v44  ;;  %v1081_v55 = vsel %vm979_vm5, %v1049_v42, 0.0 }
  0xf7   : > { %1286 = vst.msk [vmem:[%s1990_s21 + $0xc] sm:$0xf] %vm1282_vm4, %v1499_v46  ;;  %v982_v52 = vadd.f32 %v981_v48, %v980_v47  ;;  %v1653_v53 = vpop.f32.mrb[8].mxu1  ;;  %v1086_v6 = vsel %vm979_vm5, %v1052_v51, 0.0 }
  0xf8   : > { %v1082_v56 = vsel %vm979_vm5, %v1050_v49, 0.0  ;;  %1284 = vst.msk [vmem:[%s1990_s21 + $0x4] sm:$0xf] %vm1282_vm4, %v1497_v50  ;;  %v1683_v57 = vpop.f32.mrb[4].mxu0  ;;  %v670_v58 = vpop.f32.mrb[9].mxu1 }
  0xf9   : > { %v984_v59 = vadd.f32 %v983_v54, %v982_v52  ;;  %v1083_v60 = vadd.f32 %v1082_v56, %v1081_v55  ;;  %v877_v61 = vadd.f32 %v1683_v57, %v1649_v31  ;;  %v868_v62 = vpop.f32.mrb[5].mxu0  ;;  %v1654_v63 = vpop.f32.mrb[10].mxu1 }
  0xfa   : > { %v869_v1 = vadd.f32 %v868_v62, %v654_v11  ;;  %v1684_v2 = vpop.f32.mrb[6].mxu0  ;;  %v673_v3 = vpop.f32.mrb[11].mxu1 }
  0xfb   : > { %v1085_v7 = vadd.f32 %v1084_v0, %v1083_v60  ;;  %v1502_v8 = vpack.c.bf16 %v877_v61, %v877_v61  ;;  %v871_v9 = vpop.f32.mrb[7].mxu0  ;;  %v986_v10 = vadd.f32 %v985_v5, %v984_v59  ;;  %v880_v16 = vadd.f32 %v1684_v2, %v1650_v35 }
  0xfc   : > { %v987_v12 = vsel %vm979_vm5, %v869_v1, 0.0  ;;  %v1053_v13 = vmul.f32 %v869_v1, %v869_v1  ;;  %v1500_v14 = vpack.c.bf16 %v869_v1, %v869_v1  ;;  %v872_v17 = vadd.f32 %v871_v9, %v657_v38 }
  0xfd   : > { %1289 = vst.msk [vmem:[%s1990_s21 + $0x18] sm:$0xf] %vm1282_vm4, %v1502_v8  ;;  %v1087_v15 = vadd.f32 %v1086_v6, %v1085_v7  ;;  %v988_v18 = vadd.f32 %v987_v12, %v986_v10  ;;  %v1055_v20 = vmul.f32 %v877_v61, %v877_v61  ;;  %v1503_v22 = vpack.c.bf16 %v880_v16, %v880_v16 }
  0xfe   : > { %v1088_v19 = vsel %vm979_vm5, %v1053_v13, 0.0  ;;  %1287 = vst.msk [vmem:[%s1990_s21 + $0x10] sm:$0xf] %vm1282_vm4, %v1500_v14  ;;  %v989_v24 = vsel %vm979_vm5, %v872_v17, 0.0  ;;  %v1054_v25 = vmul.f32 %v872_v17, %v872_v17  ;;  %v1501_v26 = vpack.c.bf16 %v872_v17, %v872_v17 }
  0xff   : > { %v1089_v21 = vadd.f32 %v1088_v19, %v1087_v15  ;;  %v1657_v23 = vpop.f32.mrb[12].mxu1  ;;  %1290 = vst.msk [vmem:[%s1990_s21 + $0x1c] sm:$0xf] %vm1282_vm4, %v1503_v22  ;;  %v990_v28 = vadd.f32 %v989_v24, %v988_v18  ;;  %v991_v32 = vsel %vm979_vm5, %v877_v61, 0.0  ;;  %v1056_v11 = vmul.f32 %v880_v16, %v880_v16 }
 0x100   : > { %v1687_v4 = vpop.f32.mrb[8].mxu0  ;;  %v686_v27 = vpop.f32.mrb[13].mxu1  ;;  %v1090_v33 = vsel %vm979_vm5, %v1054_v25, 0.0  ;;  %1288 = vst.msk [vmem:[%s1990_s21 + $0x14] sm:$0xf] %vm1282_vm4, %v1501_v26  ;;  %v1092_v37 = vsel %vm979_vm5, %v1055_v20, 0.0 }
 0x101   : > { %v893_v29 = vadd.f32 %v1687_v4, %v1653_v53  ;;  %v884_v30 = vpop.f32.mrb[9].mxu0  ;;  %v1658_v31 = vpop.f32.mrb[14].mxu1  ;;  %v993_v38 = vsel %vm979_vm5, %v880_v16, 0.0  ;;  %v992_v39 = vadd.f32 %v991_v32, %v990_v28  ;;  %v1091_v40 = vadd.f32 %v1090_v33, %v1089_v21 }
 0x102   : > { %v885_v34 = vadd.f32 %v884_v30, %v670_v58  ;;  %v1688_v35 = vpop.f32.mrb[10].mxu0  ;;  %v689_v36 = vpop.f32.mrb[15].mxu1  ;;  %v1094_v49 = vsel %vm979_vm5, %v1056_v11, 0.0 }
 0x103   : > { %v887_v41 = vpop.f32.mrb[11].mxu0  ;;  %v1506_v42 = vpack.c.bf16 %v893_v29, %v893_v29  ;;  %v1093_v46 = vadd.f32 %v1092_v37, %v1091_v40  ;;  %v994_v47 = vadd.f32 %v993_v38, %v992_v39  ;;  %v896_v48 = vadd.f32 %v1688_v35, %v1654_v63 }
 0x104   : > { %v995_v43 = vsel %vm979_vm5, %v885_v34, 0.0  ;;  %v1057_v44 = vmul.f32 %v885_v34, %v885_v34  ;;  %v1504_v45 = vpack.c.bf16 %v885_v34, %v885_v34  ;;  %v888_v51 = vadd.f32 %v887_v41, %v673_v3 }
 0x105   : > { %1293 = vst.msk [vmem:[%s1990_s21 + $0x28] sm:$0xf] %vm1282_vm4, %v1506_v42  ;;  %v1059_v52 = vmul.f32 %v893_v29, %v893_v29  ;;  %v996_v53 = vadd.f32 %v995_v43, %v994_v47  ;;  %v1095_v54 = vadd.f32 %v1094_v49, %v1093_v46  ;;  %v1507_v56 = vpack.c.bf16 %v896_v48, %v896_v48 }
 0x106   : > { %v1096_v50 = vsel %vm979_vm5, %v1057_v44, 0.0  ;;  %1291 = vst.msk [vmem:[%s1990_s21 + $0x20] sm:$0xf] %vm1282_vm4, %v1504_v45  ;;  %v997_v57 = vsel %vm979_vm5, %v888_v51, 0.0  ;;  %v1058_v58 = vmul.f32 %v888_v51, %v888_v51  ;;  %v1505_v59 = vpack.c.bf16 %v888_v51, %v888_v51 }
 0x107   : > { %v1661_v55 = vpop.f32.mrb[16].mxu1  ;;  %v1097_v62 = vadd.f32 %v1096_v50, %v1095_v54  ;;  %v998_v63 = vadd.f32 %v997_v57, %v996_v53  ;;  %v999_v3 = vsel %vm979_vm5, %v893_v29, 0.0  ;;  %v1060_v5 = vmul.f32 %v896_v48, %v896_v48  ;;  %1294 = vst.msk [vmem:[%s1990_s21 + $0x2c] sm:$0xf] %vm1282_vm4, %v1507_v56 }
 0x108   : > { %v1691_v60 = vpop.f32.mrb[12].mxu0  ;;  %v702_v61 = vpop.f32.mrb[17].mxu1  ;;  %v1098_v6 = vsel %vm979_vm5, %v1058_v58, 0.0  ;;  %1292 = vst.msk [vmem:[%s1990_s21 + $0x24] sm:$0xf] %vm1282_vm4, %v1505_v59  ;;  %v1100_v10 = vsel %vm979_vm5, %v1059_v52, 0.0 }
 0x109   : > { %v909_v0 = vadd.f32 %v1691_v60, %v1657_v23  ;;  %v900_v1 = vpop.f32.mrb[13].mxu0  ;;  %v1662_v2 = vpop.f32.mrb[18].mxu1  ;;  %v1001_v12 = vsel %vm979_vm5, %v896_v48, 0.0  ;;  %v1000_v13 = vadd.f32 %v999_v3, %v998_v63  ;;  %v1099_v14 = vadd.f32 %v1098_v6, %v1097_v62 }
 0x10a   : > { %v901_v7 = vadd.f32 %v900_v1, %v686_v27  ;;  %v1692_v8 = vpop.f32.mrb[14].mxu0  ;;  %v705_v9 = vpop.f32.mrb[19].mxu1  ;;  %v1102_v23 = vsel %vm979_vm5, %v1060_v5, 0.0 }
 0x10b   : > { %v903_v15 = vpop.f32.mrb[15].mxu0  ;;  %v1510_v16 = vpack.c.bf16 %v909_v0, %v909_v0  ;;  %v1101_v20 = vadd.f32 %v1100_v10, %v1099_v14  ;;  %v1002_v21 = vadd.f32 %v1001_v12, %v1000_v13  ;;  %v912_v22 = vadd.f32 %v1692_v8, %v1658_v31 }
 0x10c   : > { %v1003_v17 = vsel %vm979_vm5, %v901_v7, 0.0  ;;  %v1061_v18 = vmul.f32 %v901_v7, %v901_v7  ;;  %v1508_v19 = vpack.c.bf16 %v901_v7, %v901_v7  ;;  %v904_v25 = vadd.f32 %v903_v15, %v689_v36 }
 0x10d   : > { %1297 = vst.msk [vmem:[%s1990_s21 + $0x38] sm:$0xf] %vm1282_vm4, %v1510_v16  ;;  %v1063_v26 = vmul.f32 %v909_v0, %v909_v0  ;;  %v1004_v4 = vadd.f32 %v1003_v17, %v1002_v21  ;;  %v1103_v27 = vadd.f32 %v1102_v23, %v1101_v20  ;;  %v1511_v29 = vpack.c.bf16 %v912_v22, %v912_v22 }
 0x10e   : > { %v1104_v24 = vsel %vm979_vm5, %v1061_v18, 0.0  ;;  %1295 = vst.msk [vmem:[%s1990_s21 + $0x30] sm:$0xf] %vm1282_vm4, %v1508_v19  ;;  %v1005_v30 = vsel %vm979_vm5, %v904_v25, 0.0  ;;  %v1062_v32 = vmul.f32 %v904_v25, %v904_v25  ;;  %v1509_v31 = vpack.c.bf16 %v904_v25, %v904_v25 }
 0x10f   : > { %v1665_v28 = vpop.f32.mrb[20].mxu1  ;;  %v1105_v34 = vadd.f32 %v1104_v24, %v1103_v27  ;;  %v1006_v35 = vadd.f32 %v1005_v30, %v1004_v4  ;;  %v1007_v36 = vsel %vm979_vm5, %v909_v0, 0.0  ;;  %v1064_v40 = vmul.f32 %v912_v22, %v912_v22  ;;  %1298 = vst.msk [vmem:[%s1990_s21 + $0x3c] sm:$0xf] %vm1282_vm4, %v1511_v29 }
 0x110   : > { %v1695_v11 = vpop.f32.mrb[16].mxu0  ;;  %v718_v33 = vpop.f32.mrb[21].mxu1  ;;  %v1106_v41 = vsel %vm979_vm5, %v1062_v32, 0.0  ;;  %1296 = vst.msk [vmem:[%s1990_s21 + $0x34] sm:$0xf] %vm1282_vm4, %v1509_v31  ;;  %v1108_v45 = vsel %vm979_vm5, %v1063_v26, 0.0 }
 0x111   : > { %v925_v37 = vadd.f32 %v1695_v11, %v1661_v55  ;;  %v916_v38 = vpop.f32.mrb[17].mxu0  ;;  %v1666_v39 = vpop.f32.mrb[22].mxu1  ;;  %v1009_v46 = vsel %vm979_vm5, %v912_v22, 0.0  ;;  %v1008_v47 = vadd.f32 %v1007_v36, %v1006_v35  ;;  %v1107_v48 = vadd.f32 %v1106_v41, %v1105_v34 }
 0x112   : > { %v917_v42 = vadd.f32 %v916_v38, %v702_v61  ;;  %v1696_v43 = vpop.f32.mrb[18].mxu0  ;;  %v721_v44 = vpop.f32.mrb[23].mxu1  ;;  %v1110_v57 = vsel %vm979_vm5, %v1064_v40, 0.0 }
 0x113   : > { %v919_v49 = vpop.f32.mrb[19].mxu0  ;;  %v1514_v50 = vpack.c.bf16 %v925_v37, %v925_v37  ;;  %v1109_v54 = vadd.f32 %v1108_v45, %v1107_v48  ;;  %v1010_v55 = vadd.f32 %v1009_v46, %v1008_v47  ;;  %v928_v56 = vadd.f32 %v1696_v43, %v1662_v2 }
 0x114   : > { %v1011_v51 = vsel %vm979_vm5, %v917_v42, 0.0  ;;  %v1065_v52 = vmul.f32 %v917_v42, %v917_v42  ;;  %v1512_v53 = vpack.c.bf16 %v917_v42, %v917_v42  ;;  %v920_v59 = vadd.f32 %v919_v49, %v705_v9 }
 0x115   : > { %1301 = vst.msk [vmem:[%s1990_s21 + $0x48] sm:$0xf] %vm1282_vm4, %v1514_v50  ;;  %v1067_v60 = vmul.f32 %v925_v37, %v925_v37  ;;  %v1012_v61 = vadd.f32 %v1011_v51, %v1010_v55  ;;  %v1111_v62 = vadd.f32 %v1110_v57, %v1109_v54  ;;  %v1515_v0 = vpack.c.bf16 %v928_v56, %v928_v56 }
 0x116   : > { %v1112_v58 = vsel %vm979_vm5, %v1065_v52, 0.0  ;;  %1299 = vst.msk [vmem:[%s1990_s21 + $0x40] sm:$0xf] %vm1282_vm4, %v1512_v53  ;;  %v1013_v1 = vsel %vm979_vm5, %v920_v59, 0.0  ;;  %v1066_v3 = vmul.f32 %v920_v59, %v920_v59  ;;  %v1513_v2 = vpack.c.bf16 %v920_v59, %v920_v59 }
 0x117   : > { %v1669_v63 = vpop.f32.mrb[24].mxu1  ;;  %v1113_v7 = vadd.f32 %v1112_v58, %v1111_v62  ;;  %v1014_v8 = vadd.f32 %v1013_v1, %v1012_v61  ;;  %v1015_v9 = vsel %vm979_vm5, %v925_v37, 0.0  ;;  %v1068_v14 = vmul.f32 %v928_v56, %v928_v56  ;;  %1302 = vst.msk [vmem:[%s1990_s21 + $0x4c] sm:$0xf] %vm1282_vm4, %v1515_v0 }
 0x118   : > { %v1699_v5 = vpop.f32.mrb[20].mxu0  ;;  %v734_v6 = vpop.f32.mrb[25].mxu1  ;;  %v1114_v15 = vsel %vm979_vm5, %v1066_v3, 0.0  ;;  %1300 = vst.msk [vmem:[%s1990_s21 + $0x44] sm:$0xf] %vm1282_vm4, %v1513_v2  ;;  %v1116_v19 = vsel %vm979_vm5, %v1067_v60, 0.0 }
 0x119   : > { %v941_v10 = vadd.f32 %v1699_v5, %v1665_v28  ;;  %v932_v12 = vpop.f32.mrb[21].mxu0  ;;  %v1670_v13 = vpop.f32.mrb[26].mxu1  ;;  %v1017_v20 = vsel %vm979_vm5, %v928_v56, 0.0  ;;  %v1016_v21 = vadd.f32 %v1015_v9, %v1014_v8  ;;  %v1115_v22 = vadd.f32 %v1114_v15, %v1113_v7 }
 0x11a   : > { %v933_v16 = vadd.f32 %v932_v12, %v718_v33  ;;  %v1700_v17 = vpop.f32.mrb[22].mxu0  ;;  %v737_v18 = vpop.f32.mrb[27].mxu1  ;;  %v1118_v30 = vsel %vm979_vm5, %v1068_v14, 0.0 }
 0x11b   : > { %v935_v23 = vpop.f32.mrb[23].mxu0  ;;  %v1518_v24 = vpack.c.bf16 %v941_v10, %v941_v10  ;;  %v1117_v27 = vadd.f32 %v1116_v19, %v1115_v22  ;;  %v1018_v28 = vadd.f32 %v1017_v20, %v1016_v21  ;;  %v944_v29 = vadd.f32 %v1700_v17, %v1666_v39 }
 0x11c   : > { %v1019_v25 = vsel %vm979_vm5, %v933_v16, 0.0  ;;  %v1069_v26 = vmul.f32 %v933_v16, %v933_v16  ;;  %v1516_v4 = vpack.c.bf16 %v933_v16, %v933_v16  ;;  %v936_v31 = vadd.f32 %v935_v23, %v721_v44 }
 0x11d   : > { %1305 = vst.msk [vmem:[%s1990_s21 + $0x58] sm:$0xf] %vm1282_vm4, %v1518_v24  ;;  %v1071_v11 = vmul.f32 %v941_v10, %v941_v10  ;;  %v1020_v33 = vadd.f32 %v1019_v25, %v1018_v28  ;;  %v1119_v34 = vadd.f32 %v1118_v30, %v1117_v27  ;;  %v1519_v37 = vpack.c.bf16 %v944_v29, %v944_v29 }
 0x11e   : > { %v1120_v32 = vsel %vm979_vm5, %v1069_v26, 0.0  ;;  %1303 = vst.msk [vmem:[%s1990_s21 + $0x50] sm:$0xf] %vm1282_vm4, %v1516_v4  ;;  %v1021_v38 = vsel %vm979_vm5, %v936_v31, 0.0  ;;  %v1070_v36 = vmul.f32 %v936_v31, %v936_v31  ;;  %v1517_v39 = vpack.c.bf16 %v936_v31, %v936_v31 }
 0x11f   : > { %v1673_v35 = vpop.f32.mrb[28].mxu1  ;;  %v1121_v42 = vadd.f32 %v1120_v32, %v1119_v34  ;;  %v1022_v43 = vadd.f32 %v1021_v38, %v1020_v33  ;;  %v1023_v44 = vsel %vm979_vm5, %v941_v10, 0.0  ;;  %v1072_v48 = vmul.f32 %v944_v29, %v944_v29  ;;  %1306 = vst.msk [vmem:[%s1990_s21 + $0x5c] sm:$0xf] %vm1282_vm4, %v1519_v37 }
 0x120   : > { %v1703_v40 = vpop.f32.mrb[24].mxu0  ;;  %v750_v41 = vpop.f32.mrb[29].mxu1  ;;  %v1122_v49 = vsel %vm979_vm5, %v1070_v36, 0.0  ;;  %1304 = vst.msk [vmem:[%s1990_s21 + $0x54] sm:$0xf] %vm1282_vm4, %v1517_v39  ;;  %v1124_v53 = vsel %vm979_vm5, %v1071_v11, 0.0 }
 0x121   : > { %v957_v45 = vadd.f32 %v1703_v40, %v1669_v63  ;;  %v948_v46 = vpop.f32.mrb[25].mxu0  ;;  %v1674_v47 = vpop.f32.mrb[30].mxu1  ;;  %v1025_v54 = vsel %vm979_vm5, %v944_v29, 0.0  ;;  %v1024_v55 = vadd.f32 %v1023_v44, %v1022_v43  ;;  %v1123_v56 = vadd.f32 %v1122_v49, %v1121_v42 }
 0x122   : > { %v949_v50 = vadd.f32 %v948_v46, %v734_v6  ;;  %v1704_v51 = vpop.f32.mrb[26].mxu0  ;;  %v753_v52 = vpop.f32.mrb[31].mxu1  ;;  %v1126_v1 = vsel %vm979_vm5, %v1072_v48, 0.0 }
 0x123   : > { %v951_v57 = vpop.f32.mrb[27].mxu0  ;;  %v1522_v58 = vpack.c.bf16 %v957_v45, %v957_v45  ;;  %v1125_v62 = vadd.f32 %v1124_v53, %v1123_v56  ;;  %v1026_v63 = vadd.f32 %v1025_v54, %v1024_v55  ;;  %v960_v0 = vadd.f32 %v1704_v51, %v1670_v13 }
 0x124   : > { %v1027_v59 = vsel %vm979_vm5, %v949_v50, 0.0  ;;  %v1073_v60 = vmul.f32 %v949_v50, %v949_v50  ;;  %v1520_v61 = vpack.c.bf16 %v949_v50, %v949_v50  ;;  %v952_v2 = vadd.f32 %v951_v57, %v737_v18 }
 0x125   : > { %1309 = vst.msk [vmem:[%s1990_s21 + $0x68] sm:$0xf] %vm1282_vm4, %v1522_v58  ;;  %v1075_v5 = vmul.f32 %v957_v45, %v957_v45  ;;  %v1028_v6 = vadd.f32 %v1027_v59, %v1026_v63  ;;  %v1127_v7 = vadd.f32 %v1126_v1, %v1125_v62  ;;  %v1523_v8 = vpack.c.bf16 %v960_v0, %v960_v0 }
 0x126   : > { %v1128_v3 = vsel %vm979_vm5, %v1073_v60, 0.0  ;;  %1307 = vst.msk [vmem:[%s1990_s21 + $0x60] sm:$0xf] %vm1282_vm4, %v1520_v61  ;;  %v1029_v10 = vsel %vm979_vm5, %v952_v2, 0.0  ;;  %v1074_v12 = vmul.f32 %v952_v2, %v952_v2  ;;  %v1521_v9 = vpack.c.bf16 %v952_v2, %v952_v2 }
 0x127   : > { %v1129_v14 = vadd.f32 %v1128_v3, %v1127_v7  ;;  %v1030_v15 = vadd.f32 %v1029_v10, %v1028_v6  ;;  %v1031_v19 = vsel %vm979_vm5, %v957_v45, 0.0  ;;  %v1076_v20 = vmul.f32 %v960_v0, %v960_v0  ;;  %1310 = vst.msk [vmem:[%s1990_s21 + $0x6c] sm:$0xf] %vm1282_vm4, %v1523_v8 }
 0x128   : > { %v1707_v13 = vpop.f32.mrb[28].mxu0  ;;  %v1130_v18 = vsel %vm979_vm5, %v1074_v12, 0.0  ;;  %1308 = vst.msk [vmem:[%s1990_s21 + $0x64] sm:$0xf] %vm1282_vm4, %v1521_v9  ;;  %v1132_v23 = vsel %vm979_vm5, %v1075_v5, 0.0  ;;  %v1033_v24 = vsel %vm979_vm5, %v960_v0, 0.0 }
 0x129   : > { %v973_v16 = vadd.f32 %v1707_v13, %v1673_v35  ;;  %v964_v17 = vpop.f32.mrb[29].mxu0  ;;  %v1032_v25 = vadd.f32 %v1031_v19, %v1030_v15  ;;  %v1131_v26 = vadd.f32 %v1130_v18, %v1129_v14  ;;  %v1134_v33 = vsel %vm979_vm5, %v1076_v20, 0.0 }
 0x12a   : > { %v965_v21 = vadd.f32 %v964_v17, %v750_v41  ;;  %v1708_v22 = vpop.f32.mrb[30].mxu0 }
 0x12b   : > { %v967_v4 = vpop.f32.mrb[31].mxu0  ;;  %v1526_v27 = vpack.c.bf16 %v973_v16, %v973_v16  ;;  %v1133_v32 = vadd.f32 %v1132_v23, %v1131_v26  ;;  %v1034_v31 = vadd.f32 %v1033_v24, %v1032_v25  ;;  %v976_v11 = vadd.f32 %v1708_v22, %v1674_v47 }
 0x12c   : > { %v1035_v28 = vsel %vm979_vm5, %v965_v21, 0.0  ;;  %v1077_v29 = vmul.f32 %v965_v21, %v965_v21  ;;  %v1524_v30 = vpack.c.bf16 %v965_v21, %v965_v21  ;;  %v968_v35 = vadd.f32 %v967_v4, %v753_v52 }
 0x12d   : > { %1313 = vst.msk [vmem:[%s1990_s21 + $0x78] sm:$0xf] %vm1282_vm4, %v1526_v27  ;;  %v1079_v37 = vmul.f32 %v973_v16, %v973_v16  ;;  %v1036_v38 = vadd.f32 %v1035_v28, %v1034_v31  ;;  %v1135_v36 = vadd.f32 %v1134_v33, %v1133_v32  ;;  %v1527_v39 = vpack.c.bf16 %v976_v11, %v976_v11 }
 0x12e   : > { %v1136_v34 = vsel %vm979_vm5, %v1077_v29, 0.0  ;;  %1311 = vst.msk [vmem:[%s1990_s21 + $0x70] sm:$0xf] %vm1282_vm4, %v1524_v30  ;;  %v1037_v40 = vsel %vm979_vm5, %v968_v35, 0.0  ;;  %v1078_v41 = vmul.f32 %v968_v35, %v968_v35  ;;  %v1525_v42 = vpack.c.bf16 %v968_v35, %v968_v35 }
 0x12f   : > { %v1137_v43 = vadd.f32 %v1136_v34, %v1135_v36  ;;  %v1038_v45 = vadd.f32 %v1037_v40, %v1036_v38  ;;  %v1039_v46 = vsel %vm979_vm5, %v973_v16, 0.0  ;;  %v1080_v47 = vmul.f32 %v976_v11, %v976_v11  ;;  %1314 = vst.msk [vmem:[%s1990_s21 + $0x7c] sm:$0xf] %vm1282_vm4, %v1527_v39 }
 0x130   : > { %v1138_v44 = vsel %vm979_vm5, %v1078_v41, 0.0  ;;  %1312 = vst.msk [vmem:[%s1990_s21 + $0x74] sm:$0xf] %vm1282_vm4, %v1525_v42  ;;  %v1140_v50 = vsel %vm979_vm5, %v1079_v37, 0.0  ;;  %v1041_v51 = vsel %vm979_vm5, %v976_v11, 0.0 }
 0x131   : > { %v1040_v48 = vadd.f32 %v1039_v46, %v1038_v45  ;;  %v1139_v49 = vadd.f32 %v1138_v44, %v1137_v43  ;;  %v1142_v54 = vsel %vm979_vm5, %v1080_v47, 0.0 }
 0x133   : > { %v1042_v52 = vadd.f32 %v1041_v51, %v1040_v48  ;;  %v1141_v53 = vadd.f32 %v1140_v50, %v1139_v49 }
 0x135   : > { %v1043_v55 = vrot.slane %v1042_v52, 4  ;;  %v1143_v56 = vadd.f32 %v1142_v54, %v1141_v53 }
 0x137   : > { %v1044_v57 = vadd.f32 %v1043_v55, %v1042_v52  ;;  %v1144_v58 = vrot.slane %v1143_v56, 4 }
 0x139   : > { %v1045_v59 = vrot.slane %v1044_v57, 2  ;;  %v1145_v60 = vadd.f32 %v1144_v58, %v1143_v56 }
 0x13b   : > { %v1046_v61 = vadd.f32 %v1045_v59, %v1044_v57  ;;  %v1146_v62 = vrot.slane %v1145_v60, 2 }
 0x13d   : > { %v1047_v63 = vrot.slane %v1046_v61, 1  ;;  %v1147_v0 = vadd.f32 %v1146_v62, %v1145_v60 }
 0x13f   : > { %v1148_v1 = vrot.slane %v1147_v0, 1  ;;  %v1048_v3 = vadd.f32 %v1047_v63, %v1046_v61 }
 0x141   : > { %v1149_v2 = vadd.f32 %v1148_v1, %v1147_v0 }
 0x143   : > { %v1151_v5 = vsel %vm1150_vm6, %v1048_v3, %v1149_v2 }
 0x144   : > { %v1152_v6 = vsel %vm600_vm0, %v1151_v5, 0.0 }
 0x145   : > { %1153 = vst.msk [vmem:[%s309_s27] sm:$0xff] %vm979_vm5, %v1152_v6 }
 0x146 PF: > { %s18_s24 = sadd.s32 1, %s1757_s24  }
 0x147   : > { %p15_p4 = scmp.ge.s32.totalorder %s18_s24, 4  }
 0x149   :  { %17 = sbr.rel (!%p15_p4) target bundleno = 1 (0x1), region = 89 }

// kernel: bottleneck_block_pallas.5
= control target key start
LH: loop header
LB: loop body
LE: loop exit
PB: predicated region body
PF: predicated region fallthrough
CT: control target
= control target key end

     0   :  { %s4609_s18 = smov 0   ;;  %s5514_s0 = inlined_call_operand.vmem [shape: bf16[2,16,16,8], index: 0, kind: input, shape index: {}]   ;;  %s5515_s1 = inlined_call_operand.vmem [shape: f32[1,8], index: 1, kind: input, shape index: {}]   ;;  %s5516_s2 = inlined_call_operand.vmem [shape: f32[1,8], index: 2, kind: input, shape index: {}]   ;;  %s5517_s3 = inlined_call_operand.vmem [shape: bf16[9,8,8], index: 3, kind: input, shape index: {}]   ;;  %s5518_s4 = inlined_call_operand.vmem [shape: bf16[2,16,16,8], index: 4, kind: output, shape index: {0}]   ;;  %s5519_s5 = inlined_call_operand.vmem [shape: f32[2,8,8], index: 5, kind: output, shape index: {1}]  }
   0x1 LB: > { %s3523_s19 = sadd.s32 4294967295, %s4576_s18   ;;  %p3527_p0 = scmp.ge.s32.totalorder %s4576_s18, 1  ;;  %s4576_s18 = sphi %s4609_s18, %s16_s18  }
   0x2   : > { %p190_p1 = scmp.lt.s32.totalorder %s4576_s18, 3 }
   0x4   : > { %p191_p2 = pnand %p3527_p0, %p190_p1 }
   0x5   : > { %v3535_v0 = vld [vmem:[%s5517_s3 + $0x4] sm:$0xf] (!%p191_p2)  ;;  %vm665_vm0 = vcmask (!%p191_p2), 1043456   ;;  %v4623_v1 = vld [vmem:[%s5517_s3 + $0x10] sm:$0xf] (!%p191_p2)  ;;  %vm237_vm1 = vcmask (!%p191_p2), 64512  }
   0x6   : > { %194 = sbr.rel (%p191_p2) target bundleno = 575 (0x23f), region = 36  ;;  %4551 = vmatprep.subr.msk.bf16.mxu1 (!%p191_p2), %vm665_vm0, %v3535_v0  ;;  %4555 = vmatprep.subr.msk.bf16.mxu0 (!%p191_p2), %vm665_vm0, %v4623_v1  ;;  %v667_v2 = vsel (!%p191_p2), %vm665_vm0, %v3535_v0, 0  ;;  %v4631_v3 = vsel (!%p191_p2), %vm665_vm0, %v4623_v1, 0  ;;  %p4635_p3 = scmp.lt.s32.totalorder (!%p191_p2), %s3523_s19, 1  ;;  %v4578_v4 = vmov (!%p191_p2), 0.0   ;;  %vm241_vm2 = vcmask (!%p191_p2), 57344  }
   0x7   : > { %3988 = vmatpush3.bf16.msra.mxu1 (!%p191_p2), %v667_v2  ;;  %4124 = vmatpush3.bf16.msra.mxu0 (!%p191_p2), %v4631_v3  ;;  %239 = vst.msk [vmem:[#allocation2 + $0x8] sm:$0xff] (!%p191_p2), %vm237_vm1, %v4578_v4  ;;  %240 = vst.msk [vmem:[#allocation2 + $0x10] sm:$0xff] (!%p191_p2), %vm237_vm1, %v4578_v4  ;;  %v566_v5 = vld [vmem:[%s5517_s3] sm:$0xf] (!%p191_p2)  ;;  %v3619_v6 = vld [vmem:[%s5517_s3 + $0x14] sm:$0xf] (!%p191_p2) }
   0x8   : > { %238 = vst.msk [vmem:[#allocation2] sm:$0xff] (!%p191_p2), %vm237_vm1, %v4578_v4  ;;  %243 = vst.msk [vmem:[#allocation2 + $0x20] sm:$0xff] (!%p191_p2), %vm237_vm1, %v4578_v4  ;;  %4552 = vmatprep.subr.msk.bf16.mxu1 (!%p191_p2), %vm665_vm0, %v566_v5  ;;  %4557 = vmatprep.subr.msk.bf16.mxu0 (!%p191_p2), %vm665_vm0, %v3619_v6  ;;  %v4809_v7 = vld [vmem:[%s5515_s1] ss:$0 sm:$0xff] (!%p191_p2)  ;;  %v4813_v9 = vsel (!%p191_p2), %vm665_vm0, %v566_v5, 0  ;;  %v4817_v11 = vsel (!%p191_p2), %vm665_vm0, %v3619_v6, 0 }
   0x9   : > { %244 = vst.msk [vmem:[#allocation2 + $0x28] sm:$0xff] (!%p191_p2), %vm237_vm1, %v4578_v4  ;;  %245 = vst.msk [vmem:[#allocation2 + $0x30] sm:$0xff] (!%p191_p2), %vm237_vm1, %v4578_v4  ;;  %v4824_v20 = vld [vmem:[%s5516_s2] ss:$0 sm:$0xff] (!%p191_p2)  ;;  %vm3404_vm3 = vcmask (!%p191_p2), 60416   ;;  %vm3271_vm4 = vcmask (!%p191_p2), 1040384  }
   0xa   : > { %247 = vst.msk [vmem:[#allocation2 + $0x40] sm:$0xff] (!%p191_p2), %vm237_vm1, %v4578_v4  ;;  %248 = vst.msk [vmem:[#allocation2 + $0x48] sm:$0xff] (!%p191_p2), %vm237_vm1, %v4578_v4  ;;  %vm3273_vm5 = vcmask (!%p191_p2), 1041408  }
   0xb   : > { %249 = vst.msk [vmem:[#allocation2 + $0x50] sm:$0xff] (!%p191_p2), %vm237_vm1, %v4578_v4  ;;  %251 = vst.msk [vmem:[#allocation2 + $0x60] sm:$0xff] (!%p191_p2), %vm237_vm1, %v4578_v4 }
   0xc   : > { %252 = vst.msk [vmem:[#allocation2 + $0x68] sm:$0xff] (!%p191_p2), %vm237_vm1, %v4578_v4  ;;  %253 = vst.msk [vmem:[#allocation2 + $0x70] sm:$0xff] (!%p191_p2), %vm237_vm1, %v4578_v4 }
   0xd   : > { %255 = vst.msk [vmem:[#allocation2 + $0x80] sm:$0xff] %vm237_vm1, %v4578_v4  ;;  %256 = vst.msk [vmem:[#allocation2 + $0x88] sm:$0xff] %vm237_vm1, %v4578_v4  ;;  %s5522_s19 = smov (!%p4635_p3, %s3523_s19), 1 }
   0xe   : > { %257 = vst.msk [vmem:[#allocation2 + $0x90] sm:$0xff] %vm237_vm1, %v4578_v4  ;;  %259 = vst.msk [vmem:[#allocation2 + $0xa0] sm:$0xff] %vm237_vm1, %v4578_v4  ;;  %s3721_s29 = sshll.u32 %s5522_s19, 7  ;;  %v567_v18 = vld [vmem:[#allocation2 + $0x8] sm:$0xff]  ;;  %v568_v19 = vld [vmem:[#allocation2 + $0x10] sm:$0xff]  ;;  %s3532_s27 = sshll.u32 %s5522_s19, 3 }
   0xf   : > { %260 = vst.msk [vmem:[#allocation2 + $0xa8] sm:$0xff] %vm237_vm1, %v4578_v4  ;;  %261 = vst.msk [vmem:[#allocation2 + $0xb0] sm:$0xff] %vm237_vm1, %v4578_v4  ;;  %s4804_s7 = scalar_lea.vmem %s5514_s0, %s3721_s29  ;;  %v599_v25 = vpack.c.bf16 %v568_v19, %v567_v18  ;;  %s5368_s26 = scalar_lea.vmem %s5518_s4, %s3721_s29 }
  0x10   : > { %263 = vst.msk [vmem:[#allocation2 + $0xc0] sm:$0xff] %vm237_vm1, %v4578_v4  ;;  %264 = vst.msk [vmem:[#allocation2 + $0xc8] sm:$0xff] %vm237_vm1, %v4578_v4  ;;  %v3756_v8 = vld [vmem:[%s4804_s7] sm:$0xff]   ;;  %v3819_v10 = vld [vmem:[%s4804_s7 + $0x8] sm:$0xff]   ;;  %s235_s30 = scalar_lea.vmem %s5519_s5, %s3532_s27 }
  0x11   : > { %265 = vst.msk [vmem:[#allocation2 + $0xd0] sm:$0xff] %vm237_vm1, %v4578_v4  ;;  %267 = vst.msk [vmem:[#allocation2 + $0xe0] sm:$0xff] %vm237_vm1, %v4578_v4  ;;  %v3820_v12 = vld [vmem:[%s4804_s7 + $0x10] sm:$0xff]   ;;  %v3757_v13 = vunpack.c.l.bf16 %v3756_v8  ;;  %v3758_v14 = vunpack.c.h.bf16 %v3756_v8  ;;  %v3761_v15 = vunpack.c.l.bf16 %v3819_v10  ;;  %v3762_v16 = vunpack.c.h.bf16 %v3819_v10  ;;  %v3821_v17 = vld [vmem:[%s4804_s7 + $0x18] sm:$0xff]   ;;  %3989 = vmatprep.mubr.msk.bf16.mxu1 %vm237_vm1, %v599_v25 }
  0x12   : > { %268 = vst.msk [vmem:[#allocation2 + $0xe8] sm:$0xff] %vm237_vm1, %v4578_v4  ;;  %269 = vst.msk [vmem:[#allocation2 + $0xf0] sm:$0xff] %vm237_vm1, %v4578_v4  ;;  %v3765_v21 = vunpack.c.l.bf16 %v3820_v12  ;;  %v3766_v22 = vunpack.c.h.bf16 %v3820_v12  ;;  %v3769_v23 = vunpack.c.l.bf16 %v3821_v17  ;;  %v3770_v24 = vunpack.c.h.bf16 %v3821_v17  ;;  %v3822_v41 = vld [vmem:[%s4804_s7 + $0x20] sm:$0xff]   ;;  %v3823_v42 = vld [vmem:[%s4804_s7 + $0x28] sm:$0xff]  }
  0x13   : > { %271 = vst.msk [vmem:[#allocation2 + $0x100] sm:$0xff] %vm237_vm1, %v4578_v4  ;;  %272 = vst.msk [vmem:[#allocation2 + $0x108] sm:$0xff] %vm237_vm1, %v4578_v4  ;;  %v382_v26 = vmul.f32 %v3757_v13, %v4809_v7  ;;  %v383_v27 = vmul.f32 %v3758_v14, %v4809_v7  ;;  %v384_v28 = vmul.f32 %v3761_v15, %v4809_v7  ;;  %v3824_v47 = vld [vmem:[%s4804_s7 + $0x30] sm:$0xff]   ;;  %v3825_v48 = vld [vmem:[%s4804_s7 + $0x38] sm:$0xff]   ;;  %v3773_v54 = vunpack.c.l.bf16 %v3822_v41 }
  0x14   : > { %273 = vst.msk [vmem:[#allocation2 + $0x110] sm:$0xff] %vm237_vm1, %v4578_v4  ;;  %275 = vst.msk [vmem:[#allocation2 + $0x120] sm:$0xff] %vm237_vm1, %v4578_v4  ;;  %v385_v29 = vmul.f32 %v3762_v16, %v4809_v7  ;;  %v386_v30 = vmul.f32 %v3765_v21, %v4809_v7  ;;  %v387_v31 = vmul.f32 %v3766_v22, %v4809_v7  ;;  %v3774_v55 = vunpack.c.h.bf16 %v3822_v41  ;;  %v3826_v14 = vld [vmem:[%s4804_s7 + $0x40] sm:$0xff]   ;;  %v3828_v25 = vld [vmem:[%s4804_s7 + $0x50] sm:$0xff]  }
  0x15   : > { %276 = vst.msk [vmem:[#allocation2 + $0x128] sm:$0xff] %vm237_vm1, %v4578_v4  ;;  %277 = vst.msk [vmem:[#allocation2 + $0x130] sm:$0xff] %vm237_vm1, %v4578_v4  ;;  %v388_v32 = vmul.f32 %v3769_v23, %v4809_v7  ;;  %v421_v33 = vadd.f32 %v4824_v20, %v382_v26  ;;  %v422_v34 = vadd.f32 %v4824_v20, %v383_v27  ;;  %v3777_v56 = vunpack.c.l.bf16 %v3823_v42 }
  0x16   : > { %279 = vst.msk [vmem:[#allocation2 + $0x140] sm:$0xff] %vm237_vm1, %v4578_v4  ;;  %280 = vst.msk [vmem:[#allocation2 + $0x148] sm:$0xff] %vm237_vm1, %v4578_v4  ;;  %v423_v35 = vadd.f32 %v4824_v20, %v384_v28  ;;  %v389_v36 = vmul.f32 %v3770_v24, %v4809_v7  ;;  %v424_v37 = vadd.f32 %v4824_v20, %v385_v29  ;;  %v3778_v57 = vunpack.c.h.bf16 %v3823_v42  ;;  %v3827_v24 = vld [vmem:[%s4804_s7 + $0x48] sm:$0xff]  }
  0x17   : > { %281 = vst.msk [vmem:[#allocation2 + $0x150] sm:$0xff] %vm237_vm1, %v4578_v4  ;;  %283 = vst.msk [vmem:[#allocation2 + $0x160] sm:$0xff] %vm237_vm1, %v4578_v4  ;;  %v425_v38 = vadd.f32 %v4824_v20, %v386_v30  ;;  %v426_v39 = vadd.f32 %v4824_v20, %v387_v31  ;;  %v427_v40 = vadd.f32 %v4824_v20, %v388_v32  ;;  %v453_v43 = vmax.f32 %v421_v33, 0.0 }
  0x18   : > { %284 = vst.msk [vmem:[#allocation2 + $0x168] sm:$0xff] %vm237_vm1, %v4578_v4  ;;  %285 = vst.msk [vmem:[#allocation2 + $0x170] sm:$0xff] %vm237_vm1, %v4578_v4  ;;  %v454_v44 = vmax.f32 %v422_v34, 0.0  ;;  %v455_v45 = vmax.f32 %v423_v35, 0.0  ;;  %v428_v46 = vadd.f32 %v4824_v20, %v389_v36  ;;  %v456_v49 = vmax.f32 %v424_v37, 0.0 }
  0x19   : > { %287 = vst.msk [vmem:[#allocation2 + $0x180] sm:$0xff] %vm237_vm1, %v4578_v4  ;;  %288 = vst.msk [vmem:[#allocation2 + $0x188] sm:$0xff] %vm237_vm1, %v4578_v4  ;;  %v457_v50 = vmax.f32 %v425_v38, 0.0  ;;  %v458_v51 = vmax.f32 %v426_v39, 0.0  ;;  %v459_v52 = vmax.f32 %v427_v40, 0.0  ;;  %v3781_v58 = vunpack.c.l.bf16 %v3824_v47 }
  0x1a   : > { %289 = vst.msk [vmem:[#allocation2 + $0x190] sm:$0xff] %vm237_vm1, %v4578_v4  ;;  %291 = vst.msk [vmem:[#allocation2 + $0x1a0] sm:$0xff] %vm237_vm1, %v4578_v4  ;;  %v460_v53 = vmax.f32 %v428_v46, 0.0  ;;  %v3782_v59 = vunpack.c.h.bf16 %v3824_v47  ;;  %v3785_v60 = vunpack.c.l.bf16 %v3825_v48  ;;  %v390_v61 = vmul.f32 %v3773_v54, %v4809_v7  ;;  %v4894_v46 = vld [vmem:[%s5517_s3 + $0x18] sm:$0xf] }
  0x1b   : > { %292 = vst.msk [vmem:[#allocation2 + $0x1a8] sm:$0xff] %vm237_vm1, %v4578_v4  ;;  %293 = vst.msk [vmem:[#allocation2 + $0x1b0] sm:$0xff] %vm237_vm1, %v4578_v4  ;;  %v391_v62 = vmul.f32 %v3774_v55, %v4809_v7  ;;  %v392_v63 = vmul.f32 %v3777_v56, %v4809_v7  ;;  %v3786_v0 = vunpack.c.h.bf16 %v3825_v48  ;;  %v393_v2 = vmul.f32 %v3778_v57, %v4809_v7 }
  0x1c   : > { %295 = vst.msk [vmem:[#allocation2 + $0x1c0] sm:$0xff] %vm237_vm1, %v4578_v4  ;;  %296 = vst.msk [vmem:[#allocation2 + $0x1c8] sm:$0xff] %vm237_vm1, %v4578_v4  ;;  %v395_v5 = vmul.f32 %v3782_v59, %v4809_v7  ;;  %v396_v6 = vmul.f32 %v3785_v60, %v4809_v7  ;;  %v429_v8 = vadd.f32 %v4824_v20, %v390_v61  ;;  %v3789_v32 = vunpack.c.l.bf16 %v3826_v14  ;;  %v3830_v59 = vld [vmem:[%s4804_s7 + $0x60] sm:$0xff]  }
  0x1d   : > { %297 = vst.msk [vmem:[#allocation2 + $0x1d0] sm:$0xff] %vm237_vm1, %v4578_v4  ;;  %299 = vst.msk [vmem:[#allocation2 + $0x1e0] sm:$0xff] %vm237_vm1, %v4578_v4  ;;  %v430_v10 = vadd.f32 %v4824_v20, %v391_v62  ;;  %v431_v12 = vadd.f32 %v4824_v20, %v392_v63  ;;  %v397_v13 = vmul.f32 %v3786_v0, %v4809_v7  ;;  %v3790_v39 = vunpack.c.h.bf16 %v3826_v14 }
  0x1e   : > { %300 = vst.msk [vmem:[#allocation2 + $0x1e8] sm:$0xff] %vm237_vm1, %v4578_v4  ;;  %301 = vst.msk [vmem:[#allocation2 + $0x1f0] sm:$0xff] %vm237_vm1, %v4578_v4  ;;  %v432_v15 = vadd.f32 %v4824_v20, %v393_v2  ;;  %v434_v17 = vadd.f32 %v4824_v20, %v395_v5  ;;  %v435_v18 = vadd.f32 %v4824_v20, %v396_v6  ;;  %v461_v19 = vmax.f32 %v429_v8, 0.0 }
  0x1f   : > { %303 = vst.msk [vmem:[#allocation2 + $0x200] sm:$0xff] %vm237_vm1, %v4578_v4  ;;  %304 = vst.msk [vmem:[#allocation2 + $0x208] sm:$0xff] %vm237_vm1, %v4578_v4  ;;  %v462_v21 = vmax.f32 %v430_v10, 0.0  ;;  %v463_v22 = vmax.f32 %v431_v12, 0.0  ;;  %v436_v23 = vadd.f32 %v4824_v20, %v397_v13  ;;  %v398_v42 = vmul.f32 %v3789_v32, %v4809_v7 }
  0x20   : > { %305 = vst.msk [vmem:[#allocation2 + $0x210] sm:$0xff] %vm237_vm1, %v4578_v4  ;;  %307 = vst.msk [vmem:[#allocation2 + $0x220] sm:$0xff] %vm237_vm1, %v4578_v4  ;;  %v464_v29 = vmax.f32 %v432_v15, 0.0  ;;  %v466_v31 = vmax.f32 %v434_v17, 0.0  ;;  %v467_v37 = vmax.f32 %v435_v18, 0.0  ;;  %v3794_v47 = vunpack.c.h.bf16 %v3827_v24  ;;  %v3831_v15 = vld [vmem:[%s4804_s7 + $0x68] sm:$0xff]  }
  0x21   : > { %308 = vst.msk [vmem:[#allocation2 + $0x228] sm:$0xff] %vm237_vm1, %v4578_v4  ;;  %309 = vst.msk [vmem:[#allocation2 + $0x230] sm:$0xff] %vm237_vm1, %v4578_v4  ;;  %v468_v38 = vmax.f32 %v436_v23, 0.0  ;;  %v3797_v48 = vunpack.c.l.bf16 %v3828_v25  ;;  %v3805_v14 = vunpack.c.l.bf16 %v3830_v59 }
  0x22   : > { %246 = vst.msk [vmem:[#allocation2 + $0x38] sm:$0x1] %vm241_vm2, %v4578_v4  ;;  %242 = vst.msk [vmem:[#allocation2 + $0x18] sm:$0x1] %vm241_vm2, %v4578_v4  ;;  %v401_v55 = vmul.f32 %v3794_v47, %v4809_v7 }
  0x23   : > { %250 = vst.msk [vmem:[#allocation2 + $0x58] sm:$0x1] %vm241_vm2, %v4578_v4  ;;  %254 = vst.msk [vmem:[#allocation2 + $0x78] sm:$0x1] %vm241_vm2, %v4578_v4 }
  0x24   : > { %258 = vst.msk [vmem:[#allocation2 + $0x98] sm:$0x1] %vm241_vm2, %v4578_v4  ;;  %262 = vst.msk [vmem:[#allocation2 + $0xb8] sm:$0x1] %vm241_vm2, %v4578_v4  ;;  %v440_v63 = vadd.f32 %v4824_v20, %v401_v55  ;;  %v3833_v55 = vld [vmem:[%s4804_s7 + $0x78] sm:$0xff]  }
  0x25   : > { %266 = vst.msk [vmem:[#allocation2 + $0xd8] sm:$0x1] %vm241_vm2, %v4578_v4  ;;  %270 = vst.msk [vmem:[#allocation2 + $0xf8] sm:$0x1] %vm241_vm2, %v4578_v4 }
  0x26   : > { %274 = vst.msk [vmem:[#allocation2 + $0x118] sm:$0x1] %vm241_vm2, %v4578_v4  ;;  %278 = vst.msk [vmem:[#allocation2 + $0x138] sm:$0x1] %vm241_vm2, %v4578_v4  ;;  %v472_v13 = vmax.f32 %v440_v63, 0.0  ;;  %v3818_v63 = vunpack.c.h.bf16 %v3833_v55 }
  0x27   : > { %282 = vst.msk [vmem:[#allocation2 + $0x158] sm:$0x1] %vm241_vm2, %v4578_v4  ;;  %286 = vst.msk [vmem:[#allocation2 + $0x178] sm:$0x1] %vm241_vm2, %v4578_v4 }
  0x28   : > { %290 = vst.msk [vmem:[#allocation2 + $0x198] sm:$0x1] %vm241_vm2, %v4578_v4  ;;  %294 = vst.msk [vmem:[#allocation2 + $0x1b8] sm:$0x1] %vm241_vm2, %v4578_v4 }
  0x29   : > { %298 = vst.msk [vmem:[#allocation2 + $0x1d8] sm:$0x1] %vm241_vm2, %v4578_v4  ;;  %302 = vst.msk [vmem:[#allocation2 + $0x1f8] sm:$0x1] %vm241_vm2, %v4578_v4 }
  0x2a   : > { %306 = vst.msk [vmem:[#allocation2 + $0x218] sm:$0x1] %vm241_vm2, %v4578_v4  ;;  %310 = vst.msk [vmem:[#allocation2 + $0x238] sm:$0x1] %vm241_vm2, %v4578_v4  ;;  %v394_v4 = vmul.f32 %v3781_v58, %v4809_v7  ;;  %v402_v58 = vmul.f32 %v3797_v48, %v4809_v7 }
  0x2b   : > { %486 = vst.msk [vmem:[#allocation2 + $0x28] sm:$0xff] %vm237_vm1, %v453_v43  ;;  %487 = vst.msk [vmem:[#allocation2 + $0x30] sm:$0xff] %vm237_vm1, %v454_v44  ;;  %v3793_v43 = vunpack.c.l.bf16 %v3827_v24  ;;  %v3829_v44 = vld [vmem:[%s4804_s7 + $0x58] sm:$0xff]  }
  0x2c   : > { %488 = vst.msk [vmem:[#allocation2 + $0x48] sm:$0xff] %vm237_vm1, %v455_v45  ;;  %489 = vst.msk [vmem:[#allocation2 + $0x50] sm:$0xff] %vm237_vm1, %v456_v49  ;;  %v433_v16 = vadd.f32 %v4824_v20, %v394_v4  ;;  %v399_v45 = vmul.f32 %v3790_v39, %v4809_v7  ;;  %v3801_v56 = vunpack.c.l.bf16 %v3829_v44  ;;  %v441_v4 = vadd.f32 %v4824_v20, %v402_v58 }
  0x2d   : > { %490 = vst.msk [vmem:[#allocation2 + $0x68] sm:$0xff] %vm237_vm1, %v457_v50  ;;  %491 = vst.msk [vmem:[#allocation2 + $0x70] sm:$0xff] %vm237_vm1, %v458_v51  ;;  %v437_v51 = vadd.f32 %v4824_v20, %v398_v42  ;;  %v400_v54 = vmul.f32 %v3793_v43, %v4809_v7  ;;  %v3802_v6 = vunpack.c.h.bf16 %v3829_v44 }
  0x2e   : > { %492 = vst.msk [vmem:[#allocation2 + $0x88] sm:$0xff] %vm237_vm1, %v459_v52  ;;  %493 = vst.msk [vmem:[#allocation2 + $0x90] sm:$0xff] %vm237_vm1, %v460_v53  ;;  %v465_v30 = vmax.f32 %v433_v16, 0.0  ;;  %v3798_v52 = vunpack.c.h.bf16 %v3828_v25  ;;  %v4903_v53 = vld [vmem:[%s5517_s3 + $0x8] sm:$0xf]  ;;  %v404_v8 = vmul.f32 %v3801_v56, %v4809_v7  ;;  %v473_v16 = vmax.f32 %v441_v4, 0.0 }
  0x2f   : > { %494 = vst.msk [vmem:[#allocation2 + $0xa8] sm:$0xff] %vm237_vm1, %v461_v19  ;;  %495 = vst.msk [vmem:[#allocation2 + $0xb0] sm:$0xff] %vm237_vm1, %v462_v21  ;;  %v469_v57 = vmax.f32 %v437_v51, 0.0  ;;  %v439_v62 = vadd.f32 %v4824_v20, %v400_v54  ;;  %v405_v18 = vmul.f32 %v3802_v6, %v4809_v7  ;;  %v3806_v21 = vunpack.c.h.bf16 %v3830_v59 }
  0x30   : > { %496 = vst.msk [vmem:[#allocation2 + $0xc8] sm:$0xff] %vm237_vm1, %v463_v22  ;;  %497 = vst.msk [vmem:[#allocation2 + $0xd0] sm:$0xff] %vm237_vm1, %v464_v29  ;;  %v443_v19 = vadd.f32 %v4824_v20, %v404_v8  ;;  %v3832_v22 = vld [vmem:[%s4804_s7 + $0x70] sm:$0xff]   ;;  %v406_v25 = vmul.f32 %v3805_v14, %v4809_v7 }
  0x31   : > { %498 = vst.msk [vmem:[#allocation2 + $0xe8] sm:$0xff] %vm237_vm1, %v465_v30  ;;  %499 = vst.msk [vmem:[#allocation2 + $0xf0] sm:$0xff] %vm237_vm1, %v466_v31  ;;  %v471_v12 = vmax.f32 %v439_v62, 0.0  ;;  %v407_v29 = vmul.f32 %v3806_v21, %v4809_v7  ;;  %v3810_v30 = vunpack.c.h.bf16 %v3831_v15  ;;  %v3817_v62 = vunpack.c.l.bf16 %v3833_v55 }
  0x32   : > { %v569_v26 = vld [vmem:[#allocation2 + $0x28] sm:$0xff]  ;;  %v570_v27 = vld [vmem:[#allocation2 + $0x30] sm:$0xff]  ;;  %500 = vst.msk [vmem:[#allocation2 + $0x108] sm:$0xff] %vm237_vm1, %v467_v37  ;;  %501 = vst.msk [vmem:[#allocation2 + $0x110] sm:$0xff] %vm237_vm1, %v468_v38 }
  0x33   : > { %v1632_v28 = vld [vmem:[#allocation2 + $0x48] sm:$0xff]  ;;  %v600_v33 = vpack.c.bf16 %v570_v27, %v569_v26  ;;  %v1633_v34 = vld [vmem:[#allocation2 + $0x50] sm:$0xff]  ;;  %502 = vst.msk [vmem:[#allocation2 + $0x128] sm:$0xff] %vm237_vm1, %v469_v57  ;;  %504 = vst.msk [vmem:[#allocation2 + $0x148] sm:$0xff] %vm237_vm1, %v471_v12  ;;  %v3809_v26 = vunpack.c.l.bf16 %v3831_v15  ;;  %v444_v27 = vadd.f32 %v4824_v20, %v405_v18  ;;  %v446_v39 = vadd.f32 %v4824_v20, %v407_v29 }
  0x34   : > { %v573_v35 = vld [vmem:[#allocation2 + $0x68] sm:$0xff]  ;;  %v574_v36 = vld [vmem:[#allocation2 + $0x70] sm:$0xff]  ;;  %v4877_v40 = vpack.c.bf16 %v1633_v34, %v1632_v28  ;;  %505 = vst.msk [vmem:[#allocation2 + $0x150] sm:$0xff] %vm237_vm1, %v472_v13  ;;  %506 = vst.msk [vmem:[#allocation2 + $0x168] sm:$0xff] %vm237_vm1, %v473_v16  ;;  %v475_v28 = vmax.f32 %v443_v19, 0.0  ;;  %v409_v42 = vmul.f32 %v3810_v30, %v4809_v7 }
  0x35   : > { %v4879_v41 = vpack.c.bf16 %v574_v36, %v573_v35  ;;  %3990 = vmatmul.mubr.msk.bf16.vlgmr.msra.gmra.mrb[0].mxu1 %vm237_vm1, %v600_v33  ;;  %4125 = vmatprep.mubr.msk.bf16.mxu0 %vm237_vm1, %v600_v33  ;;  %v1636_v49 = vld [vmem:[#allocation2 + $0x88] sm:$0xff]  ;;  %v1637_v50 = vld [vmem:[#allocation2 + $0x90] sm:$0xff]  ;;  %v445_v33 = vadd.f32 %v4824_v20, %v406_v25  ;;  %v408_v34 = vmul.f32 %v3809_v26, %v4809_v7  ;;  %v3813_v35 = vunpack.c.l.bf16 %v3832_v22  ;;  %v5014_v26 = vld [vmem:[%s5517_s3 + $0x1c] sm:$0xf] }
  0x36   : > { %4022 = vmatpush3.bf16.msra.mxu1 %v4813_v9  ;;  %4126 = vmatmul.mubr.msk.bf16.vlgmr.msra.gmra.mrb[0].mxu0 %vm237_vm1, %v4877_v40  ;;  %v438_v9 = vadd.f32 %v4824_v20, %v399_v45  ;;  %v4918_v60 = vpack.c.bf16 %v1637_v50, %v1636_v49  ;;  %v577_v0 = vld [vmem:[#allocation2 + $0xa8] sm:$0xff]  ;;  %v578_v2 = vld [vmem:[#allocation2 + $0xb0] sm:$0xff]  ;;  %v3814_v36 = vunpack.c.h.bf16 %v3832_v22  ;;  %v476_v38 = vmax.f32 %v444_v27, 0.0  ;;  %508 = vst.msk [vmem:[#allocation2 + $0x188] sm:$0xff] %vm237_vm1, %v475_v28 }
  0x37   : > { %4158 = vmatpush3.bf16.msra.mxu0 %v4817_v11  ;;  %3993 = vmatprep.mubr.msk.bf16.mxu1 %vm237_vm1, %v4877_v40  ;;  %v403_v11 = vmul.f32 %v3798_v52, %v4809_v7  ;;  %v4928_v10 = vpack.c.bf16 %v578_v2, %v577_v0  ;;  %v1640_v23 = vld [vmem:[#allocation2 + $0xc8] sm:$0xff]  ;;  %v1641_v24 = vld [vmem:[#allocation2 + $0xd0] sm:$0xff]  ;;  %v477_v43 = vmax.f32 %v445_v33, 0.0  ;;  %v447_v44 = vadd.f32 %v4824_v20, %v408_v34 }
  0x38   : > { %4129 = vmatprep.mubr.msk.bf16.mxu0 %vm237_vm1, %v4879_v41  ;;  %4558 = vmatprep.subr.msk.bf16.mxu0 %vm665_vm0, %v4894_v46  ;;  %v470_v61 = vmax.f32 %v438_v9, 0.0  ;;  %v581_v31 = vld [vmem:[#allocation2 + $0xe8] sm:$0xff]  ;;  %v582_v32 = vld [vmem:[#allocation2 + $0xf0] sm:$0xff]  ;;  %v4952_v37 = vpack.c.bf16 %v1641_v24, %v1640_v23  ;;  %v410_v45 = vmul.f32 %v3813_v35, %v4809_v7  ;;  %v411_v47 = vmul.f32 %v3814_v36, %v4809_v7 }
  0x39   : > { %4553 = vmatprep.subr.msk.bf16.mxu1 %vm665_vm0, %v4903_v53  ;;  %v442_v5 = vadd.f32 %v4824_v20, %v403_v11  ;;  %v4960_v48 = vpack.c.bf16 %v582_v32, %v581_v31  ;;  %509 = vst.msk [vmem:[#allocation2 + $0x190] sm:$0xff] %vm237_vm1, %v476_v38  ;;  %v478_v49 = vmax.f32 %v446_v39, 0.0  ;;  %v448_v50 = vadd.f32 %v4824_v20, %v409_v42  ;;  %v1644_v58 = vld [vmem:[#allocation2 + $0x108] sm:$0xff]  ;;  %v1645_v11 = vld [vmem:[#allocation2 + $0x110] sm:$0xff] }
  0x3a   : > { %503 = vst.msk [vmem:[#allocation2 + $0x130] sm:$0xff] %vm237_vm1, %v470_v61  ;;  %510 = vst.msk [vmem:[#allocation2 + $0x1a8] sm:$0xff] %vm237_vm1, %v477_v43  ;;  %v479_v51 = vmax.f32 %v447_v44, 0.0  ;;  %v449_v52 = vadd.f32 %v4824_v20, %v410_v45  ;;  %v450_v9 = vadd.f32 %v4824_v20, %v411_v47  ;;  %v1924_v59 = vld [vmem:[#allocation2 + $0x29] sm:$0xff]  ;;  %v1925_v61 = vld [vmem:[#allocation2 + $0x31] sm:$0xff]  ;;  %v4981_v0 = vpack.c.bf16 %v1645_v11, %v1644_v58 }
  0x3b   : > { %v474_v17 = vmax.f32 %v442_v5, 0.0  ;;  %511 = vst.msk [vmem:[#allocation2 + $0x1b0] sm:$0xff] %vm237_vm1, %v478_v49  ;;  %v480_v54 = vmax.f32 %v448_v50, 0.0  ;;  %v412_v2 = vmul.f32 %v3817_v62, %v4809_v7  ;;  %v4984_v4 = vpack.c.bf16 %v1925_v61, %v1924_v59  ;;  %v585_v12 = vld [vmem:[#allocation2 + $0x128] sm:$0xff]  ;;  %v1929_v21 = vld [vmem:[#allocation2 + $0x71] sm:$0xff] }
  0x3c   : > { %512 = vst.msk [vmem:[#allocation2 + $0x1c8] sm:$0xff] %vm237_vm1, %v479_v51  ;;  %v481_v56 = vmax.f32 %v449_v52, 0.0  ;;  %v482_v57 = vmax.f32 %v450_v9, 0.0  ;;  %v413_v5 = vmul.f32 %v3818_v63, %v4809_v7  ;;  %v1926_v14 = vld [vmem:[#allocation2 + $0x49] sm:$0xff]  ;;  %v1927_v7 = vld [vmem:[#allocation2 + $0x51] sm:$0xff]  ;;  %v2318_v25 = vsel %vm665_vm0, %v4894_v46, 0 }
  0x3d   : > { %3994 = vmatmul.mubr.msk.bf16.gmra.mrb[4].mxu1 %vm237_vm1, %v4879_v41  ;;  %507 = vst.msk [vmem:[#allocation2 + $0x170] sm:$0xff] %vm237_vm1, %v474_v17  ;;  %513 = vst.msk [vmem:[#allocation2 + $0x1d0] sm:$0xff] %vm237_vm1, %v480_v54  ;;  %v451_v6 = vadd.f32 %v4824_v20, %v412_v2  ;;  %v587_v16 = vld [vmem:[#allocation2 + $0x148] sm:$0xff]  ;;  %v588_v17 = vld [vmem:[#allocation2 + $0x150] sm:$0xff]  ;;  %v5001_v22 = vpack.c.bf16 %v1927_v7, %v1926_v14 }
  0x3e   : > { %4130 = vmatmul.mubr.msk.bf16.gmra.mrb[4].mxu0 %vm237_vm1, %v4918_v60  ;;  %3997 = vmatprep.mubr.msk.bf16.mxu1 %vm237_vm1, %v4918_v60  ;;  %514 = vst.msk [vmem:[#allocation2 + $0x1e8] sm:$0xff] %vm237_vm1, %v481_v56  ;;  %515 = vst.msk [vmem:[#allocation2 + $0x1f0] sm:$0xff] %vm237_vm1, %v482_v57  ;;  %v452_v8 = vadd.f32 %v4824_v20, %v413_v5  ;;  %v1928_v19 = vld [vmem:[#allocation2 + $0x69] sm:$0xff]  ;;  %v5003_v23 = vpack.c.bf16 %v588_v17, %v587_v16  ;;  %v1931_v46 = vld [vmem:[#allocation2 + $0x91] sm:$0xff] }
  0x3f   : > { %4133 = vmatprep.mubr.msk.bf16.mxu0 %vm237_vm1, %v4928_v10  ;;  %v483_v15 = vmax.f32 %v451_v6, 0.0  ;;  %v5005_v24 = vpack.c.bf16 %v1929_v21, %v1928_v19  ;;  %v589_v27 = vld [vmem:[#allocation2 + $0x168] sm:$0xff]  ;;  %v1933_v33 = vld [vmem:[#allocation2 + $0xb1] sm:$0xff]  ;;  %v1141_v21 = vsel %vm665_vm0, %v4903_v53, 0 }
  0x40   : > { %v484_v18 = vmax.f32 %v452_v8, 0.0  ;;  %v1930_v29 = vld [vmem:[#allocation2 + $0x89] sm:$0xff]  ;;  %v1935_v44 = vld [vmem:[#allocation2 + $0xd1] sm:$0xff] }
  0x41   : > { %v586_v13 = vld [vmem:[#allocation2 + $0x130] sm:$0xff]  ;;  %516 = vst.msk [vmem:[#allocation2 + $0x208] sm:$0xff] %vm237_vm1, %v483_v15  ;;  %v591_v30 = vld [vmem:[#allocation2 + $0x188] sm:$0xff]  ;;  %v5026_v35 = vpack.c.bf16 %v1931_v46, %v1930_v29 }
  0x42   : > { %v4998_v20 = vpack.c.bf16 %v586_v13, %v585_v12  ;;  %517 = vst.msk [vmem:[#allocation2 + $0x210] sm:$0xff] %vm237_vm1, %v484_v18  ;;  %v592_v31 = vld [vmem:[#allocation2 + $0x190] sm:$0xff]  ;;  %v593_v39 = vld [vmem:[#allocation2 + $0x1a8] sm:$0xff] }
  0x43   : > { %v1932_v32 = vld [vmem:[#allocation2 + $0xa9] sm:$0xff]  ;;  %v5028_v36 = vpack.c.bf16 %v592_v31, %v591_v30  ;;  %v1937_v50 = vld [vmem:[#allocation2 + $0xf1] sm:$0xff] }
  0x44   : > { %v590_v28 = vld [vmem:[#allocation2 + $0x170] sm:$0xff]  ;;  %v5030_v38 = vpack.c.bf16 %v1933_v33, %v1932_v32  ;;  %v595_v45 = vld [vmem:[#allocation2 + $0x1c8] sm:$0xff] }
  0x45   : > { %3998 = vmatmul.mubr.msk.bf16.gmra.mrb[8].mxu1 %vm237_vm1, %v4928_v10  ;;  %v5024_v34 = vpack.c.bf16 %v590_v28, %v589_v27  ;;  %v594_v42 = vld [vmem:[#allocation2 + $0x1b0] sm:$0xff]  ;;  %v597_v55 = vld [vmem:[#allocation2 + $0x1e8] sm:$0xff] }
  0x46   : > { %4134 = vmatmul.mubr.msk.bf16.gmra.mrb[8].mxu0 %vm237_vm1, %v4952_v37  ;;  %4001 = vmatprep.mubr.msk.bf16.mxu1 %vm237_vm1, %v4952_v37  ;;  %v1934_v43 = vld [vmem:[#allocation2 + $0xc9] sm:$0xff]  ;;  %v5040_v51 = vpack.c.bf16 %v594_v42, %v593_v39  ;;  %v1939_v11 = vld [vmem:[#allocation2 + $0x111] sm:$0xff] }
  0x47   : > { %4137 = vmatprep.mubr.msk.bf16.mxu0 %vm237_vm1, %v4960_v48  ;;  %v596_v47 = vld [vmem:[#allocation2 + $0x1d0] sm:$0xff]  ;;  %v5042_v52 = vpack.c.bf16 %v1935_v44, %v1934_v43  ;;  %v518_v57 = vld [vmem:[#allocation2 + $0x7] sm:$0xff] }
  0x48   : > { %v1936_v49 = vld [vmem:[#allocation2 + $0xe9] sm:$0xff]  ;;  %v5044_v9 = vpack.c.bf16 %v596_v47, %v595_v45  ;;  %v1941_v62 = vld [vmem:[#allocation2 + $0x131] sm:$0xff] }
  0x49   : > { %v5046_v54 = vpack.c.bf16 %v1937_v50, %v1936_v49  ;;  %v598_v56 = vld [vmem:[#allocation2 + $0x1f0] sm:$0xff]  ;;  %v520_v8 = vld [vmem:[#allocation2 + $0x27] sm:$0xff] }
  0x4a   : > { %v1938_v58 = vld [vmem:[#allocation2 + $0x109] sm:$0xff]  ;;  %v5056_v63 = vpack.c.bf16 %v598_v56, %v597_v55  ;;  %v1943_v14 = vld [vmem:[#allocation2 + $0x151] sm:$0xff] }
  0x4b   : > { %v519_v59 = vld [vmem:[#allocation2 + $0xf] sm:$0xff]  ;;  %v5058_v2 = vpack.c.bf16 %v1939_v11, %v1938_v58  ;;  %v522_v15 = vld [vmem:[#allocation2 + $0x47] sm:$0xff] }
  0x4c   : > { %v1940_v61 = vld [vmem:[#allocation2 + $0x129] sm:$0xff]  ;;  %v550_v5 = vpack.c.bf16 %v519_v59, %v518_v57  ;;  %v1945_v17 = vld [vmem:[#allocation2 + $0x171] sm:$0xff] }
  0x4d   : > { %4002 = vmatmul.mubr.msk.bf16.gmra.mrb[12].mxu1 %vm237_vm1, %v4960_v48  ;;  %v5060_v6 = vpack.c.bf16 %v1941_v62, %v1940_v61  ;;  %v521_v12 = vld [vmem:[#allocation2 + $0x2f] sm:$0xff]  ;;  %v524_v29 = vld [vmem:[#allocation2 + $0x67] sm:$0xff] }
  0x4e   : > { %4138 = vmatmul.mubr.msk.bf16.gmra.mrb[12].mxu0 %vm237_vm1, %v4981_v0  ;;  %4005 = vmatprep.mubr.msk.bf16.mxu1 %vm237_vm1, %v4981_v0  ;;  %v1942_v13 = vld [vmem:[#allocation2 + $0x149] sm:$0xff]  ;;  %v5069_v18 = vpack.c.bf16 %v521_v12, %v520_v8  ;;  %v1947_v31 = vld [vmem:[#allocation2 + $0x191] sm:$0xff] }
  0x4f   : > { %4159 = vmatprep.mubr.msk.bf16.mxu0 %vm237_vm1, %v4984_v4  ;;  %v523_v7 = vld [vmem:[#allocation2 + $0x4f] sm:$0xff]  ;;  %v5071_v19 = vpack.c.bf16 %v1943_v14, %v1942_v13  ;;  %v526_v30 = vld [vmem:[#allocation2 + $0x87] sm:$0xff] }
  0x50   : > { %v1944_v16 = vld [vmem:[#allocation2 + $0x169] sm:$0xff]  ;;  %v1949_v39 = vld [vmem:[#allocation2 + $0x1b1] sm:$0xff] }
  0x51   : > { %v5077_v27 = vpack.c.bf16 %v1945_v17, %v1944_v16  ;;  %v5084_v28 = vld [vmem:[%s5517_s3 + $0xc] sm:$0xf]  ;;  %v1951_v56 = vld [vmem:[#allocation2 + $0x1d1] sm:$0xff] }
  0x52   : > { %v525_v46 = vld [vmem:[#allocation2 + $0x6f] sm:$0xff]  ;;  %v528_v47 = vld [vmem:[#allocation2 + $0xa7] sm:$0xff] }
  0x53   : > { %v1946_v53 = vld [vmem:[#allocation2 + $0x189] sm:$0xff]  ;;  %v5094_v42 = vpack.c.bf16 %v525_v46, %v524_v29  ;;  %v1953_v11 = vld [vmem:[#allocation2 + $0x1f1] sm:$0xff] }
  0x54   : > { %v527_v32 = vld [vmem:[#allocation2 + $0x8f] sm:$0xff]  ;;  %v5096_v43 = vpack.c.bf16 %v1947_v31, %v1946_v53  ;;  %v530_v50 = vld [vmem:[#allocation2 + $0xc7] sm:$0xff] }
  0x55   : > { %4006 = vmatmul.mubr.msk.bf16.gmra.mrb[16].mxu1 %vm237_vm1, %v4998_v20  ;;  %v1948_v33 = vld [vmem:[#allocation2 + $0x1a9] sm:$0xff]  ;;  %v5098_v44 = vpack.c.bf16 %v527_v32, %v526_v30 }
  0x56   : > { %4160 = vmatmul.mubr.msk.bf16.vlgmr.msra.gmra.mrb[0].mxu0 %vm237_vm1, %v5001_v22  ;;  %4009 = vmatprep.mubr.msk.bf16.mxu1 %vm237_vm1, %v5003_v23  ;;  %v5100_v45 = vpack.c.bf16 %v1949_v39, %v1948_v33  ;;  %v529_v49 = vld [vmem:[#allocation2 + $0xaf] sm:$0xff]  ;;  %v532_v8 = vld [vmem:[#allocation2 + $0xe7] sm:$0xff]  ;;  %v2612_v33 = vsel %vm665_vm0, %v5014_v26, 0  ;;  %v3670_v39 = vld [vmem:[%s5517_s3 + $0x20] sm:$0xf] }
  0x57   : > { %4192 = vmatpush3.bf16.msra.mxu0 %v2318_v25  ;;  %4163 = vmatprep.mubr.msk.bf16.mxu0 %vm237_vm1, %v5005_v24  ;;  %v5075_v25 = vpack.c.bf16 %v523_v7, %v522_v15  ;;  %v1950_v55 = vld [vmem:[#allocation2 + $0x1c9] sm:$0xff]  ;;  %v5110_v59 = vpack.c.bf16 %v529_v49, %v528_v47  ;;  %v1955_v15 = vld [vmem:[#allocation2 + $0x211] sm:$0xff] }
  0x58   : > { %4559 = vmatprep.subr.msk.bf16.mxu0 %vm665_vm0, %v5014_v26  ;;  %v531_v57 = vld [vmem:[#allocation2 + $0xcf] sm:$0xff]  ;;  %v5112_v61 = vpack.c.bf16 %v1951_v56, %v1950_v55  ;;  %v534_v13 = vld [vmem:[#allocation2 + $0x107] sm:$0xff] }
  0x59   : > { %v1952_v58 = vld [vmem:[#allocation2 + $0x1e9] sm:$0xff]  ;;  %v5114_v62 = vpack.c.bf16 %v531_v57, %v530_v50 }
  0x5a   : > { %v533_v12 = vld [vmem:[#allocation2 + $0xef] sm:$0xff]  ;;  %v536_v29 = vld [vmem:[#allocation2 + $0x127] sm:$0xff] }
  0x5b   : > { %v1954_v14 = vld [vmem:[#allocation2 + $0x209] sm:$0xff]  ;;  %v5126_v16 = vpack.c.bf16 %v533_v12, %v532_v8 }
  0x5c   : > { %v535_v7 = vld [vmem:[#allocation2 + $0x10f] sm:$0xff]  ;;  %v5128_v17 = vpack.c.bf16 %v1955_v15, %v1954_v14  ;;  %v538_v30 = vld [vmem:[#allocation2 + $0x147] sm:$0xff] }
  0x5d   : > { %4010 = vmatmul.mubr.msk.bf16.gmra.mrb[20].mxu1 %vm237_vm1, %v5024_v34  ;;  %v537_v46 = vld [vmem:[#allocation2 + $0x12f] sm:$0xff]  ;;  %v540_v47 = vld [vmem:[#allocation2 + $0x167] sm:$0xff] }
  0x5e   : > { %4164 = vmatmul.mubr.msk.bf16.gmra.mrb[4].mxu0 %vm237_vm1, %v5026_v35  ;;  %4013 = vmatprep.mubr.msk.bf16.mxu1 %vm237_vm1, %v5028_v36  ;;  %v539_v53 = vld [vmem:[#allocation2 + $0x14f] sm:$0xff]  ;;  %v5140_v31 = vpack.c.bf16 %v537_v46, %v536_v29  ;;  %v542_v26 = vld [vmem:[#allocation2 + $0x187] sm:$0xff] }
  0x5f   : > { %4167 = vmatprep.mubr.msk.bf16.mxu0 %vm237_vm1, %v5030_v38  ;;  %v5142_v32 = vpack.c.bf16 %v539_v53, %v538_v30  ;;  %v541_v49 = vld [vmem:[#allocation2 + $0x16f] sm:$0xff]  ;;  %v544_v57 = vld [vmem:[#allocation2 + $0x1a7] sm:$0xff]  ;;  %v1435_v53 = vsel %vm665_vm0, %v5084_v28, 0 }
  0x60   : > { %v543_v50 = vld [vmem:[#allocation2 + $0x18f] sm:$0xff]  ;;  %v5158_v55 = vpack.c.bf16 %v541_v49, %v540_v47  ;;  %v548_v14 = vld [vmem:[#allocation2 + $0x1e7] sm:$0xff] }
  0x61   : > { %v5160_v56 = vpack.c.bf16 %v543_v50, %v542_v26  ;;  %v547_v8 = vld [vmem:[#allocation2 + $0x1cf] sm:$0xff]  ;;  %v2906_v26 = vsel %vm665_vm0, %v3670_v39, 0 }
  0x62   : > { %v549_v15 = vld [vmem:[#allocation2 + $0x1ef] sm:$0xff] }
  0x63   : > { %v1043_v29 = vld [vmem:[#allocation2 + $0x11] sm:$0xff]  ;;  %v5182_v46 = vpack.c.bf16 %v549_v15, %v548_v14 }
  0x64   : > { %v2250_v47 = vld [vmem:[#allocation2 + $0x22f] sm:$0xff] }
  0x65   : > { %4014 = vmatmul.mubr.msk.bf16.gmra.mrb[24].mxu1 %vm237_vm1, %v5040_v51 }
  0x66   : > { %4168 = vmatmul.mubr.msk.bf16.gmra.mrb[8].mxu0 %vm237_vm1, %v5042_v52  ;;  %4017 = vmatprep.mubr.msk.bf16.mxu1 %vm237_vm1, %v5044_v9 }
  0x67   : > { %4171 = vmatprep.mubr.msk.bf16.mxu0 %vm237_vm1, %v5046_v54 }
  0x6d   : > { %4018 = vmatmul.mubr.msk.bf16.gmra.mrb[28].mxu1 %vm237_vm1, %v5056_v63 }
  0x6e   : > { %4172 = vmatmul.mubr.msk.bf16.gmra.mrb[12].mxu0 %vm237_vm1, %v5058_v2  ;;  %4023 = vmatprep.mubr.msk.bf16.mxu1 %vm237_vm1, %v550_v5  ;;  %v5116_v5 = vpack.c.bf16 %v1953_v11, %v1952_v58  ;;  %v545_v58 = vld [vmem:[#allocation2 + $0x1af] sm:$0xff]  ;;  %v546_v11 = vld [vmem:[#allocation2 + $0x1c7] sm:$0xff] }
  0x6f   : > { %4175 = vmatprep.mubr.msk.bf16.mxu0 %vm237_vm1, %v5060_v6  ;;  %v5170_v12 = vpack.c.bf16 %v545_v58, %v544_v57 }
  0x75   : > { %4024 = vmatmul.mubr.msk.bf16.vlgmr.msra.gmra.mrb[0].mxu1 %vm237_vm1, %v5069_v18 }
  0x76   : > { %4056 = vmatpush3.bf16.msra.mxu1 %v1141_v21  ;;  %4176 = vmatmul.mubr.msk.bf16.gmra.mrb[16].mxu0 %vm237_vm1, %v5071_v19  ;;  %v5130_v21 = vpack.c.bf16 %v535_v7, %v534_v13  ;;  %v5172_v13 = vpack.c.bf16 %v547_v8, %v546_v11  ;;  %v1042_v7 = vld [vmem:[#allocation2 + $0x9] sm:$0xff] }
  0x77   : > { %4027 = vmatprep.mubr.msk.bf16.mxu1 %vm237_vm1, %v5075_v25  ;;  %4179 = vmatprep.mubr.msk.bf16.mxu0 %vm237_vm1, %v5077_v27  ;;  %v1074_v30 = vpack.c.bf16 %v1043_v29, %v1042_v7 }
  0x78   : > { %4554 = vmatprep.subr.msk.bf16.mxu1 %vm665_vm0, %v5084_v28  ;;  %v2248_v28 = vld [vmem:[#allocation2 + $0x20f] sm:$0xff] }
  0x7d   : > { %4028 = vmatmul.mubr.msk.bf16.gmra.mrb[4].mxu1 %vm237_vm1, %v5094_v42 }
  0x7e   : > { %4180 = vmatmul.mubr.msk.bf16.gmra.mrb[20].mxu0 %vm237_vm1, %v5096_v43  ;;  %4031 = vmatprep.mubr.msk.bf16.mxu1 %vm237_vm1, %v5098_v44 }
  0x7f   : > { %4183 = vmatprep.mubr.msk.bf16.mxu0 %vm237_vm1, %v5100_v45 }
  0x85   : > { %4032 = vmatmul.mubr.msk.bf16.gmra.mrb[8].mxu1 %vm237_vm1, %v5110_v59 }
  0x86   : > { %4184 = vmatmul.mubr.msk.bf16.gmra.mrb[24].mxu0 %vm237_vm1, %v5112_v61  ;;  %4035 = vmatprep.mubr.msk.bf16.mxu1 %vm237_vm1, %v5114_v62 }
  0x87   : > { %4187 = vmatprep.mubr.msk.bf16.mxu0 %vm237_vm1, %v5116_v5 }
  0x8d   : > { %4036 = vmatmul.mubr.msk.bf16.gmra.mrb[12].mxu1 %vm237_vm1, %v5126_v16 }
  0x8e   : > { %4188 = vmatmul.mubr.msk.bf16.gmra.mrb[28].mxu0 %vm237_vm1, %v5128_v17  ;;  %4039 = vmatprep.mubr.msk.bf16.mxu1 %vm237_vm1, %v5130_v21 }
  0x8f   : > { %4193 = vmatprep.mubr.msk.bf16.mxu0 %vm237_vm1, %v5075_v25 }
  0x95   : > { %4040 = vmatmul.mubr.msk.bf16.gmra.mrb[16].mxu1 %vm237_vm1, %v5140_v31 }
  0x96   : > { %4194 = vmatmul.mubr.msk.bf16.vlgmr.msra.gmra.mrb[0].mxu0 %vm237_vm1, %v5094_v42  ;;  %4043 = vmatprep.mubr.msk.bf16.mxu1 %vm237_vm1, %v5142_v32 }
  0x97   : > { %4226 = vmatpush3.bf16.msra.mxu0 %v2612_v33  ;;  %4197 = vmatprep.mubr.msk.bf16.mxu0 %vm237_vm1, %v5098_v44 }
  0x98   : > { %4560 = vmatprep.subr.msk.bf16.mxu0 %vm665_vm0, %v3670_v39 }
  0x9d   : > { %4044 = vmatmul.mubr.msk.bf16.gmra.mrb[20].mxu1 %vm237_vm1, %v5158_v55 }
  0x9e   : > { %4198 = vmatmul.mubr.msk.bf16.gmra.mrb[4].mxu0 %vm237_vm1, %v5110_v59  ;;  %4047 = vmatprep.mubr.msk.bf16.mxu1 %vm237_vm1, %v5160_v56 }
  0x9f   : > { %4201 = vmatprep.mubr.msk.bf16.mxu0 %vm237_vm1, %v5114_v62 }
  0xa5   : > { %4048 = vmatmul.mubr.msk.bf16.gmra.mrb[24].mxu1 %vm237_vm1, %v5170_v12 }
  0xa6   : > { %4202 = vmatmul.mubr.msk.bf16.gmra.mrb[8].mxu0 %vm237_vm1, %v5126_v16  ;;  %4051 = vmatprep.mubr.msk.bf16.mxu1 %vm237_vm1, %v5172_v13 }
  0xa7   : > { %4205 = vmatprep.mubr.msk.bf16.mxu0 %vm237_vm1, %v5130_v21 }
  0xad   : > { %4052 = vmatmul.mubr.msk.bf16.gmra.mrb[28].mxu1 %vm237_vm1, %v5182_v46 }
  0xae   : > { %4206 = vmatmul.mubr.msk.bf16.gmra.mrb[12].mxu0 %vm237_vm1, %v5140_v31  ;;  %4057 = vmatprep.mubr.msk.bf16.mxu1 %vm237_vm1, %v1074_v30 }
  0xaf   : > { %4209 = vmatprep.mubr.msk.bf16.mxu0 %vm237_vm1, %v5142_v32 }
  0xb5   : > { %4058 = vmatmul.mubr.msk.bf16.vlgmr.msra.gmra.mrb[0].mxu1 %vm237_vm1, %v4984_v4  ;;  %v2247_v4 = vld [vmem:[#allocation2 + $0x207] sm:$0xff] }
  0xb6   : > { %4090 = vmatpush3.bf16.msra.mxu1 %v1435_v53  ;;  %4210 = vmatmul.mubr.msk.bf16.gmra.mrb[16].mxu0 %vm237_vm1, %v5158_v55  ;;  %v5211_v33 = vpack.c.bf16 %v2248_v28, %v2247_v4 }
  0xb7   : > { %4061 = vmatprep.mubr.msk.bf16.mxu1 %vm237_vm1, %v5001_v22  ;;  %4213 = vmatprep.mubr.msk.bf16.mxu0 %vm237_vm1, %v5160_v56 }
  0xb8   : > { %4556 = vmatprep.subr.msk.bf16.mxu1 %vm665_vm0, %v4623_v1  ;;  %v2249_v1 = vld [vmem:[#allocation2 + $0x227] sm:$0xff] }
  0xb9   : > { %v2266_v49 = vpack.c.bf16 %v2250_v47, %v2249_v1 }
  0xbd   : > { %4062 = vmatmul.mubr.msk.bf16.gmra.mrb[4].mxu1 %vm237_vm1, %v5005_v24 }
  0xbe   : > { %4214 = vmatmul.mubr.msk.bf16.gmra.mrb[20].mxu0 %vm237_vm1, %v5170_v12  ;;  %4065 = vmatprep.mubr.msk.bf16.mxu1 %vm237_vm1, %v5026_v35 }
  0xbf   : > { %4217 = vmatprep.mubr.msk.bf16.mxu0 %vm237_vm1, %v5172_v13 }
  0xc5   : > { %4066 = vmatmul.mubr.msk.bf16.gmra.mrb[8].mxu1 %vm237_vm1, %v5030_v38 }
  0xc6   : > { %4218 = vmatmul.mubr.msk.bf16.gmra.mrb[24].mxu0 %vm237_vm1, %v5182_v46  ;;  %4069 = vmatprep.mubr.msk.bf16.mxu1 %vm237_vm1, %v5042_v52 }
  0xc7   : > { %4221 = vmatprep.mubr.msk.bf16.mxu0 %vm237_vm1, %v5211_v33 }
  0xcd   : > { %4070 = vmatmul.mubr.msk.bf16.gmra.mrb[12].mxu1 %vm237_vm1, %v5046_v54 }
  0xce   : > { %4222 = vmatmul.mubr.msk.bf16.gmra.mrb[28].mxu0 %vm237_vm1, %v2266_v49  ;;  %4073 = vmatprep.mubr.msk.bf16.mxu1 %vm237_vm1, %v5058_v2 }
  0xcf   : > { %4227 = vmatprep.mubr.msk.bf16.mxu0 %vm237_vm1, %v4877_v40  ;;  %v2542_v40 = vld [vmem:[#allocation2 + $0x210] sm:$0xff] }
  0xd5   : > { %4074 = vmatmul.mubr.msk.bf16.gmra.mrb[16].mxu1 %vm237_vm1, %v5060_v6 }
  0xd6   : > { %4228 = vmatmul.mubr.msk.bf16.vlgmr.msra.gmra.mrb[0].mxu0 %vm237_vm1, %v4879_v41  ;;  %4077 = vmatprep.mubr.msk.bf16.mxu1 %vm237_vm1, %v5071_v19 }
  0xd7   : > { %4260 = vmatpush3.bf16.msra.mxu0 %v2906_v26  ;;  %4231 = vmatprep.mubr.msk.bf16.mxu0 %vm237_vm1, %v4918_v60  ;;  %v2543_v60 = vld [vmem:[#allocation2 + $0x228] sm:$0xff] }
  0xdd   : > { %4078 = vmatmul.mubr.msk.bf16.gmra.mrb[20].mxu1 %vm237_vm1, %v5077_v27 }
  0xde   : > { %4232 = vmatmul.mubr.msk.bf16.gmra.mrb[4].mxu0 %vm237_vm1, %v4928_v10  ;;  %4081 = vmatprep.mubr.msk.bf16.mxu1 %vm237_vm1, %v5096_v43  ;;  %v2544_v10 = vld [vmem:[#allocation2 + $0x230] sm:$0xff] }
  0xdf   : > { %4235 = vmatprep.mubr.msk.bf16.mxu0 %vm237_vm1, %v4952_v37  ;;  %v2560_v37 = vpack.c.bf16 %v2544_v10, %v2543_v60 }
  0xe5   : > { %4082 = vmatmul.mubr.msk.bf16.gmra.mrb[24].mxu1 %vm237_vm1, %v5100_v45 }
  0xe6   : > { %4236 = vmatmul.mubr.msk.bf16.gmra.mrb[8].mxu0 %vm237_vm1, %v4960_v48  ;;  %4085 = vmatprep.mubr.msk.bf16.mxu1 %vm237_vm1, %v5112_v61  ;;  %v1646_v48 = vld [vmem:[#allocation2 + $0x128] sm:$0xff] }
  0xe7   : > { %4239 = vmatprep.mubr.msk.bf16.mxu0 %vm237_vm1, %v4981_v0  ;;  %v1647_v0 = vld [vmem:[#allocation2 + $0x130] sm:$0xff] }
  0xed   : > { %4086 = vmatmul.mubr.msk.bf16.gmra.mrb[28].mxu1 %vm237_vm1, %v5116_v5 }
  0xee   : > { %4240 = vmatmul.mubr.msk.bf16.gmra.mrb[12].mxu0 %vm237_vm1, %v4998_v20  ;;  %4091 = vmatprep.mubr.msk.bf16.mxu1 %vm237_vm1, %v5069_v18  ;;  %v1670_v20 = vpack.c.bf16 %v1647_v0, %v1646_v48 }
  0xef   : > { %4243 = vmatprep.mubr.msk.bf16.mxu0 %vm237_vm1, %v5003_v23  ;;  %v1649_v23 = vld [vmem:[#allocation2 + $0x150] sm:$0xff] }
  0xf5   : > { %4092 = vmatmul.mubr.msk.bf16.vlgmr.msra.gmra.mrb[0].mxu1 %vm237_vm1, %v5075_v25 }
  0xf6   : > { %4294 = vmatpush3.bf16.msra.mxu1 %v4631_v3  ;;  %4244 = vmatmul.mubr.msk.bf16.gmra.mrb[16].mxu0 %vm237_vm1, %v5024_v34  ;;  %v2541_v3 = vld [vmem:[#allocation2 + $0x208] sm:$0xff]  ;;  %v1651_v34 = vld [vmem:[#allocation2 + $0x170] sm:$0xff] }
  0xf7   : > { %4095 = vmatprep.mubr.msk.bf16.mxu1 %vm237_vm1, %v5094_v42  ;;  %4247 = vmatprep.mubr.msk.bf16.mxu0 %vm237_vm1, %v5028_v36  ;;  %v2559_v41 = vpack.c.bf16 %v2542_v40, %v2541_v3 }
  0xfd   : > { %4096 = vmatmul.mubr.msk.bf16.gmra.mrb[4].mxu1 %vm237_vm1, %v5098_v44 }
  0xfe   : > { %4248 = vmatmul.mubr.msk.bf16.gmra.mrb[20].mxu0 %vm237_vm1, %v5040_v51  ;;  %4099 = vmatprep.mubr.msk.bf16.mxu1 %vm237_vm1, %v5110_v59 }
  0xff   : > { %4251 = vmatprep.mubr.msk.bf16.mxu0 %vm237_vm1, %v5044_v9 }
 0x105   : > { %4100 = vmatmul.mubr.msk.bf16.gmra.mrb[8].mxu1 %vm237_vm1, %v5114_v62 }
 0x106   : > { %4252 = vmatmul.mubr.msk.bf16.gmra.mrb[24].mxu0 %vm237_vm1, %v5056_v63  ;;  %4103 = vmatprep.mubr.msk.bf16.mxu1 %vm237_vm1, %v5126_v16 }
 0x107   : > { %4255 = vmatprep.mubr.msk.bf16.mxu0 %vm237_vm1, %v2559_v41 }
 0x10d   : > { %4104 = vmatmul.mubr.msk.bf16.gmra.mrb[12].mxu1 %vm237_vm1, %v5130_v21 }
 0x10e   : > { %4256 = vmatmul.mubr.msk.bf16.gmra.mrb[28].mxu0 %vm237_vm1, %v2560_v37  ;;  %4107 = vmatprep.mubr.msk.bf16.mxu1 %vm237_vm1, %v5140_v31 }
 0x10f   : > { %4261 = vmatprep.mubr.msk.bf16.mxu0 %vm237_vm1, %v5001_v22  ;;  %v1648_v22 = vld [vmem:[#allocation2 + $0x148] sm:$0xff] }
 0x115   : > { %4108 = vmatmul.mubr.msk.bf16.gmra.mrb[16].mxu1 %vm237_vm1, %v5142_v32 }
 0x116   : > { %4262 = vmatmul.mubr.msk.bf16.vlgmr.msra.gmra.mrb[0].mxu0 %vm237_vm1, %v5005_v24  ;;  %4111 = vmatprep.mubr.msk.bf16.mxu1 %vm237_vm1, %v5158_v55  ;;  %v1650_v24 = vld [vmem:[#allocation2 + $0x168] sm:$0xff] }
 0x117   : > { %4265 = vmatprep.mubr.msk.bf16.mxu0 %vm237_vm1, %v5026_v35  ;;  %v1671_v35 = vpack.c.bf16 %v1649_v23, %v1648_v22 }
 0x11d   : > { %4112 = vmatmul.mubr.msk.bf16.gmra.mrb[20].mxu1 %vm237_vm1, %v5160_v56 }
 0x11e   : > { %4266 = vmatmul.mubr.msk.bf16.gmra.mrb[4].mxu0 %vm237_vm1, %v5030_v38  ;;  %4115 = vmatprep.mubr.msk.bf16.mxu1 %vm237_vm1, %v5170_v12  ;;  %v1672_v38 = vpack.c.bf16 %v1651_v34, %v1650_v24 }
 0x11f   : > { %4269 = vmatprep.mubr.msk.bf16.mxu0 %vm237_vm1, %v5042_v52  ;;  %v2838_v52 = vld [vmem:[#allocation2 + $0x231] sm:$0xff] }
 0x125   : > { %4116 = vmatmul.mubr.msk.bf16.gmra.mrb[24].mxu1 %vm237_vm1, %v5172_v13 }
 0x126   : > { %4270 = vmatmul.mubr.msk.bf16.gmra.mrb[8].mxu0 %vm237_vm1, %v5046_v54  ;;  %4119 = vmatprep.mubr.msk.bf16.mxu1 %vm237_vm1, %v5182_v46 }
 0x127   : > { %4273 = vmatprep.mubr.msk.bf16.mxu0 %vm237_vm1, %v5058_v2 }
 0x12d   : > { %4120 = vmatmul.mubr.msk.bf16.gmra.mrb[28].mxu1 %vm237_vm1, %v5211_v33 }
 0x12e   : > { %4274 = vmatmul.mubr.msk.bf16.gmra.mrb[12].mxu0 %vm237_vm1, %v5060_v6  ;;  %4141 = vmatprep.mubr.msk.bf16.mxu1 %vm237_vm1, %v1670_v20 }
 0x12f   : > { %4277 = vmatprep.mubr.msk.bf16.mxu0 %vm237_vm1, %v5071_v19 }
 0x135   : > { %4142 = vmatmul.mubr.msk.bf16.vlgmr.msra.gmra.mrb[16].mxu1 %vm237_vm1, %v1671_v35 }
 0x136   : > { %4278 = vmatmul.mubr.msk.bf16.gmra.mrb[16].mxu0 %vm237_vm1, %v5077_v27  ;;  %4145 = vmatprep.mubr.msk.bf16.mxu1 %vm237_vm1, %v1672_v38 }
 0x137   : > { %4281 = vmatprep.mubr.msk.bf16.mxu0 %vm237_vm1, %v5096_v43 }
 0x13d   : > { %4146 = vmatmul.mubr.msk.bf16.gmra.mrb[20].mxu1 %vm237_vm1, %v5028_v36  ;;  %v2837_v36 = vld [vmem:[#allocation2 + $0x229] sm:$0xff] }
 0x13e   : > { %4282 = vmatmul.mubr.msk.bf16.gmra.mrb[20].mxu0 %vm237_vm1, %v5100_v45  ;;  %4149 = vmatprep.mubr.msk.bf16.mxu1 %vm237_vm1, %v5040_v51  ;;  %v2854_v54 = vpack.c.bf16 %v2838_v52, %v2837_v36 }
 0x13f   : > { %4285 = vmatprep.mubr.msk.bf16.mxu0 %vm237_vm1, %v5112_v61 }
 0x145   : > { %4150 = vmatmul.mubr.msk.bf16.gmra.mrb[24].mxu1 %vm237_vm1, %v5044_v9 }
 0x146   : > { %4286 = vmatmul.mubr.msk.bf16.gmra.mrb[24].mxu0 %vm237_vm1, %v5116_v5  ;;  %4153 = vmatprep.mubr.msk.bf16.mxu1 %vm237_vm1, %v5056_v63 }
 0x147   : > { %4289 = vmatprep.mubr.msk.bf16.mxu0 %vm237_vm1, %v5128_v17 }
 0x14d   : > { %4154 = vmatmul.mubr.msk.bf16.gmra.mrb[28].mxu1 %vm237_vm1, %v2559_v41 }
 0x14e   : > { %4290 = vmatmul.mubr.msk.bf16.gmra.mrb[28].mxu0 %vm237_vm1, %v2854_v54 }
 0x1c8   : > { %v4093_v51 = vpop.f32.mrb[0].mxu1 }
 0x1c9   : > { %v1471_v2 = vpop.f32.mrb[1].mxu1 }
 0x1ca   : > { %v4094_v6 = vpop.f32.mrb[2].mxu1 }
 0x1cb   : > { %v1474_v9 = vpop.f32.mrb[3].mxu1 }
 0x1d0   : > { %v4097_v18 = vpop.f32.mrb[4].mxu1 }
 0x1d1   : > { %v1487_v19 = vpop.f32.mrb[5].mxu1 }
 0x1d2   : > { %v4098_v25 = vpop.f32.mrb[6].mxu1 }
 0x1d3   : > { %v1490_v27 = vpop.f32.mrb[7].mxu1 }
 0x1d8   : > { %v5347_v63 = vpop.f32.mrb[8].mxu1 }
 0x1d9   : > { %v5349_v42 = vpop.f32.mrb[9].mxu1 }
 0x1da   : > { %v5351_v43 = vpop.f32.mrb[10].mxu1 }
 0x1db   : > { %v5353_v44 = vpop.f32.mrb[11].mxu1 }
 0x1e0   : > { %v5355_v45 = vpop.f32.mrb[12].mxu1 }
 0x1e1   : > { %v5357_v59 = vpop.f32.mrb[13].mxu1 }
 0x1e2   : > { %v5359_v61 = vpop.f32.mrb[14].mxu1 }
 0x1e3   : > { %v5361_v62 = vpop.f32.mrb[15].mxu1 }
 0x1e9   : > { %v4263_v5 = vpop.f32.mrb[0].mxu0 }
 0x1ea   : > { %v4295_v16 = vadd.f32 %v4263_v5, %v4093_v51  ;;  %v2942_v17 = vpop.f32.mrb[1].mxu0 }
 0x1eb   : > { %v4296_v21 = vadd.f32 %v2942_v17, %v1471_v2  ;;  %v4264_v31 = vpop.f32.mrb[2].mxu0 }
 0x1ec   : > { %v3725_v32 = vpack.c.bf16 %v4295_v16, %v4295_v16  ;;  %v4297_v39 = vadd.f32 %v4264_v31, %v4094_v6  ;;  %v2945_v50 = vpop.f32.mrb[3].mxu0  ;;  %v3172_v58 = vmul.f32 %v4295_v16, %v4295_v16  ;;  %v3104_v29 = vsel %vm237_vm1, %v4295_v16, 0.0 }
 0x1ed   : > { %v3170_v55 = vmul.f32 %v4296_v21, %v4296_v21  ;;  %v3723_v56 = vpack.c.bf16 %v4296_v21, %v4296_v21  ;;  %v4298_v57 = vadd.f32 %v2945_v50, %v1474_v9  ;;  %v3101_v8 = vsel %vm237_vm1, %v4296_v21, 0.0 }
 0x1ee   : > { %3407 = vst.msk [vmem:[%s5368_s26 + $0x8] sm:$0xf] %vm3404_vm3, %v3725_v32  ;;  %v3726_v11 = vpack.c.bf16 %v4297_v39, %v4297_v39  ;;  %v3173_v15 = vmul.f32 %v4297_v39, %v4297_v39  ;;  %v3205_v47 = vsel %vm237_vm1, %v3172_v58, 0.0  ;;  %v3106_v3 = vsel %vm237_vm1, %v4297_v39, 0.0 }
 0x1ef   : > { %3405 = vst.msk [vmem:[%s5368_s26] sm:$0xf] %vm3404_vm3, %v3723_v56  ;;  %v3102_v12 = vsel %vm237_vm1, %v4298_v57, 0.0  ;;  %v3171_v13 = vmul.f32 %v4298_v57, %v4298_v57  ;;  %v3724_v14 = vpack.c.bf16 %v4298_v57, %v4298_v57  ;;  %v3202_v46 = vsel %vm237_vm1, %v3170_v55, 0.0 }
 0x1f0   : > { %3408 = vst.msk [vmem:[%s5368_s26 + $0xc] sm:$0xf] %vm3404_vm3, %v3726_v11  ;;  %v3103_v7 = vadd.f32 %v3102_v12, %v3101_v8  ;;  %v3207_v40 = vsel %vm237_vm1, %v3173_v15, 0.0 }
 0x1f1   : > { %v3203_v30 = vsel %vm237_vm1, %v3171_v13, 0.0  ;;  %3406 = vst.msk [vmem:[%s5368_s26 + $0x4] sm:$0xf] %vm3404_vm3, %v3724_v14  ;;  %v4267_v53 = vpop.f32.mrb[4].mxu0 }
 0x1f2   : > { %v3105_v4 = vadd.f32 %v3104_v29, %v3103_v7  ;;  %v3204_v28 = vadd.f32 %v3203_v30, %v3202_v46  ;;  %v4299_v33 = vadd.f32 %v4267_v53, %v4097_v18  ;;  %v2958_v1 = vpop.f32.mrb[5].mxu0 }
 0x1f3   : > { %v4300_v49 = vadd.f32 %v2958_v1, %v1487_v19  ;;  %v4268_v26 = vpop.f32.mrb[6].mxu0 }
 0x1f4   : > { %v3206_v41 = vadd.f32 %v3205_v47, %v3204_v28  ;;  %v3729_v60 = vpack.c.bf16 %v4299_v33, %v4299_v33  ;;  %v2961_v10 = vpop.f32.mrb[7].mxu0  ;;  %v3107_v37 = vadd.f32 %v3106_v3, %v3105_v4  ;;  %v4301_v23 = vadd.f32 %v4268_v26, %v4098_v25 }
 0x1f5   : > { %v3108_v48 = vsel %vm237_vm1, %v4300_v49, 0.0  ;;  %v3174_v0 = vmul.f32 %v4300_v49, %v4300_v49  ;;  %v3727_v20 = vpack.c.bf16 %v4300_v49, %v4300_v49  ;;  %v4302_v24 = vadd.f32 %v2961_v10, %v1490_v27 }
 0x1f6   : > { %3411 = vst.msk [vmem:[%s5368_s26 + $0x18] sm:$0xf] %vm3404_vm3, %v3729_v60  ;;  %v3208_v22 = vadd.f32 %v3207_v40, %v3206_v41  ;;  %v3109_v34 = vadd.f32 %v3108_v48, %v3107_v37  ;;  %v3176_v38 = vmul.f32 %v4299_v33, %v4299_v33  ;;  %v3730_v52 = vpack.c.bf16 %v4301_v23, %v4301_v23 }
 0x1f7   : > { %v3209_v35 = vsel %vm237_vm1, %v3174_v0, 0.0  ;;  %3409 = vst.msk [vmem:[%s5368_s26 + $0x10] sm:$0xf] %vm3404_vm3, %v3727_v20  ;;  %v3110_v54 = vsel %vm237_vm1, %v4302_v24, 0.0  ;;  %v3175_v51 = vmul.f32 %v4302_v24, %v4302_v24  ;;  %v3728_v2 = vpack.c.bf16 %v4302_v24, %v4302_v24 }
 0x1f8   : > { %v3210_v36 = vadd.f32 %v3209_v35, %v3208_v22  ;;  %3412 = vst.msk [vmem:[%s5368_s26 + $0x1c] sm:$0xf] %vm3404_vm3, %v3730_v52  ;;  %v3111_v9 = vadd.f32 %v3110_v54, %v3109_v34  ;;  %v3112_v25 = vsel %vm237_vm1, %v4299_v33, 0.0  ;;  %v3177_v27 = vmul.f32 %v4301_v23, %v4301_v23 }
 0x1f9   : > { %v4271_v6 = vpop.f32.mrb[8].mxu0  ;;  %v3211_v5 = vsel %vm237_vm1, %v3175_v51, 0.0  ;;  %3410 = vst.msk [vmem:[%s5368_s26 + $0x14] sm:$0xf] %vm3404_vm3, %v3728_v2  ;;  %v3213_v21 = vsel %vm237_vm1, %v3176_v38, 0.0  ;;  %v3114_v31 = vsel %vm237_vm1, %v4301_v23, 0.0 }
 0x1fa   : > { %v4303_v18 = vadd.f32 %v4271_v6, %v5347_v63  ;;  %v2974_v19 = vpop.f32.mrb[9].mxu0  ;;  %v3113_v32 = vadd.f32 %v3112_v25, %v3111_v9  ;;  %v3212_v39 = vadd.f32 %v3211_v5, %v3210_v36 }
 0x1fb   : > { %v4304_v16 = vadd.f32 %v2974_v19, %v5349_v42  ;;  %v4272_v17 = vpop.f32.mrb[10].mxu0  ;;  %v3215_v42 = vsel %vm237_vm1, %v3177_v27, 0.0 }
 0x1fc   : > { %v2977_v63 = vpop.f32.mrb[11].mxu0  ;;  %v3733_v50 = vpack.c.bf16 %v4303_v18, %v4303_v18  ;;  %v3214_v58 = vadd.f32 %v3213_v21, %v3212_v39  ;;  %v3115_v11 = vadd.f32 %v3114_v31, %v3113_v32  ;;  %v4305_v8 = vadd.f32 %v4272_v17, %v5351_v43 }
 0x1fd   : > { %v3116_v55 = vsel %vm237_vm1, %v4304_v16, 0.0  ;;  %v3178_v56 = vmul.f32 %v4304_v16, %v4304_v16  ;;  %v3731_v57 = vpack.c.bf16 %v4304_v16, %v4304_v16  ;;  %v4306_v13 = vadd.f32 %v2977_v63, %v5353_v44 }
 0x1fe   : > { %3415 = vst.msk [vmem:[%s5368_s26 + $0x28] sm:$0xf] %vm3404_vm3, %v3733_v50  ;;  %v3180_v14 = vmul.f32 %v4303_v18, %v4303_v18  ;;  %v3117_v15 = vadd.f32 %v3116_v55, %v3115_v11  ;;  %v3216_v7 = vadd.f32 %v3215_v42, %v3214_v58  ;;  %v3734_v29 = vpack.c.bf16 %v4305_v8, %v4305_v8 }
 0x1ff   : > { %v3217_v12 = vsel %vm237_vm1, %v3178_v56, 0.0  ;;  %3413 = vst.msk [vmem:[%s5368_s26 + $0x20] sm:$0xf] %vm3404_vm3, %v3731_v57  ;;  %v3118_v46 = vsel %vm237_vm1, %v4306_v13, 0.0  ;;  %v3179_v30 = vmul.f32 %v4306_v13, %v4306_v13  ;;  %v3732_v43 = vpack.c.bf16 %v4306_v13, %v4306_v13 }
 0x200   : > { %v3218_v4 = vadd.f32 %v3217_v12, %v3216_v7  ;;  %v3119_v28 = vadd.f32 %v3118_v46, %v3117_v15  ;;  %v3120_v47 = vsel %vm237_vm1, %v4303_v18, 0.0  ;;  %v3181_v49 = vmul.f32 %v4305_v8, %v4305_v8  ;;  %3416 = vst.msk [vmem:[%s5368_s26 + $0x2c] sm:$0xf] %vm3404_vm3, %v3734_v29 }
 0x201   : > { %v4275_v53 = vpop.f32.mrb[12].mxu0  ;;  %v3219_v44 = vsel %vm237_vm1, %v3179_v30, 0.0  ;;  %3414 = vst.msk [vmem:[%s5368_s26 + $0x24] sm:$0xf] %vm3404_vm3, %v3732_v43  ;;  %v3221_v40 = vsel %vm237_vm1, %v3180_v14, 0.0  ;;  %v3122_v41 = vsel %vm237_vm1, %v4305_v8, 0.0 }
 0x202   : > { %v4307_v33 = vadd.f32 %v4275_v53, %v5355_v45  ;;  %v2990_v1 = vpop.f32.mrb[13].mxu0  ;;  %v3121_v45 = vadd.f32 %v3120_v47, %v3119_v28  ;;  %v3220_v60 = vadd.f32 %v3219_v44, %v3218_v4 }
 0x203   : > { %v4308_v26 = vadd.f32 %v2990_v1, %v5357_v59  ;;  %v4276_v3 = vpop.f32.mrb[14].mxu0  ;;  %v3223_v59 = vsel %vm237_vm1, %v3181_v49, 0.0 }
 0x204   : > { %v2993_v10 = vpop.f32.mrb[15].mxu0  ;;  %v3737_v37 = vpack.c.bf16 %v4307_v33, %v4307_v33  ;;  %v3222_v22 = vadd.f32 %v3221_v40, %v3220_v60  ;;  %v3123_v23 = vadd.f32 %v3122_v41, %v3121_v45  ;;  %v4309_v24 = vadd.f32 %v4276_v3, %v5359_v61 }
 0x205   : > { %v3124_v48 = vsel %vm237_vm1, %v4308_v26, 0.0  ;;  %v3182_v0 = vmul.f32 %v4308_v26, %v4308_v26  ;;  %v3735_v20 = vpack.c.bf16 %v4308_v26, %v4308_v26  ;;  %v4310_v35 = vadd.f32 %v2993_v10, %v5361_v62 }
 0x206   : > { %3419 = vst.msk [vmem:[%s5368_s26 + $0x38] sm:$0xf] %vm3404_vm3, %v3737_v37  ;;  %v3184_v38 = vmul.f32 %v4307_v33, %v4307_v33  ;;  %v3125_v36 = vadd.f32 %v3124_v48, %v3123_v23  ;;  %v3224_v52 = vadd.f32 %v3223_v59, %v3222_v22  ;;  %v3738_v51 = vpack.c.bf16 %v4309_v24, %v4309_v24 }
 0x207   : > { %v3225_v34 = vsel %vm237_vm1, %v3182_v0, 0.0  ;;  %3417 = vst.msk [vmem:[%s5368_s26 + $0x30] sm:$0xf] %vm3404_vm3, %v3735_v20  ;;  %v3126_v2 = vsel %vm237_vm1, %v4310_v35, 0.0  ;;  %v3183_v61 = vmul.f32 %v4310_v35, %v4310_v35  ;;  %v3736_v6 = vpack.c.bf16 %v4310_v35, %v4310_v35 }
 0x208   : > { %v4143_v54 = vpop.f32.mrb[16].mxu1  ;;  %v3226_v19 = vadd.f32 %v3225_v34, %v3224_v52  ;;  %v3127_v25 = vadd.f32 %v3126_v2, %v3125_v36  ;;  %v3128_v62 = vsel %vm237_vm1, %v4307_v33, 0.0  ;;  %v3185_v17 = vmul.f32 %v4309_v24, %v4309_v24  ;;  %3420 = vst.msk [vmem:[%s5368_s26 + $0x3c] sm:$0xf] %vm3404_vm3, %v3738_v51 }
 0x209   : > { %v1829_v9 = vpop.f32.mrb[17].mxu1  ;;  %v4279_v18 = vpop.f32.mrb[16].mxu0  ;;  %v3227_v21 = vsel %vm237_vm1, %v3183_v61, 0.0  ;;  %3418 = vst.msk [vmem:[%s5368_s26 + $0x34] sm:$0xf] %vm3404_vm3, %v3736_v6  ;;  %v3229_v63 = vsel %vm237_vm1, %v3184_v38, 0.0 }
 0x20a   : > { %v4311_v27 = vadd.f32 %v4279_v18, %v4143_v54  ;;  %v4144_v5 = vpop.f32.mrb[18].mxu1  ;;  %v3006_v16 = vpop.f32.mrb[17].mxu0  ;;  %v3130_v50 = vsel %vm237_vm1, %v4309_v24, 0.0  ;;  %v3129_v55 = vadd.f32 %v3128_v62, %v3127_v25  ;;  %v3228_v56 = vadd.f32 %v3227_v21, %v3226_v19 }
 0x20b   : > { %v4312_v31 = vadd.f32 %v3006_v16, %v1829_v9  ;;  %v1832_v32 = vpop.f32.mrb[19].mxu1  ;;  %v4280_v39 = vpop.f32.mrb[18].mxu0  ;;  %v3231_v15 = vsel %vm237_vm1, %v3185_v17, 0.0 }
 0x20c   : > { %v3009_v57 = vpop.f32.mrb[19].mxu0  ;;  %v3741_v58 = vpack.c.bf16 %v4311_v27, %v4311_v27  ;;  %v3230_v12 = vadd.f32 %v3229_v63, %v3228_v56  ;;  %v3131_v13 = vadd.f32 %v3130_v50, %v3129_v55  ;;  %v4313_v14 = vadd.f32 %v4280_v39, %v4144_v5 }
 0x20d   : > { %v3132_v11 = vsel %vm237_vm1, %v4312_v31, 0.0  ;;  %v3186_v8 = vmul.f32 %v4312_v31, %v4312_v31  ;;  %v3739_v42 = vpack.c.bf16 %v4312_v31, %v4312_v31  ;;  %v4314_v29 = vadd.f32 %v3009_v57, %v1832_v32 }
 0x20e   : > { %3423 = vst.msk [vmem:[%s5368_s26 + $0x48] sm:$0xf] %vm3404_vm3, %v3741_v58  ;;  %v3188_v46 = vmul.f32 %v4311_v27, %v4311_v27  ;;  %v3133_v30 = vadd.f32 %v3132_v11, %v3131_v13  ;;  %v3232_v43 = vadd.f32 %v3231_v15, %v3230_v12  ;;  %v3742_v4 = vpack.c.bf16 %v4313_v14, %v4313_v14 }
 0x20f   : > { %v3233_v7 = vsel %vm237_vm1, %v3186_v8, 0.0  ;;  %3421 = vst.msk [vmem:[%s5368_s26 + $0x40] sm:$0xf] %vm3404_vm3, %v3739_v42  ;;  %v3134_v28 = vsel %vm237_vm1, %v4314_v29, 0.0  ;;  %v3187_v33 = vmul.f32 %v4314_v29, %v4314_v29  ;;  %v3740_v1 = vpack.c.bf16 %v4314_v29, %v4314_v29 }
 0x210   : > { %v4147_v53 = vpop.f32.mrb[20].mxu1  ;;  %v3234_v44 = vadd.f32 %v3233_v7, %v3232_v43  ;;  %v3135_v26 = vadd.f32 %v3134_v28, %v3133_v30  ;;  %v3136_v45 = vsel %vm237_vm1, %v4311_v27, 0.0  ;;  %v3189_v60 = vmul.f32 %v4313_v14, %v4313_v14  ;;  %3424 = vst.msk [vmem:[%s5368_s26 + $0x4c] sm:$0xf] %vm3404_vm3, %v3742_v4 }
 0x211   : > { %v1845_v47 = vpop.f32.mrb[21].mxu1  ;;  %v4283_v49 = vpop.f32.mrb[20].mxu0  ;;  %v3235_v10 = vsel %vm237_vm1, %v3187_v33, 0.0  ;;  %3422 = vst.msk [vmem:[%s5368_s26 + $0x44] sm:$0xf] %vm3404_vm3, %v3740_v1  ;;  %v3237_v20 = vsel %vm237_vm1, %v3188_v46, 0.0 }
 0x212   : > { %v4315_v3 = vadd.f32 %v4283_v49, %v4147_v53  ;;  %v4148_v40 = vpop.f32.mrb[22].mxu1  ;;  %v3022_v41 = vpop.f32.mrb[21].mxu0  ;;  %v3138_v22 = vsel %vm237_vm1, %v4313_v14, 0.0  ;;  %v3137_v23 = vadd.f32 %v3136_v45, %v3135_v26  ;;  %v3236_v24 = vadd.f32 %v3235_v10, %v3234_v44 }
 0x213   : > { %v4316_v37 = vadd.f32 %v3022_v41, %v1845_v47  ;;  %v1848_v48 = vpop.f32.mrb[23].mxu1  ;;  %v4284_v0 = vpop.f32.mrb[22].mxu0  ;;  %v3239_v2 = vsel %vm237_vm1, %v3189_v60, 0.0 }
 0x214   : > { %v3025_v59 = vpop.f32.mrb[23].mxu0  ;;  %v3745_v34 = vpack.c.bf16 %v4315_v3, %v4315_v3  ;;  %v3238_v52 = vadd.f32 %v3237_v20, %v3236_v24  ;;  %v3139_v54 = vadd.f32 %v3138_v22, %v3137_v23  ;;  %v4317_v51 = vadd.f32 %v4284_v0, %v4148_v40 }
 0x215   : > { %v3140_v35 = vsel %vm237_vm1, %v4316_v37, 0.0  ;;  %v3190_v38 = vmul.f32 %v4316_v37, %v4316_v37  ;;  %v3743_v36 = vpack.c.bf16 %v4316_v37, %v4316_v37  ;;  %v4318_v6 = vadd.f32 %v3025_v59, %v1848_v48 }
 0x216   : > { %3427 = vst.msk [vmem:[%s5368_s26 + $0x58] sm:$0xf] %vm3404_vm3, %v3745_v34  ;;  %v3192_v9 = vmul.f32 %v4315_v3, %v4315_v3  ;;  %v3141_v18 = vadd.f32 %v3140_v35, %v3139_v54  ;;  %v3240_v19 = vadd.f32 %v3239_v2, %v3238_v52  ;;  %v3746_v27 = vpack.c.bf16 %v4317_v51, %v4317_v51 }
 0x217   : > { %v3241_v61 = vsel %vm237_vm1, %v3190_v38, 0.0  ;;  %3425 = vst.msk [vmem:[%s5368_s26 + $0x50] sm:$0xf] %vm3404_vm3, %v3743_v36  ;;  %v3142_v5 = vsel %vm237_vm1, %v4318_v6, 0.0  ;;  %v3191_v16 = vmul.f32 %v4318_v6, %v4318_v6  ;;  %v3744_v62 = vpack.c.bf16 %v4318_v6, %v4318_v6 }
 0x218   : > { %v4151_v25 = vpop.f32.mrb[24].mxu1  ;;  %v3242_v31 = vadd.f32 %v3241_v61, %v3240_v19  ;;  %v3143_v32 = vadd.f32 %v3142_v5, %v3141_v18  ;;  %v3144_v55 = vsel %vm237_vm1, %v4315_v3, 0.0  ;;  %v3193_v56 = vmul.f32 %v4317_v51, %v4317_v51  ;;  %3428 = vst.msk [vmem:[%s5368_s26 + $0x5c] sm:$0xf] %vm3404_vm3, %v3746_v27 }
 0x219   : > { %v1861_v17 = vpop.f32.mrb[25].mxu1  ;;  %v4287_v21 = vpop.f32.mrb[24].mxu0  ;;  %v3243_v57 = vsel %vm237_vm1, %v3191_v16, 0.0  ;;  %3426 = vst.msk [vmem:[%s5368_s26 + $0x54] sm:$0xf] %vm3404_vm3, %v3744_v62  ;;  %v3245_v42 = vsel %vm237_vm1, %v3192_v9, 0.0 }
 0x21a   : > { %v4319_v39 = vadd.f32 %v4287_v21, %v4151_v25  ;;  %v4152_v63 = vpop.f32.mrb[26].mxu1  ;;  %v3038_v50 = vpop.f32.mrb[25].mxu0  ;;  %v3146_v12 = vsel %vm237_vm1, %v4317_v51, 0.0  ;;  %v3145_v13 = vadd.f32 %v3144_v55, %v3143_v32  ;;  %v3244_v14 = vadd.f32 %v3243_v57, %v3242_v31 }
 0x21b   : > { %v4320_v58 = vadd.f32 %v3038_v50, %v1861_v17  ;;  %v1864_v11 = vpop.f32.mrb[27].mxu1  ;;  %v4288_v8 = vpop.f32.mrb[26].mxu0  ;;  %v3247_v28 = vsel %vm237_vm1, %v3193_v56, 0.0 }
 0x21c   : > { %v3041_v15 = vpop.f32.mrb[27].mxu0  ;;  %v3749_v7 = vpack.c.bf16 %v4319_v39, %v4319_v39  ;;  %v3246_v43 = vadd.f32 %v3245_v42, %v3244_v14  ;;  %v3147_v53 = vadd.f32 %v3146_v12, %v3145_v13  ;;  %v4321_v4 = vadd.f32 %v4288_v8, %v4152_v63 }
 0x21d   : > { %v3148_v29 = vsel %vm237_vm1, %v4320_v58, 0.0  ;;  %v3194_v46 = vmul.f32 %v4320_v58, %v4320_v58  ;;  %v3747_v30 = vpack.c.bf16 %v4320_v58, %v4320_v58  ;;  %v4322_v1 = vadd.f32 %v3041_v15, %v1864_v11 }
 0x21e   : > { %3431 = vst.msk [vmem:[%s5368_s26 + $0x68] sm:$0xf] %vm3404_vm3, %v3749_v7  ;;  %v3196_v47 = vmul.f32 %v4319_v39, %v4319_v39  ;;  %v3149_v49 = vadd.f32 %v3148_v29, %v3147_v53  ;;  %v3248_v44 = vadd.f32 %v3247_v28, %v3246_v43  ;;  %v3750_v3 = vpack.c.bf16 %v4321_v4, %v4321_v4 }
 0x21f   : > { %v3249_v33 = vsel %vm237_vm1, %v3194_v46, 0.0  ;;  %3429 = vst.msk [vmem:[%s5368_s26 + $0x60] sm:$0xf] %vm3404_vm3, %v3747_v30  ;;  %v3150_v40 = vsel %vm237_vm1, %v4322_v1, 0.0  ;;  %v3195_v41 = vmul.f32 %v4322_v1, %v4322_v1  ;;  %v3748_v45 = vpack.c.bf16 %v4322_v1, %v4322_v1 }
 0x220   : > { %v4155_v26 = vpop.f32.mrb[28].mxu1  ;;  %v3250_v37 = vadd.f32 %v3249_v33, %v3248_v44  ;;  %v3151_v48 = vadd.f32 %v3150_v40, %v3149_v49  ;;  %v3152_v23 = vsel %vm237_vm1, %v4319_v39, 0.0  ;;  %v3197_v24 = vmul.f32 %v4321_v4, %v4321_v4  ;;  %3432 = vst.msk [vmem:[%s5368_s26 + $0x6c] sm:$0xf] %vm3404_vm3, %v3750_v3 }
 0x221   : > { %v1877_v60 = vpop.f32.mrb[29].mxu1  ;;  %v4291_v10 = vpop.f32.mrb[28].mxu0  ;;  %v3251_v59 = vsel %vm237_vm1, %v3195_v41, 0.0  ;;  %3430 = vst.msk [vmem:[%s5368_s26 + $0x64] sm:$0xf] %vm3404_vm3, %v3748_v45  ;;  %v3253_v36 = vsel %vm237_vm1, %v3196_v47, 0.0 }
 0x222   : > { %v4323_v0 = vadd.f32 %v4291_v10, %v4155_v26  ;;  %v4156_v20 = vpop.f32.mrb[30].mxu1  ;;  %v3054_v22 = vpop.f32.mrb[29].mxu0  ;;  %v3154_v52 = vsel %vm237_vm1, %v4321_v4, 0.0  ;;  %v3153_v54 = vadd.f32 %v3152_v23, %v3151_v48  ;;  %v3252_v51 = vadd.f32 %v3251_v59, %v3250_v37 }
 0x223   : > { %v4324_v34 = vadd.f32 %v3054_v22, %v1877_v60  ;;  %v1880_v35 = vpop.f32.mrb[31].mxu1  ;;  %v4292_v38 = vpop.f32.mrb[30].mxu0  ;;  %v3255_v5 = vsel %vm237_vm1, %v3197_v24, 0.0 }
 0x224   : > { %v3057_v2 = vpop.f32.mrb[31].mxu0  ;;  %v3753_v61 = vpack.c.bf16 %v4323_v0, %v4323_v0  ;;  %v3254_v19 = vadd.f32 %v3253_v36, %v3252_v51  ;;  %v3155_v25 = vadd.f32 %v3154_v52, %v3153_v54  ;;  %v4325_v27 = vadd.f32 %v4292_v38, %v4156_v20 }
 0x225   : > { %v3156_v6 = vsel %vm237_vm1, %v4324_v34, 0.0  ;;  %v3198_v9 = vmul.f32 %v4324_v34, %v4324_v34  ;;  %v3751_v18 = vpack.c.bf16 %v4324_v34, %v4324_v34  ;;  %v4326_v62 = vadd.f32 %v3057_v2, %v1880_v35 }
 0x226   : > { %3435 = vst.msk [vmem:[%s5368_s26 + $0x78] sm:$0xf] %vm3404_vm3, %v3753_v61  ;;  %v3200_v17 = vmul.f32 %v4323_v0, %v4323_v0  ;;  %v3157_v21 = vadd.f32 %v3156_v6, %v3155_v25  ;;  %v3256_v31 = vadd.f32 %v3255_v5, %v3254_v19  ;;  %v3754_v32 = vpack.c.bf16 %v4325_v27, %v4325_v27 }
 0x227   : > { %v3257_v16 = vsel %vm237_vm1, %v3198_v9, 0.0  ;;  %3433 = vst.msk [vmem:[%s5368_s26 + $0x70] sm:$0xf] %vm3404_vm3, %v3751_v18  ;;  %v3158_v39 = vsel %vm237_vm1, %v4326_v62, 0.0  ;;  %v3199_v63 = vmul.f32 %v4326_v62, %v4326_v62  ;;  %v3752_v50 = vpack.c.bf16 %v4326_v62, %v4326_v62 }
 0x228   : > { %v3258_v55 = vadd.f32 %v3257_v16, %v3256_v31  ;;  %v3159_v56 = vadd.f32 %v3158_v39, %v3157_v21  ;;  %v3160_v57 = vsel %vm237_vm1, %v4323_v0, 0.0  ;;  %v3201_v58 = vmul.f32 %v4325_v27, %v4325_v27  ;;  %3436 = vst.msk [vmem:[%s5368_s26 + $0x7c] sm:$0xf] %vm3404_vm3, %v3754_v32 }
 0x229   : > { %v3259_v11 = vsel %vm237_vm1, %v3199_v63, 0.0  ;;  %3434 = vst.msk [vmem:[%s5368_s26 + $0x74] sm:$0xf] %vm3404_vm3, %v3752_v50  ;;  %v3261_v12 = vsel %vm237_vm1, %v3200_v17, 0.0  ;;  %v3162_v13 = vsel %vm237_vm1, %v4325_v27, 0.0 }
 0x22a   : > { %v3161_v8 = vadd.f32 %v3160_v57, %v3159_v56  ;;  %v3260_v42 = vadd.f32 %v3259_v11, %v3258_v55  ;;  %v3263_v7 = vsel %vm237_vm1, %v3201_v58, 0.0 }
 0x22c   : > { %v3163_v14 = vadd.f32 %v3162_v13, %v3161_v8  ;;  %v3262_v15 = vadd.f32 %v3261_v12, %v3260_v42 }
 0x22e   : > { %v3164_v29 = vrot.slane %v3163_v14, 4  ;;  %v3264_v46 = vadd.f32 %v3263_v7, %v3262_v15 }
 0x230   : > { %v3165_v30 = vadd.f32 %v3164_v29, %v3163_v14  ;;  %v3265_v43 = vrot.slane %v3264_v46, 4 }
 0x232   : > { %v3166_v53 = vrot.slane %v3165_v30, 2  ;;  %v3266_v4 = vadd.f32 %v3265_v43, %v3264_v46 }
 0x234   : > { %v3167_v28 = vadd.f32 %v3166_v53, %v3165_v30  ;;  %v3267_v33 = vrot.slane %v3266_v4, 2 }
 0x236   : > { %v3168_v1 = vrot.slane %v3167_v28, 1  ;;  %v3268_v47 = vadd.f32 %v3267_v33, %v3266_v4 }
 0x238   : > { %v3269_v49 = vrot.slane %v3268_v47, 1  ;;  %v3169_v44 = vadd.f32 %v3168_v1, %v3167_v28 }
 0x23a   : > { %v3270_v26 = vadd.f32 %v3269_v49, %v3268_v47 }
 0x23c   : > { %v3272_v3 = vsel %vm3271_vm4, %v3169_v44, %v3270_v26 }
 0x23d   : > { %v3274_v40 = vsel %vm3273_vm5, %v3272_v3, 0.0 }
 0x23e   : > { %3275 = vst.msk [vmem:[%s235_s30] sm:$0xff] %vm237_vm1, %v3274_v40 }
 0x23f PF: > { %s16_s18 = sadd.s32 1, %s4576_s18  }
 0x240   : > { %p13_p4 = scmp.ge.s32.totalorder %s16_s18, 4  }
 0x242   :  { %15 = sbr.rel (!%p13_p4) target bundleno = 1 (0x1), region = 88 }

</bundles_post_ra>
